<compile_context>
chip_gen: v7x
topology: tpu7x:2x2x1
jax: 0.10.0
libtpu: 0.0.40
codegen_flags: <defaults>
</compile_context>

<pallas_src>
import functools
import math

import jax
import jax.numpy as jnp
from jax.experimental import pallas as pl
from jax.experimental.pallas import tpu as pltpu


def fcghpn_kernel(adj_t_ref, x_ref, t2v_ref, inten_ref, sel_ref,
                  w1_ref, b1_ref, w2_ref, b2_ref,
                  wq_ref, wk_ref, wvo_ref, hm_ref, bo_ref, wio_ref,
                  pod_ref, slab_ref,
                  *, batch_tile, num_nodes, num_neighbors, num_heads, head_dim):
    Bt, N, K = batch_tile, num_nodes, num_neighbors
    nh, dh = num_heads, head_dim
    Hd = nh * dh
    f32 = jnp.float32
    bf16 = jnp.bfloat16

    adj_t = adj_t_ref[...]                  # (Bt, N, N); adj_t[b, j, i] = adj[b, i, j]

    # ---- F.softmax(adj_matrix[idx], dim=1) -> threshold 1e-8 -> binarize ----
    # Per-sample slice is (N, N) indexed [i, j]; torch dim=1 is the column
    # index j, which is axis 1 of the pre-transposed adj_t -> reduce over
    # axis 1 (keepdims (Bt, 1, N)).  csr_matrix -> dgl keeps only the sparsity
    # pattern, so the divide is folded into the threshold comparison.
    row_max = jnp.max(adj_t, axis=1, keepdims=True)          # over j, per (b, i)
    e_t = jnp.exp(adj_t - row_max)
    row_sum = jnp.sum(e_t, axis=1, keepdims=True)
    a_t = (e_t >= 1e-8 * row_sum).astype(f32)                # A^T, [dst j, src i]

    # ---- DGL GraphConv norm='both': H' = D_in^-1/2 A^T D_out^-1/2 H W + b ----
    d_out = jnp.sum(a_t, axis=1, keepdims=True)              # (Bt, 1, N) src out-deg
    d_in = jnp.sum(a_t, axis=2, keepdims=True)               # (Bt, N, 1) dst in-deg
    inv_out = jnp.where(d_out > 0, jax.lax.rsqrt(d_out), 0.0)
    inv_in = jnp.where(d_in > 0, jax.lax.rsqrt(d_in), 0.0)
    agg = (a_t * inv_in * inv_out).astype(bf16)              # (Bt, N, N), reused twice

    # TODO(synk): GCN class body is not in the reference file; a standard
    # 2-layer DGL GraphConv (norm='both', bias) -> ReLU -> GraphConv is assumed.
    f_in = x_ref.shape[-1]
    h_hid = w1_ref.shape[-1]
    g_out = w2_ref.shape[-1]
    x2 = x_ref[...].reshape(Bt * N, f_in).astype(bf16)
    xw1 = jnp.dot(x2, w1_ref[...], preferred_element_type=f32).reshape(Bt, N, h_hid)
    h1 = jnp.einsum('bji,bif->bjf', agg, xw1.astype(bf16),
                    preferred_element_type=f32) + b1_ref[...]
    h1 = jnp.maximum(h1, 0.0)
    h1w2 = jnp.dot(h1.reshape(Bt * N, h_hid).astype(bf16), w2_ref[...],
                   preferred_element_type=f32).reshape(Bt, N, g_out)
    h2 = jnp.einsum('bji,bif->bjf', agg, h1w2.astype(bf16),
                    preferred_element_type=f32) + b2_ref[...]

    # timeAndGcn_embedding = cat([gcn_out, time2vec], dim=-1)
    emb3 = jnp.concatenate([h2, t2v_ref[...]], axis=-1)       # (Bt, N, D)
    d_model = emb3.shape[-1]
    emb2 = emb3.reshape(Bt * N, d_model).astype(bf16)

    # ---- attention projections: three lane-aligned 2-D matmuls, no slicing ----
    # The (Hd, 1) output projection is folded into the V weights outside the
    # kernel (exact because att_output_size == 1), so V is (Bt*N, nh).
    q2 = jnp.dot(emb2, wq_ref[...], preferred_element_type=f32)    # (Bt*N, Hd)
    k2 = jnp.dot(emb2, wk_ref[...], preferred_element_type=f32)    # (Bt*N, Hd)
    v2 = jnp.dot(emb2, wvo_ref[...], preferred_element_type=f32)   # (Bt*N, nh)

    # ---- neighbour gather: batched one-hot matmuls, k-major rows ----
    sel_b = jnp.broadcast_to(sel_ref[...][None], (Bt, K * N, N))   # bf16
    k_g = jnp.einsum('bsn,bnf->bsf', sel_b, k2.reshape(Bt, N, Hd).astype(bf16),
                     preferred_element_type=f32)                   # (Bt, K*N, Hd)
    v_g = jnp.einsum('bsn,bnh->bsh', sel_b, v2.reshape(Bt, N, nh).astype(bf16),
                     preferred_element_type=f32)                   # (Bt, K*N, nh)

    # TODO(synk): MHA class body not given; per-node attention over the K
    # gathered neighbours with intensity_score scaling the pre-softmax logits.
    q_rep = jnp.tile(q2.reshape(Bt, N, Hd), (1, K, 1))             # row k*N+n = q[b, n]
    # per-head dh-reduction of q*k as one batched matmul against the constant
    # block indicator (1/sqrt(dh) folded into hm); no per-head lane slicing.
    hm_b = jnp.broadcast_to(hm_ref[...][None], (Bt, Hd, nh))
    sc = jnp.einsum('bsd,bdh->bsh', q_rep * k_g, hm_b,
                    preferred_element_type=f32)                    # (Bt, K*N, nh)
    sc = sc.reshape(Bt, K, N, nh) * inten_ref[...][..., None]      # intensity (Bt,K,N)
    sc_max = jnp.max(sc, axis=1, keepdims=True)                    # softmax over K
    es = jnp.exp(sc - sc_max)
    attn = es * pl.reciprocal(jnp.sum(es, axis=1, keepdims=True), approx=True)

    # finally_embedding (scalar per node; output projection already folded in)
    f2 = jnp.sum(attn * v_g.reshape(Bt, K, N, nh), axis=(1, 3)) + bo_ref[...]  # (Bt, N)

    # predict_od_matrix[b, i, j] = sigmoid(f[b, i]) * f[b, j]
    sig_f = jax.nn.sigmoid(f2)
    pod_ref[...] = sig_f[:, :, None] * f2[:, None, :]

    # [embedding | in_degree | out_degree] stored as one lane-dense slab.
    # (kept in f32: this matmul is tiny and the embedding must stay exact)
    deg = jnp.dot(f2, wio_ref[...], preferred_element_type=f32)    # (Bt, 2N)
    slab_ref[...] = jnp.concatenate([f2, deg], axis=-1)            # (Bt, 3N)


def fcghpn_forward(adj, x, t2v, intensity, neighbors, params, *, batch_tile=32):
    B, N, F_in = x.shape
    T = t2v.shape[-1]
    K = neighbors.shape[-1]
    heads, D, dh = params["wq"].shape
    H_hid = params["w1"].shape[1]
    G = params["w2"].shape[1]
    Hd = heads * dh
    att_out = params["wo"].shape[1]
    assert att_out == 1, "OD-matrix / degree math requires att_output_size == 1"
    assert D == G + T

    # ---- pad the batch to a multiple of 8 (never fall back to one huge tile) ----
    Bp = ((B + 7) // 8) * 8
    if Bp != B:
        pad = Bp - B
        def padb(a):
            return jnp.concatenate([a, jnp.zeros((pad,) + a.shape[1:], a.dtype)], 0)
        adj, x, t2v, intensity = padb(adj), padb(x), padb(t2v), padb(intensity)

    # ---- batch tile: multiple of 8, divides Bp, keep >= 2 grid steps (v7x) ----
    bt = max(8, min(batch_tile - batch_tile % 8, Bp))
    while Bp % bt != 0:
        bt -= 8
    if Bp // bt == 1 and Bp >= 16:
        half = Bp // 2
        bt = half if (half % 8 == 0 and Bp % half == 0) else 8
    grid = (Bp // bt,)

    # ---- batch-invariant preprocessing (plain XLA, outside the kernel) ----
    adj_t = jnp.swapaxes(adj, 1, 2)                  # adj_t[b, j, i] = adj[b, i, j]
    inten_t = jnp.swapaxes(intensity, 1, 2)          # (Bp, K, N)
    sel = jax.nn.one_hot(jnp.transpose(neighbors).reshape(K * N), N,
                         dtype=jnp.bfloat16)         # (K*N, N), k-major rows

    def fuse(w):  # (heads, D, dh) -> (D, heads*dh), head-major columns
        return jnp.transpose(w, (1, 0, 2)).reshape(D, Hd)

    wq_f = fuse(params["wq"]).astype(jnp.bfloat16)
    wk_f = fuse(params["wk"]).astype(jnp.bfloat16)
    # fold the (Hd, 1) output projection into V: wvo[:, h] = Wv_h @ wo_h
    wo_h = params["wo"].reshape(heads, dh)
    wvo = jnp.einsum('hdf,hf->dh', params["wv"], wo_h).astype(jnp.bfloat16)   # (D, heads)
    # per-head block indicator for the q*k dh-reduction; 1/sqrt(dh) folded in
    headmask = jnp.repeat(jnp.eye(heads, dtype=jnp.float32), dh, axis=0) / math.sqrt(dh)
    wio = jnp.concatenate([params["weight_in"], params["weight_out"]], axis=1)  # (N, 2N)
    w1 = params["w1"].astype(jnp.bfloat16)
    w2 = params["w2"].astype(jnp.bfloat16)

    kernel = functools.partial(
        fcghpn_kernel, batch_tile=bt, num_nodes=N, num_neighbors=K,
        num_heads=heads, head_dim=dh)

    def batched(*tail):
        nd = len(tail)
        return pl.BlockSpec((bt,) + tail, lambda b, _nd=nd: (b,) + (0,) * _nd)

    def full(*shape):
        nd = len(shape)
        return pl.BlockSpec(shape, lambda b, _nd=nd: (0,) * _nd)

    grid_spec = pltpu.PrefetchScalarGridSpec(
        num_scalar_prefetch=0,
        grid=grid,
        in_specs=[
            batched(N, N),            # adj (pre-transposed)
            batched(N, F_in),         # input_data
            batched(N, T),            # time2vec
            batched(K, N),            # intensity_score (pre-transposed)
            full(K * N, N),           # one-hot neighbour gather matrix (bf16)
            full(F_in, H_hid), full(1, H_hid),   # GCN layer 1
            full(H_hid, G), full(1, G),          # GCN layer 2
            full(D, Hd),              # Wq (fused heads)
            full(D, Hd),              # Wk (fused heads)
            full(D, heads),           # Wv with output projection folded in
            full(Hd, heads),          # per-head block indicator (incl. 1/sqrt(dh))
            full(1, 1),               # output bias
            full(N, 2 * N),           # [weight_in | weight_out]
        ],
        out_specs=[
            batched(N, N),            # predict_od_matrix
            batched(3 * N),           # [embedding | in_degree | out_degree]
        ],
    )

    out_shapes = (
        jax.ShapeDtypeStruct((Bp, N, N), jnp.float32),
        jax.ShapeDtypeStruct((Bp, 3 * N), jnp.float32),
    )

    pod, slab = pl.pallas_call(
        kernel,
        out_shape=out_shapes,
        grid_spec=grid_spec,
        compiler_params=pltpu.CompilerParams(
            dimension_semantics=("parallel",),
            vmem_limit_bytes=48 * 1024 * 1024),
    )(adj_t, x, t2v, inten_t, sel,
      w1, params["b1"], w2, params["b2"],
      wq_f, wk_f, wvo, headmask, params["bo"], wio)

    pod = pod[:B]
    slab = slab[:B]
    embedding = slab[:, :N, None]          # finally_embedding, (B, N, 1)
    in_degree = slab[:, N:2 * N]
    out_degree = slab[:, 2 * N:]
    return embedding, pod, in_degree, out_degree


if __name__ == "__main__":
    # Small synthetic config (original uses num_nodes=66; we use N=8).
    B, N, K = 16, 8, 4
    F_in, H_hid, G_out = 16, 32, 8      # gcn_in_feats, gcn_hid_feats, gcn_output_size
    T = 8                               # time2vec dim
    D = G_out + T                       # att_input_size
    heads = 2
    dh = D // heads
    att_out = 1                         # forced by the od-matrix / in_degree math

    key = jax.random.PRNGKey(0)
    keys = jax.random.split(key, 16)

    adj = jax.random.normal(keys[0], (B, N, N), jnp.float32)
    x = jax.random.normal(keys[1], (B, N, F_in), jnp.float32)
    t2v = jax.random.normal(keys[2], (B, N, T), jnp.float32)
    intensity = jax.random.uniform(keys[3], (B, N, K), jnp.float32, 0.5, 1.5)
    neighbors = jax.random.randint(keys[4], (N, K), 0, N, jnp.int32)

    def glorot(k, shape):
        fan_in, fan_out = shape[-2], shape[-1]
        lim = math.sqrt(6.0 / (fan_in + fan_out))
        return jax.random.uniform(k, shape, jnp.float32, -lim, lim)

    params = dict(
        w1=glorot(keys[5], (F_in, H_hid)),
        b1=jnp.zeros((1, H_hid), jnp.float32),
        w2=glorot(keys[6], (H_hid, G_out)),
        b2=jnp.zeros((1, G_out), jnp.float32),
        wq=glorot(keys[7], (heads, D, dh)),
        wk=glorot(keys[8], (heads, D, dh)),
        wv=glorot(keys[9], (heads, D, dh)),
        wo=glorot(keys[10], (heads * dh, att_out)),
        bo=jnp.zeros((1, att_out), jnp.float32),
        # nn.init.uniform_(a=0, b=0.0001)
        weight_in=jax.random.uniform(keys[11], (N, N), jnp.float32, 0.0, 1e-4),
        weight_out=jax.random.uniform(keys[12], (N, N), jnp.float32, 0.0, 1e-4),
    )

    outs = fcghpn_forward(adj, x, t2v, intensity, neighbors, params, batch_tile=32)
    jax.block_until_ready(outs)

    embedding, predict_od_matrix, in_degree, out_degree = outs
    assert embedding.shape == (B, N, att_out)
    assert predict_od_matrix.shape == (B, N, N)
    assert in_degree.shape == (B, N)
    assert out_degree.shape == (B, N)
    assert all(bool(jnp.all(jnp.isfinite(o))) for o in outs)
    print("KERNEL_OK")
</pallas_src>

<mosaic_0001>
module attributes {stable_mosaic.version = 11 : i64} {
  func.func @fcghpn_kernel(%arg0: i32, %arg1: memref<8x8x8xf32, #tpu.memory_space<vmem>>, %arg2: memref<8x8x16xf32, #tpu.memory_space<vmem>>, %arg3: memref<8x8x8xf32, #tpu.memory_space<vmem>>, %arg4: memref<8x4x8xf32, #tpu.memory_space<vmem>>, %arg5: memref<32x8xbf16, #tpu.memory_space<vmem>>, %arg6: memref<16x32xbf16, #tpu.memory_space<vmem>>, %arg7: memref<1x32xf32, #tpu.memory_space<vmem>>, %arg8: memref<32x8xbf16, #tpu.memory_space<vmem>>, %arg9: memref<1x8xf32, #tpu.memory_space<vmem>>, %arg10: memref<16x16xbf16, #tpu.memory_space<vmem>>, %arg11: memref<16x16xbf16, #tpu.memory_space<vmem>>, %arg12: memref<16x2xbf16, #tpu.memory_space<vmem>>, %arg13: memref<16x2xf32, #tpu.memory_space<vmem>>, %arg14: memref<1x1xf32, #tpu.memory_space<vmem>>, %arg15: memref<8x16xf32, #tpu.memory_space<vmem>>, %arg16: memref<8x8x8xf32, #tpu.memory_space<vmem>>, %arg17: memref<8x24xf32, #tpu.memory_space<vmem>>) attributes {dimension_semantics = [#tpu.dimension_semantics<parallel>], iteration_bounds = array<i64: 2>, scalar_prefetch = 0 : i64, scratch_operands = 0 : i64, tpu.core_type = #tpu.core_type<tc>, window_params = [{transform_indices = @transform_0, window_bounds = array<i64: 8, 8, 8>}, {transform_indices = @transform_1, window_bounds = array<i64: 8, 8, 16>}, {transform_indices = @transform_2, window_bounds = array<i64: 8, 8, 8>}, {transform_indices = @transform_3, window_bounds = array<i64: 8, 4, 8>}, {pipeline_mode = #tpu.pipeline_mode<synchronous>, transform_indices = @transform_4, window_bounds = array<i64: 32, 8>}, {pipeline_mode = #tpu.pipeline_mode<synchronous>, transform_indices = @transform_5, window_bounds = array<i64: 16, 32>}, {pipeline_mode = #tpu.pipeline_mode<synchronous>, transform_indices = @transform_6, window_bounds = array<i64: 1, 32>}, {pipeline_mode = #tpu.pipeline_mode<synchronous>, transform_indices = @transform_7, window_bounds = array<i64: 32, 8>}, {pipeline_mode = #tpu.pipeline_mode<synchronous>, transform_indices = @transform_8, window_bounds = array<i64: 1, 8>}, {pipeline_mode = #tpu.pipeline_mode<synchronous>, transform_indices = @transform_9, window_bounds = array<i64: 16, 16>}, {pipeline_mode = #tpu.pipeline_mode<synchronous>, transform_indices = @transform_10, window_bounds = array<i64: 16, 16>}, {pipeline_mode = #tpu.pipeline_mode<synchronous>, transform_indices = @transform_11, window_bounds = array<i64: 16, 2>}, {pipeline_mode = #tpu.pipeline_mode<synchronous>, transform_indices = @transform_12, window_bounds = array<i64: 16, 2>}, {pipeline_mode = #tpu.pipeline_mode<synchronous>, transform_indices = @transform_13, window_bounds = array<i64: 1, 1>}, {pipeline_mode = #tpu.pipeline_mode<synchronous>, transform_indices = @transform_14, window_bounds = array<i64: 8, 16>}, {transform_indices = @transform_15, window_bounds = array<i64: 8, 8, 8>}, {transform_indices = @transform_16, window_bounds = array<i64: 8, 24>}]} {
    %c0 = arith.constant 0 : index
    %c0_0 = arith.constant 0 : index
    %c0_1 = arith.constant 0 : index
    %0 = vector.load %arg1[%c0, %c0_0, %c0_1] : memref<8x8x8xf32, #tpu.memory_space<vmem>>, vector<8x8x8xf32>
    %cst = arith.constant dense<0xFF800000> : vector<8x8xf32>
    %1 = vector.multi_reduction <maximumf>, %0, %cst [1] : vector<8x8x8xf32> to vector<8x8xf32>
    %2 = vector.shape_cast %1 : vector<8x8xf32> to vector<8x1x8xf32>
    %3 = vector.broadcast %2 : vector<8x1x8xf32> to vector<8x8x8xf32>
    %4 = arith.subf %0, %3 : vector<8x8x8xf32>
    %5 = math.exp %4 : vector<8x8x8xf32>
    %cst_2 = arith.constant dense<0.000000e+00> : vector<8x8xf32>
    %6 = vector.multi_reduction <add>, %5, %cst_2 [1] : vector<8x8x8xf32> to vector<8x8xf32>
    %7 = vector.shape_cast %6 : vector<8x8xf32> to vector<8x1x8xf32>
    %cst_3 = arith.constant 9.99999993E-9 : f32
    %8 = vector.broadcast %cst_3 : f32 to vector<8x1x8xf32>
    %9 = arith.mulf %8, %7 : vector<8x1x8xf32>
    %10 = vector.broadcast %9 : vector<8x1x8xf32> to vector<8x8x8xf32>
    %11 = arith.cmpf oge, %5, %10 : vector<8x8x8xf32>
    %12 = arith.extui %11 : vector<8x8x8xi1> to vector<8x8x8xi32>
    %13 = arith.sitofp %12 : vector<8x8x8xi32> to vector<8x8x8xf32>
    %cst_4 = arith.constant dense<0.000000e+00> : vector<8x8xf32>
    %14 = vector.multi_reduction <add>, %13, %cst_4 [1] : vector<8x8x8xf32> to vector<8x8xf32>
    %15 = vector.shape_cast %14 : vector<8x8xf32> to vector<8x1x8xf32>
    %cst_5 = arith.constant dense<0.000000e+00> : vector<8x8xf32>
    %16 = vector.multi_reduction <add>, %13, %cst_5 [2] : vector<8x8x8xf32> to vector<8x8xf32>
    %17 = vector.shape_cast %16 : vector<8x8xf32> to vector<8x8x1xf32>
    %cst_6 = arith.constant 0.000000e+00 : f32
    %18 = vector.broadcast %cst_6 : f32 to vector<8x1x8xf32>
    %19 = arith.cmpf ogt, %15, %18 : vector<8x1x8xf32>
    %20 = math.rsqrt %15 : vector<8x1x8xf32>
    %cst_7 = arith.constant 0.000000e+00 : f32
    %21 = vector.broadcast %cst_7 : f32 to vector<8x1x8xf32>
    %22 = arith.select %19, %20, %21 : vector<8x1x8xi1>, vector<8x1x8xf32>
    %cst_8 = arith.constant 0.000000e+00 : f32
    %23 = vector.broadcast %cst_8 : f32 to vector<8x8x1xf32>
    %24 = arith.cmpf ogt, %17, %23 : vector<8x8x1xf32>
    %25 = math.rsqrt %17 : vector<8x8x1xf32>
    %cst_9 = arith.constant 0.000000e+00 : f32
    %26 = vector.broadcast %cst_9 : f32 to vector<8x8x1xf32>
    %27 = arith.select %24, %25, %26 : vector<8x8x1xi1>, vector<8x8x1xf32>
    %28 = vector.broadcast %27 : vector<8x8x1xf32> to vector<8x8x8xf32>
    %29 = arith.mulf %13, %28 : vector<8x8x8xf32>
    %30 = vector.broadcast %22 : vector<8x1x8xf32> to vector<8x8x8xf32>
    %31 = arith.mulf %29, %30 : vector<8x8x8xf32>
    %32 = arith.truncf %31 : vector<8x8x8xf32> to vector<8x8x8xbf16>
    %c0_10 = arith.constant 0 : index
    %c0_11 = arith.constant 0 : index
    %c0_12 = arith.constant 0 : index
    %33 = vector.load %arg2[%c0_10, %c0_11, %c0_12] : memref<8x8x16xf32, #tpu.memory_space<vmem>>, vector<8x8x16xf32>
    %34 = vector.shape_cast %33 : vector<8x8x16xf32> to vector<64x16xf32>
    %35 = arith.truncf %34 : vector<64x16xf32> to vector<64x16xbf16>
    %c0_13 = arith.constant 0 : index
    %c0_14 = arith.constant 0 : index
    %36 = vector.load %arg6[%c0_13, %c0_14] : memref<16x32xbf16, #tpu.memory_space<vmem>>, vector<16x32xbf16>
    %cst_15 = arith.constant dense<0.000000e+00> : vector<64x32xf32>
    %37 = tpu.matmul %35, %36, %cst_15 {dimension_numbers = #tpu.dot_dimension_numbers<[1], [0], [0], [1], [0, 0, 1, 1], [], []>} : vector<64x16xbf16>, vector<16x32xbf16>, vector<64x32xf32> -> vector<64x32xf32>
    %38 = vector.shape_cast %37 : vector<64x32xf32> to vector<8x8x32xf32>
    %39 = arith.truncf %38 : vector<8x8x32xf32> to vector<8x8x32xbf16>
    "tpu.trace_start"() <{level = 10 : i32, message = "bji,bif->bjf"}> : () -> ()
    %cst_16 = arith.constant dense<0.000000e+00> : vector<8x8x32xf32>
    %40 = tpu.matmul %32, %39, %cst_16 {dimension_numbers = #tpu.dot_dimension_numbers<[2], [1], [1], [2], [0, 0, 0, 1, 1, 2], [0], [0]>} : vector<8x8x8xbf16>, vector<8x8x32xbf16>, vector<8x8x32xf32> -> vector<8x8x32xf32>
    "tpu.trace_stop"() : () -> ()
    %c0_17 = arith.constant 0 : index
    %c0_18 = arith.constant 0 : index
    %41 = vector.load %arg7[%c0_17, %c0_18] : memref<1x32xf32, #tpu.memory_space<vmem>>, vector<1x32xf32>
    %42 = vector.shape_cast %41 : vector<1x32xf32> to vector<1x1x32xf32>
    %43 = vector.broadcast %42 : vector<1x1x32xf32> to vector<8x8x32xf32>
    %44 = arith.addf %40, %43 : vector<8x8x32xf32>
    %cst_19 = arith.constant 0.000000e+00 : f32
    %45 = vector.broadcast %cst_19 : f32 to vector<8x8x32xf32>
    %46 = arith.maximumf %44, %45 : vector<8x8x32xf32>
    %47 = vector.shape_cast %46 : vector<8x8x32xf32> to vector<64x32xf32>
    %48 = arith.truncf %47 : vector<64x32xf32> to vector<64x32xbf16>
    %c0_20 = arith.constant 0 : index
    %c0_21 = arith.constant 0 : index
    %49 = vector.load %arg8[%c0_20, %c0_21] : memref<32x8xbf16, #tpu.memory_space<vmem>>, vector<32x8xbf16>
    %cst_22 = arith.constant dense<0.000000e+00> : vector<64x8xf32>
    %50 = tpu.matmul %48, %49, %cst_22 {dimension_numbers = #tpu.dot_dimension_numbers<[1], [0], [0], [1], [0, 0, 1, 1], [], []>} : vector<64x32xbf16>, vector<32x8xbf16>, vector<64x8xf32> -> vector<64x8xf32>
    %51 = vector.shape_cast %50 : vector<64x8xf32> to vector<8x8x8xf32>
    %52 = arith.truncf %51 : vector<8x8x8xf32> to vector<8x8x8xbf16>
    "tpu.trace_start"() <{level = 10 : i32, message = "bji,bif->bjf"}> : () -> ()
    %cst_23 = arith.constant dense<0.000000e+00> : vector<8x8x8xf32>
    %53 = tpu.matmul %32, %52, %cst_23 {dimension_numbers = #tpu.dot_dimension_numbers<[2], [1], [1], [2], [0, 0, 0, 1, 1, 2], [0], [0]>} : vector<8x8x8xbf16>, vector<8x8x8xbf16>, vector<8x8x8xf32> -> vector<8x8x8xf32>
    "tpu.trace_stop"() : () -> ()
    %c0_24 = arith.constant 0 : index
    %c0_25 = arith.constant 0 : index
    %54 = vector.load %arg9[%c0_24, %c0_25] : memref<1x8xf32, #tpu.memory_space<vmem>>, vector<1x8xf32>
    %55 = vector.shape_cast %54 : vector<1x8xf32> to vector<1x1x8xf32>
    %56 = vector.broadcast %55 : vector<1x1x8xf32> to vector<8x8x8xf32>
    %57 = arith.addf %53, %56 : vector<8x8x8xf32>
    %c0_26 = arith.constant 0 : index
    %c0_27 = arith.constant 0 : index
    %c0_28 = arith.constant 0 : index
    %58 = vector.load %arg3[%c0_26, %c0_27, %c0_28] : memref<8x8x8xf32, #tpu.memory_space<vmem>>, vector<8x8x8xf32>
    %59 = tpu.concatenate %57, %58 in 2 : vector<8x8x8xf32>, vector<8x8x8xf32> -> vector<8x8x16xf32>
    %60 = vector.shape_cast %59 : vector<8x8x16xf32> to vector<64x16xf32>
    %61 = arith.truncf %60 : vector<64x16xf32> to vector<64x16xbf16>
    %c0_29 = arith.constant 0 : index
    %c0_30 = arith.constant 0 : index
    %62 = vector.load %arg10[%c0_29, %c0_30] : memref<16x16xbf16, #tpu.memory_space<vmem>>, vector<16x16xbf16>
    %cst_31 = arith.constant dense<0.000000e+00> : vector<64x16xf32>
    %63 = tpu.matmul %61, %62, %cst_31 {dimension_numbers = #tpu.dot_dimension_numbers<[1], [0], [0], [1], [0, 0, 1, 1], [], []>} : vector<64x16xbf16>, vector<16x16xbf16>, vector<64x16xf32> -> vector<64x16xf32>
    %c0_32 = arith.constant 0 : index
    %c0_33 = arith.constant 0 : index
    %64 = vector.load %arg11[%c0_32, %c0_33] : memref<16x16xbf16, #tpu.memory_space<vmem>>, vector<16x16xbf16>
    %cst_34 = arith.constant dense<0.000000e+00> : vector<64x16xf32>
    %65 = tpu.matmul %61, %64, %cst_34 {dimension_numbers = #tpu.dot_dimension_numbers<[1], [0], [0], [1], [0, 0, 1, 1], [], []>} : vector<64x16xbf16>, vector<16x16xbf16>, vector<64x16xf32> -> vector<64x16xf32>
    %c0_35 = arith.constant 0 : index
    %c0_36 = arith.constant 0 : index
    %66 = vector.load %arg12[%c0_35, %c0_36] : memref<16x2xbf16, #tpu.memory_space<vmem>>, vector<16x2xbf16>
    %cst_37 = arith.constant dense<0.000000e+00> : vector<64x2xf32>
    %67 = tpu.matmul %61, %66, %cst_37 {dimension_numbers = #tpu.dot_dimension_numbers<[1], [0], [0], [1], [0, 0, 1, 1], [], []>} : vector<64x16xbf16>, vector<16x2xbf16>, vector<64x2xf32> -> vector<64x2xf32>
    %c0_38 = arith.constant 0 : index
    %c0_39 = arith.constant 0 : index
    %68 = vector.load %arg5[%c0_38, %c0_39] : memref<32x8xbf16, #tpu.memory_space<vmem>>, vector<32x8xbf16>
    %69 = vector.shape_cast %68 : vector<32x8xbf16> to vector<1x32x8xbf16>
    %70 = vector.shape_cast %69 : vector<1x32x8xbf16> to vector<1x32x8xbf16>
    %71 = vector.broadcast %70 : vector<1x32x8xbf16> to vector<8x32x8xbf16>
    %72 = vector.shape_cast %65 : vector<64x16xf32> to vector<8x8x16xf32>
    %73 = arith.truncf %72 : vector<8x8x16xf32> to vector<8x8x16xbf16>
    "tpu.trace_start"() <{level = 10 : i32, message = "bsn,bnf->bsf"}> : () -> ()
    %cst_40 = arith.constant dense<0.000000e+00> : vector<8x32x16xf32>
    %74 = tpu.matmul %71, %73, %cst_40 {dimension_numbers = #tpu.dot_dimension_numbers<[2], [1], [1], [2], [0, 0, 0, 1, 1, 2], [0], [0]>} : vector<8x32x8xbf16>, vector<8x8x16xbf16>, vector<8x32x16xf32> -> vector<8x32x16xf32>
    "tpu.trace_stop"() : () -> ()
    %75 = vector.shape_cast %67 : vector<64x2xf32> to vector<8x8x2xf32>
    %76 = arith.truncf %75 : vector<8x8x2xf32> to vector<8x8x2xbf16>
    "tpu.trace_start"() <{level = 10 : i32, message = "bsn,bnh->bsh"}> : () -> ()
    %cst_41 = arith.constant dense<0.000000e+00> : vector<8x32x2xf32>
    %77 = tpu.matmul %71, %76, %cst_41 {dimension_numbers = #tpu.dot_dimension_numbers<[2], [1], [1], [2], [0, 0, 0, 1, 1, 2], [0], [0]>} : vector<8x32x8xbf16>, vector<8x8x2xbf16>, vector<8x32x2xf32> -> vector<8x32x2xf32>
    "tpu.trace_stop"() : () -> ()
    %78 = vector.shape_cast %63 : vector<64x16xf32> to vector<8x8x16xf32>
    %79 = tpu.concatenate %78, %78, %78, %78 in 1 : vector<8x8x16xf32>, vector<8x8x16xf32>, vector<8x8x16xf32>, vector<8x8x16xf32> -> vector<8x32x16xf32>
    %c0_42 = arith.constant 0 : index
    %c0_43 = arith.constant 0 : index
    %80 = vector.load %arg13[%c0_42, %c0_43] : memref<16x2xf32, #tpu.memory_space<vmem>>, vector<16x2xf32>
    %81 = vector.shape_cast %80 : vector<16x2xf32> to vector<1x16x2xf32>
    %82 = vector.shape_cast %81 : vector<1x16x2xf32> to vector<1x16x2xf32>
    %83 = vector.broadcast %82 : vector<1x16x2xf32> to vector<8x16x2xf32>
    %84 = arith.mulf %79, %74 : vector<8x32x16xf32>
    "tpu.trace_start"() <{level = 10 : i32, message = "bsd,bdh->bsh"}> : () -> ()
    %cst_44 = arith.constant dense<0.000000e+00> : vector<8x32x2xf32>
    %85 = tpu.matmul %84, %83, %cst_44 {dimension_numbers = #tpu.dot_dimension_numbers<[2], [1], [1], [2], [0, 0, 0, 1, 1, 2], [0], [0]>} : vector<8x32x16xf32>, vector<8x16x2xf32>, vector<8x32x2xf32> -> vector<8x32x2xf32>
    "tpu.trace_stop"() : () -> ()
    %86 = vector.shape_cast %85 : vector<8x32x2xf32> to vector<8x4x8x2xf32>
    %c0_45 = arith.constant 0 : index
    %c0_46 = arith.constant 0 : index
    %c0_47 = arith.constant 0 : index
    %87 = vector.load %arg4[%c0_45, %c0_46, %c0_47] : memref<8x4x8xf32, #tpu.memory_space<vmem>>, vector<8x4x8xf32>
    %88 = vector.shape_cast %87 : vector<8x4x8xf32> to vector<8x4x8x1xf32>
    %89 = vector.broadcast %88 : vector<8x4x8x1xf32> to vector<8x4x8x2xf32>
    %90 = arith.mulf %86, %89 : vector<8x4x8x2xf32>
    %cst_48 = arith.constant dense<0xFF800000> : vector<8x8x2xf32>
    %91 = vector.multi_reduction <maximumf>, %90, %cst_48 [1] : vector<8x4x8x2xf32> to vector<8x8x2xf32>
    %92 = vector.shape_cast %91 : vector<8x8x2xf32> to vector<8x1x8x2xf32>
    %93 = vector.broadcast %92 : vector<8x1x8x2xf32> to vector<8x4x8x2xf32>
    %94 = arith.subf %90, %93 : vector<8x4x8x2xf32>
    %95 = math.exp %94 : vector<8x4x8x2xf32>
    %cst_49 = arith.constant dense<0.000000e+00> : vector<8x8x2xf32>
    %96 = vector.multi_reduction <add>, %95, %cst_49 [1] : vector<8x4x8x2xf32> to vector<8x8x2xf32>
    %97 = vector.shape_cast %96 : vector<8x8x2xf32> to vector<8x1x8x2xf32>
    %98 = tpu.reciprocal %97 {approx = true} : vector<8x1x8x2xf32> -> vector<8x1x8x2xf32>
    %99 = vector.broadcast %98 : vector<8x1x8x2xf32> to vector<8x4x8x2xf32>
    %100 = arith.mulf %95, %99 : vector<8x4x8x2xf32>
    %101 = vector.shape_cast %77 : vector<8x32x2xf32> to vector<8x4x8x2xf32>
    %102 = arith.mulf %100, %101 : vector<8x4x8x2xf32>
    %cst_50 = arith.constant dense<0.000000e+00> : vector<8x8xf32>
    %103 = vector.multi_reduction <add>, %102, %cst_50 [1, 3] : vector<8x4x8x2xf32> to vector<8x8xf32>
    %c0_51 = arith.constant 0 : index
    %c0_52 = arith.constant 0 : index
    %104 = vector.load %arg14[%c0_51, %c0_52] : memref<1x1xf32, #tpu.memory_space<vmem>>, vector<1x1xf32>
    %105 = vector.broadcast %104 : vector<1x1xf32> to vector<8x8xf32>
    %106 = arith.addf %103, %105 : vector<8x8xf32>
    %107 = arith.negf %106 : vector<8x8xf32>
    %108 = math.exp %107 : vector<8x8xf32>
    %cst_53 = arith.constant 1.000000e+00 : f32
    %109 = vector.broadcast %cst_53 : f32 to vector<8x8xf32>
    %110 = arith.addf %109, %108 : vector<8x8xf32>
    %111 = arith.divf %109, %110 : vector<8x8xf32>
    %112 = vector.shape_cast %111 : vector<8x8xf32> to vector<8x8x1xf32>
    %113 = vector.shape_cast %106 : vector<8x8xf32> to vector<8x1x8xf32>
    %114 = vector.broadcast %112 : vector<8x8x1xf32> to vector<8x8x8xf32>
    %115 = vector.broadcast %113 : vector<8x1x8xf32> to vector<8x8x8xf32>
    %116 = arith.mulf %114, %115 : vector<8x8x8xf32>
    %c0_54 = arith.constant 0 : index
    %c0_55 = arith.constant 0 : index
    %c0_56 = arith.constant 0 : index
    %117 = vector.load %arg16[%c0_54, %c0_55, %c0_56] : memref<8x8x8xf32, #tpu.memory_space<vmem>>, vector<8x8x8xf32>
    tpu.vector_store %arg16[%c0_54, %c0_55, %c0_56], %116 {strides = array<i32>} : memref<8x8x8xf32, #tpu.memory_space<vmem>>, vector<8x8x8xf32>,
    %c0_57 = arith.constant 0 : index
    %c0_58 = arith.constant 0 : index
    %118 = vector.load %arg15[%c0_57, %c0_58] : memref<8x16xf32, #tpu.memory_space<vmem>>, vector<8x16xf32>
    %cst_59 = arith.constant dense<0.000000e+00> : vector<8x16xf32>
    %119 = tpu.matmul %106, %118, %cst_59 {dimension_numbers = #tpu.dot_dimension_numbers<[1], [0], [0], [1], [0, 0, 1, 1], [], []>} : vector<8x8xf32>, vector<8x16xf32>, vector<8x16xf32> -> vector<8x16xf32>
    %120 = tpu.concatenate %106, %119 in 1 : vector<8x8xf32>, vector<8x16xf32> -> vector<8x24xf32>
    %c0_60 = arith.constant 0 : index
    %c0_61 = arith.constant 0 : index
    %121 = vector.load %arg17[%c0_60, %c0_61] : memref<8x24xf32, #tpu.memory_space<vmem>>, vector<8x24xf32>
    tpu.vector_store %arg17[%c0_60, %c0_61], %120 {strides = array<i32>} : memref<8x24xf32, #tpu.memory_space<vmem>>, vector<8x24xf32>,
    return
  }
  func.func @transform_0(%arg0: i32) -> (i32, i32, i32) {
    %c0_i32 = arith.constant 0 : i32
    %c0_i32_0 = arith.constant 0 : i32
    %c0_i32_1 = arith.constant 0 : i32
    return %arg0, %c0_i32, %c0_i32_0 : i32, i32, i32
  }
  func.func @transform_1(%arg0: i32) -> (i32, i32, i32) {
    %c0_i32 = arith.constant 0 : i32
    %c0_i32_0 = arith.constant 0 : i32
    %c0_i32_1 = arith.constant 0 : i32
    return %arg0, %c0_i32, %c0_i32_0 : i32, i32, i32
  }
  func.func @transform_2(%arg0: i32) -> (i32, i32, i32) {
    %c0_i32 = arith.constant 0 : i32
    %c0_i32_0 = arith.constant 0 : i32
    %c0_i32_1 = arith.constant 0 : i32
    return %arg0, %c0_i32, %c0_i32_0 : i32, i32, i32
  }
  func.func @transform_3(%arg0: i32) -> (i32, i32, i32) {
    %c0_i32 = arith.constant 0 : i32
    %c0_i32_0 = arith.constant 0 : i32
    %c0_i32_1 = arith.constant 0 : i32
    return %arg0, %c0_i32, %c0_i32_0 : i32, i32, i32
  }
  func.func @transform_4(%arg0: i32) -> (i32, i32) {
    %c0_i32 = arith.constant 0 : i32
    %c0_i32_0 = arith.constant 0 : i32
    %c0_i32_1 = arith.constant 0 : i32
    return %c0_i32, %c0_i32_0 : i32, i32
  }
  func.func @transform_5(%arg0: i32) -> (i32, i32) {
    %c0_i32 = arith.constant 0 : i32
    %c0_i32_0 = arith.constant 0 : i32
    %c0_i32_1 = arith.constant 0 : i32
    return %c0_i32, %c0_i32_0 : i32, i32
  }
  func.func @transform_6(%arg0: i32) -> (i32, i32) {
    %c0_i32 = arith.constant 0 : i32
    %c0_i32_0 = arith.constant 0 : i32
    %c0_i32_1 = arith.constant 0 : i32
    return %c0_i32, %c0_i32_0 : i32, i32
  }
  func.func @transform_7(%arg0: i32) -> (i32, i32) {
    %c0_i32 = arith.constant 0 : i32
    %c0_i32_0 = arith.constant 0 : i32
    %c0_i32_1 = arith.constant 0 : i32
    return %c0_i32, %c0_i32_0 : i32, i32
  }
  func.func @transform_8(%arg0: i32) -> (i32, i32) {
    %c0_i32 = arith.constant 0 : i32
    %c0_i32_0 = arith.constant 0 : i32
    %c0_i32_1 = arith.constant 0 : i32
    return %c0_i32, %c0_i32_0 : i32, i32
  }
  func.func @transform_9(%arg0: i32) -> (i32, i32) {
    %c0_i32 = arith.constant 0 : i32
    %c0_i32_0 = arith.constant 0 : i32
    %c0_i32_1 = arith.constant 0 : i32
    return %c0_i32, %c0_i32_0 : i32, i32
  }
  func.func @transform_10(%arg0: i32) -> (i32, i32) {
    %c0_i32 = arith.constant 0 : i32
    %c0_i32_0 = arith.constant 0 : i32
    %c0_i32_1 = arith.constant 0 : i32
    return %c0_i32, %c0_i32_0 : i32, i32
  }
  func.func @transform_11(%arg0: i32) -> (i32, i32) {
    %c0_i32 = arith.constant 0 : i32
    %c0_i32_0 = arith.constant 0 : i32
    %c0_i32_1 = arith.constant 0 : i32
    return %c0_i32, %c0_i32_0 : i32, i32
  }
  func.func @transform_12(%arg0: i32) -> (i32, i32) {
    %c0_i32 = arith.constant 0 : i32
    %c0_i32_0 = arith.constant 0 : i32
    %c0_i32_1 = arith.constant 0 : i32
    return %c0_i32, %c0_i32_0 : i32, i32
  }
  func.func @transform_13(%arg0: i32) -> (i32, i32) {
    %c0_i32 = arith.constant 0 : i32
    %c0_i32_0 = arith.constant 0 : i32
    %c0_i32_1 = arith.constant 0 : i32
    return %c0_i32, %c0_i32_0 : i32, i32
  }
  func.func @transform_14(%arg0: i32) -> (i32, i32) {
    %c0_i32 = arith.constant 0 : i32
    %c0_i32_0 = arith.constant 0 : i32
    %c0_i32_1 = arith.constant 0 : i32
    return %c0_i32, %c0_i32_0 : i32, i32
  }
  func.func @transform_15(%arg0: i32) -> (i32, i32, i32) {
    %c0_i32 = arith.constant 0 : i32
    %c0_i32_0 = arith.constant 0 : i32
    %c0_i32_1 = arith.constant 0 : i32
    return %arg0, %c0_i32, %c0_i32_0 : i32, i32, i32
  }
  func.func @transform_16(%arg0: i32) -> (i32, i32) {
    %c0_i32 = arith.constant 0 : i32
    %c0_i32_0 = arith.constant 0 : i32
    return %arg0, %c0_i32 : i32, i32
  }
}

</mosaic_0001>

<bundles_post_ra>
// kernel: tpu_custom_call.1
= control target key start
LH: loop header
LB: loop body
LE: loop exit
PB: predicated region body
PF: predicated region fallthrough
CT: control target
= control target key end

     0   :  { %s7178_s0 = inlined_call_operand.vmem [shape: f32[16,8,8], index: 0, kind: input, shape index: {}]   ;;  %s7179_s1 = inlined_call_operand.vmem [shape: f32[16,8,16], index: 1, kind: input, shape index: {}]   ;;  %s7180_s2 = inlined_call_operand.vmem [shape: f32[16,8,8], index: 2, kind: input, shape index: {}]   ;;  %s7181_s3 = inlined_call_operand.vmem [shape: f32[16,4,8], index: 3, kind: input, shape index: {}]   ;;  %s7182_s4 = inlined_call_operand.vmem [shape: bf16[32,8], index: 4, kind: input, shape index: {}]   ;;  %s7183_s5 = inlined_call_operand.vmem [shape: bf16[16,32], index: 5, kind: input, shape index: {}]   ;;  %s7184_s6 = inlined_call_operand.vmem [shape: f32[1,32], index: 6, kind: input, shape index: {}]   ;;  %s7185_s7 = inlined_call_operand.vmem [shape: bf16[32,8], index: 7, kind: input, shape index: {}]   ;;  %s7186_s8 = inlined_call_operand.vmem [shape: f32[1,8], index: 8, kind: input, shape index: {}]   ;;  %s7187_s9 = inlined_call_operand.vmem [shape: bf16[16,16], index: 9, kind: input, shape index: {}]   ;;  %s7188_s10 = inlined_call_operand.vmem [shape: bf16[16,16], index: 10, kind: input, shape index: {}]   ;;  %s7189_s11 = inlined_call_operand.vmem [shape: bf16[16,2], index: 11, kind: input, shape index: {}]   ;;  %s7190_s12 = inlined_call_operand.vmem [shape: f32[16,2], index: 12, kind: input, shape index: {}]   ;;  %s7191_s13 = inlined_call_operand.<no memory space> [shape: f32[1,1], index: 13, kind: input, shape index: {}]   ;;  %s7192_s14 = inlined_call_operand.vmem [shape: f32[8,16], index: 14, kind: input, shape index: {}]   ;;  %s7193_s15 = inlined_call_operand.vmem [shape: f32[16,8,8], index: 15, kind: output, shape index: {0}]   ;;  %s7194_s16 = inlined_call_operand.hbm [shape: f32[16,24], index: 16, kind: output, shape index: {1}]  }
   0x1   :  { %7201 = sst [smem:[#allocation32_spill]] %s7178_s0  ;;  %v22_v0 = vstv %s7191_s13 }
   0x2   :  { %7202 = sst [smem:[#allocation33_spill]] %s7179_s1  ;;  %23 = vst [vmem:[#allocation2] sm:$0x1] %v22_v0 }
   0x3   :  { %7203 = sst [smem:[#allocation34_spill]] %s7183_s5 }
   0x4   :  { %24 = vsyncpa [#allocation4], 0 }
   0x5   :  { %26 = vsyncpa [#allocation4 + $0x1], 0  ;;  %s5938_s23 = smov 0   ;;  %s5940_s24 = smov 0  }
   0x6   :  { %s5942_s25 = smov 0   ;;  %s5944_s26 = smov 0  }
   0x7 LB: > { %s5959_s13 = sadd.s32 4294967295, %s5843_s26   ;;  %s4869_s27 = sadd.s32 4294967294, %s5843_s26   ;;  %s5843_s26 = sphi %s5944_s26, %s7265_s26   ;;  %s5839_s25 = sphi %s5942_s25, %s7264_s25   ;;  %s5835_s24 = sphi %s5940_s24, %s7263_s24   ;;  %s5831_s23 = sphi %s5938_s23, %s7262_s23  }
   0x8   : > { %s5963_s28 = sadd.s32 1, %s5843_s26   ;;  %s400_s29 = sadd.s32 1, %s5839_s25 }
   0x9   : > { %s397_s30 = ssub.s32 %s5843_s26, %s5963_s28  ;;  %p410_p0 = scmp.ne.s32.totalorder %s5839_s25, %s5835_s24 }
   0xa   : > { %p398_p1 = scmp.eq.s32.totalorder %s397_s30, 0  ;;  %p411_p2 = scmp.eq.s32.totalorder %s5959_s13, 1 }
   0xb   : > { %p416_p3 = scmp.ne.s32.totalorder %s5835_s24, %s5831_s23  ;;  %p417_p4 = scmp.eq.s32.totalorder %s4869_s27, 1 }
   0xc   : > { %s5974_s0 = scalar_select %p398_p1, %s5839_s25, %s400_s29  }
   0xd   : > { %p5976_p5 = por %p411_p2, %p410_p0  ;;  %p5980_p6 = por %p417_p4, %p416_p3 }
   0xe   : > { %7204 = sst [smem:[#allocation6_spill]] %s5974_s0  ;;  %p4872_p7 = scmp.ge.s32.totalorder %s5843_s26, 1 }
   0xf   : > { %p504_p8 = scmp.lt.s32.totalorder %s5843_s26, 3 }
  0x11   : > { %p505_p9 = pnand %p4872_p7, %p504_p8 }
  0x13   : > { %508 = sbr.rel (%p505_p9) target bundleno = 2198 (0x896), region = 80 }
  0x1a   : > { %s7207_s5 = sld [smem:[#allocation34_spill]]  ;;  %s4874_s21 = sshll.u32 %s5959_s13, 3  ;;  %v5845_v2 = vmov 0.0   ;;  %vm946_vm0 = vcmask 130048   ;;  %vm613_vm1 = vcmask 64512   ;;  %vm5846_vm10 = vmmov 0  }
  0x1b   : > { %p575_p10 = scmp.lt.s32.totalorder %s4874_s21, 15  ;;  %5182 = vmatprep.subr.bf16.mxu1 %v5845_v2  ;;  %s7208_s30 = sld [smem:[#allocation32_spill]]  ;;  %5184 = vmatprep.mubr.msk.bf16.mxu1 %vm5846_vm10, %v5845_v2 }
  0x1c   : > { %s7209_s1 = sld [smem:[#allocation33_spill]]  ;;  %s5847_s27 = smov 8  }
  0x1d   : > { %s7267_s21 = smov (!%p575_p10, %s4874_s21), 15 }
  0x1e   : > { %s5995_s22 = sshll.u32 %s7267_s21, 3 }
  0x20   : > { %v5613_v1 = vld [vmem:[%s7207_s5] sm:$0xff]   ;;  %s4881_s5 = sshll.u32 %s7267_s21, 2 }
  0x21   : > { %5172 = vmatprep.subr.bf16.mxu0 %v5613_v1  ;;  %s6001_s19 = scalar_lea.vmem %s7208_s30, %s5995_s22  ;;  %s6497_s30 = scalar_lea.vmem %s7181_s3, %s4881_s5 }
  0x22   : > { %5173 = vmatpush3.bf16.msra.mxu0 %v5613_v1  ;;  %s584_s0 = scalar_lea.vmem %s7209_s1, %s5995_s22  ;;  %v6008_v14 = vld [vmem:[%s6001_s19] sm:$0xff]  ;;  %v6014_v17 = vld [vmem:[%s6001_s19 + $0x8] sm:$0xff]  ;;  %v6017_v18 = vld [vmem:[%s6001_s19 + $0x10] sm:$0xff] }
  0x23   : > { %5194 = vmatprep.subr.bf16.mxu0 %v5845_v2  ;;  %v926_v3 = vld [vmem:[%s584_s0] sm:$0xff]  ;;  %v927_v4 = vld [vmem:[%s584_s0 + $0x8] sm:$0xff]  ;;  %v928_v5 = vld [vmem:[%s584_s0 + $0x10] sm:$0xff]  ;;  %v614_v16 = vsel %vm613_vm1, %v6008_v14, -inf  ;;  %v621_v21 = vsel %vm613_vm1, %v6014_v17, -inf  ;;  %v628_v22 = vsel %vm613_vm1, %v6017_v18, -inf }
  0x24   : > { %v934_v6 = vpack.c.bf16 %v927_v4, %v926_v3  ;;  %v929_v7 = vld [vmem:[%s584_s0 + $0x18] sm:$0xff]  ;;  %v930_v8 = vld [vmem:[%s584_s0 + $0x20] sm:$0xff]  ;;  %v931_v9 = vld [vmem:[%s584_s0 + $0x28] sm:$0xff]  ;;  %v615_v20 = vrot.slane %v614_v16, 4  ;;  %v622_v26 = vrot.slane %v621_v21, 4  ;;  %v629_v27 = vrot.slane %v628_v22, 4 }
  0x25   : > { %v935_v10 = vpack.c.bf16 %v929_v7, %v928_v5  ;;  %v936_v11 = vpack.c.bf16 %v931_v9, %v930_v8  ;;  %v932_v12 = vld [vmem:[%s584_s0 + $0x30] sm:$0xff]  ;;  %v933_v13 = vld [vmem:[%s584_s0 + $0x38] sm:$0xff]  ;;  %v6030_v24 = vld [vmem:[%s6001_s19 + $0x28] sm:$0xff]  ;;  %s590_s0 = scalar_lea.vmem %s7180_s2, %s5995_s22 }
  0x26   : > { %5174 = vmatprep.mubr.msk.bf16.mxu0 %vm946_vm0, %v934_v6  ;;  %v937_v15 = vpack.c.bf16 %v933_v13, %v932_v12  ;;  %v6020_v19 = vld [vmem:[%s6001_s19 + $0x18] sm:$0xff]  ;;  %v6033_v25 = vld [vmem:[%s6001_s19 + $0x20] sm:$0xff]  ;;  %v649_v29 = vsel %vm613_vm1, %v6030_v24, -inf  ;;  %v6042_v31 = vld [vmem:[%s6001_s19 + $0x30] sm:$0xff]  ;;  %v616_v32 = vmax.f32 %v614_v16, %v615_v20  ;;  %v623_v36 = vmax.f32 %v621_v21, %v622_v26 }
  0x27   : > { %5175 = vmatmul.mubr.msk.bf16.vlgmr.msra.gmra.mrb[0].mxu0 %vm946_vm0, %v935_v10  ;;  %v635_v23 = vsel %vm613_vm1, %v6020_v19, -inf  ;;  %v6039_v30 = vld [vmem:[%s6001_s19 + $0x38] sm:$0xff]  ;;  %v650_v33 = vrot.slane %v649_v29, 4  ;;  %v642_v34 = vsel %vm613_vm1, %v6033_v25, -inf  ;;  %v630_v37 = vmax.f32 %v628_v22, %v629_v27 }
  0x28   : > { %5178 = vmatprep.mubr.msk.bf16.mxu0 %vm946_vm0, %v936_v11  ;;  %v636_v28 = vrot.slane %v635_v23, 4  ;;  %v663_v35 = vsel %vm613_vm1, %v6039_v30, -inf  ;;  %v643_v39 = vrot.slane %v642_v34, 4  ;;  %v617_v40 = vrot.slane %v616_v32, 2 }
  0x29   : > { %v651_v41 = vmax.f32 %v649_v29, %v650_v33  ;;  %v664_v42 = vrot.slane %v663_v35, 4  ;;  %v656_v43 = vsel %vm613_vm1, %v6042_v31, -inf  ;;  %v624_v44 = vrot.slane %v623_v36, 2 }
  0x2a   : > { %v637_v38 = vmax.f32 %v635_v23, %v636_v28  ;;  %v631_v45 = vrot.slane %v630_v37, 2  ;;  %v644_v47 = vmax.f32 %v642_v34, %v643_v39  ;;  %v618_v48 = vmax.f32 %v616_v32, %v617_v40 }
  0x2b   : > { %v652_v49 = vrot.slane %v651_v41, 2  ;;  %v665_v50 = vmax.f32 %v663_v35, %v664_v42  ;;  %v657_v51 = vrot.slane %v656_v43, 4  ;;  %v625_v52 = vmax.f32 %v623_v36, %v624_v44 }
  0x2c   : > { %v638_v46 = vrot.slane %v637_v38, 2  ;;  %v632_v53 = vmax.f32 %v630_v37, %v631_v45  ;;  %v645_v55 = vrot.slane %v644_v47, 2  ;;  %v619_v56 = vrot.slane %v618_v48, 1 }
  0x2d   : > { %v653_v57 = vmax.f32 %v651_v41, %v652_v49  ;;  %v666_v58 = vrot.slane %v665_v50, 2  ;;  %v658_v59 = vmax.f32 %v656_v43, %v657_v51  ;;  %v626_v60 = vrot.slane %v625_v52, 1 }
  0x2e   : > { %v639_v54 = vmax.f32 %v637_v38, %v638_v46  ;;  %v633_v61 = vrot.slane %v632_v53, 1  ;;  %v646_v63 = vmax.f32 %v644_v47, %v645_v55  ;;  %v620_v0 = vmax.f32 %v618_v48, %v619_v56 }
  0x2f   : > { %5179 = vmatmul.mubr.msk.bf16.gmra.mrb[4].mxu0 %vm946_vm0, %v937_v15  ;;  %v654_v1 = vrot.slane %v653_v57, 1  ;;  %v667_v3 = vmax.f32 %v665_v50, %v666_v58  ;;  %v659_v4 = vrot.slane %v658_v59, 2  ;;  %v627_v5 = vmax.f32 %v625_v52, %v626_v60 }
  0x30   : > { %v640_v62 = vrot.slane %v639_v54, 1  ;;  %v634_v6 = vmax.f32 %v632_v53, %v633_v61  ;;  %v647_v8 = vrot.slane %v646_v63, 1  ;;  %v670_v9 = vsub.f32 %v6008_v14, %v620_v0  ;;  %5196 = vmatprep.mubr.msk.bf16.mxu0 %vm5846_vm10, %v5845_v2 }
  0x31   : > { %v655_v10 = vmax.f32 %v653_v57, %v654_v1  ;;  %v668_v11 = vrot.slane %v667_v3, 1  ;;  %v660_v12 = vmax.f32 %v658_v59, %v659_v4  ;;  %v671_v13 = vsub.f32 %v6014_v17, %v627_v5 }
  0x32   : > { %v641_v7 = vmax.f32 %v639_v54, %v640_v62  ;;  %v672_v15 = vsub.f32 %v6017_v18, %v634_v6  ;;  %v648_v20 = vmax.f32 %v646_v63, %v647_v8  ;;  %v678_v21 = vmul.f32 1.442695, %v670_v9 }
  0x33   : > { %v675_v22 = vsub.f32 %v6030_v24, %v655_v10  ;;  %v669_v23 = vmax.f32 %v667_v3, %v668_v11  ;;  %v661_v26 = vrot.slane %v660_v12, 1  ;;  %v680_v27 = vmul.f32 1.442695, %v671_v13 }
  0x34   : > { %v673_v16 = vsub.f32 %v6020_v19, %v641_v7  ;;  %v682_v28 = vmul.f32 1.442695, %v672_v15  ;;  %v674_v14 = vsub.f32 %v6033_v25, %v648_v20  ;;  %5621 = vpow2.f32 %v678_v21 }
  0x35   : > { %v688_v32 = vmul.f32 1.442695, %v675_v22  ;;  %v677_v33 = vsub.f32 %v6039_v30, %v669_v23  ;;  %v662_v17 = vmax.f32 %v660_v12, %v661_v26  ;;  %5623 = vpow2.f32 %v680_v27 }
  0x36   : > { %v684_v29 = vmul.f32 1.442695, %v673_v16  ;;  %v686_v18 = vmul.f32 1.442695, %v674_v14  ;;  %5625 = vpow2.f32 %v682_v28 }
  0x37   : > { %v692_v19 = vmul.f32 1.442695, %v677_v33  ;;  %v676_v34 = vsub.f32 %v6042_v31, %v662_v17 }
  0x38   : > { %5627 = vpow2.f32 %v684_v29 }
  0x39   : > { %5629 = vpow2.f32 %v688_v32  ;;  %v690_v24 = vmul.f32 1.442695, %v676_v34 }
  0x3a   : > { %5631 = vpow2.f32 %v686_v18 }
  0x3b   : > { %5633 = vpow2.f32 %v692_v19 }
  0x3c   : > { %5635 = vpow2.f32 %v690_v24 }
  0x3e   : > { %v5622_v35 = vpop.eup %5621 }
  0x3f   : > { %v6059_v36 = vpop.eup %5623  ;;  %v694_v25 = vsel %vm613_vm1, %v5622_v35, 0.0 }
  0x40   : > { %v6062_v37 = vpop.eup %5625  ;;  %v695_v30 = vrot.slane %v694_v25, 4  ;;  %v701_v38 = vsel %vm613_vm1, %v6059_v36, 0.0 }
  0x41   : > { %v702_v31 = vrot.slane %v701_v38, 4  ;;  %v708_v40 = vsel %vm613_vm1, %v6062_v37, 0.0 }
  0x42   : > { %v6066_v39 = vpop.eup %5627  ;;  %v696_v42 = vadd.f32 %v695_v30, %v694_v25  ;;  %v709_v43 = vrot.slane %v708_v40, 4 }
  0x43   : > { %v6070_v41 = vpop.eup %5629  ;;  %v715_v44 = vsel %vm613_vm1, %v6066_v39, 0.0  ;;  %v703_v46 = vadd.f32 %v702_v31, %v701_v38 }
  0x44   : > { %v6074_v45 = vpop.eup %5631  ;;  %v716_v47 = vrot.slane %v715_v44, 4  ;;  %v729_v48 = vsel %vm613_vm1, %v6070_v41, 0.0  ;;  %v697_v50 = vrot.slane %v696_v42, 2  ;;  %v710_v51 = vadd.f32 %v709_v43, %v708_v40 }
  0x45   : > { %v6078_v49 = vpop.eup %5633  ;;  %v730_v52 = vrot.slane %v729_v48, 4  ;;  %v722_v53 = vsel %vm613_vm1, %v6074_v45, 0.0  ;;  %v704_v55 = vrot.slane %v703_v46, 2 }
  0x46   : > { %v6082_v54 = vpop.eup %5635  ;;  %v717_v56 = vadd.f32 %v716_v47, %v715_v44  ;;  %v723_v57 = vrot.slane %v722_v53, 4  ;;  %v743_v58 = vsel %vm613_vm1, %v6078_v49, 0.0  ;;  %v698_v59 = vadd.f32 %v697_v50, %v696_v42 }
  0x47   : > { %v711_v60 = vrot.slane %v710_v51, 2  ;;  %v731_v61 = vadd.f32 %v730_v52, %v729_v48  ;;  %v744_v62 = vrot.slane %v743_v58, 4  ;;  %v705_v63 = vadd.f32 %v704_v55, %v703_v46 }
  0x48   : > { %v718_v0 = vrot.slane %v717_v56, 2  ;;  %v724_v1 = vadd.f32 %v723_v57, %v722_v53  ;;  %v736_v3 = vsel %vm613_vm1, %v6082_v54, 0.0  ;;  %v699_v4 = vrot.slane %v698_v59, 1 }
  0x49   : > { %v712_v5 = vadd.f32 %v711_v60, %v710_v51  ;;  %v732_v6 = vrot.slane %v731_v61, 2  ;;  %v745_v7 = vadd.f32 %v744_v62, %v743_v58  ;;  %v706_v8 = vrot.slane %v705_v63, 1 }
  0x4a   : > { %v719_v9 = vadd.f32 %v718_v0, %v717_v56  ;;  %v725_v10 = vrot.slane %v724_v1, 2  ;;  %v737_v11 = vrot.slane %v736_v3, 4  ;;  %v700_v12 = vadd.f32 %v699_v4, %v698_v59 }
  0x4b   : > { %v713_v13 = vrot.slane %v712_v5, 1  ;;  %v733_v15 = vadd.f32 %v732_v6, %v731_v61  ;;  %v746_v16 = vrot.slane %v745_v7, 2  ;;  %v707_v20 = vadd.f32 %v706_v8, %v705_v63 }
  0x4c   : > { %v720_v21 = vrot.slane %v719_v9, 1  ;;  %v726_v22 = vadd.f32 %v725_v10, %v724_v1  ;;  %v750_v23 = vmul.f32 1e-08, %v700_v12  ;;  %v738_v28 = vadd.f32 %v737_v11, %v736_v3 }
  0x4d   : > { %v714_v26 = vadd.f32 %v713_v13, %v712_v5  ;;  %v734_v27 = vrot.slane %v733_v15, 1  ;;  %v751_v29 = vmul.f32 1e-08, %v707_v20  ;;  %v747_v33 = vadd.f32 %v746_v16, %v745_v7 }
  0x4e   : > { %v721_v14 = vadd.f32 %v720_v21, %v719_v9  ;;  %v727_v32 = vrot.slane %v726_v22, 1  ;;  %vm758_vm2 = vcmp.ge.f32.partialorder %v5622_v35, %v750_v23  ;;  %v739_v40 = vrot.slane %v738_v28, 2 }
  0x4f   : > { %v752_v17 = vmul.f32 1e-08, %v714_v26  ;;  %v735_v18 = vadd.f32 %v734_v27, %v733_v15  ;;  %v6089_v19 = vsel %vm758_vm2, 1.0, %v5845_v2  ;;  %vm759_vm3 = vcmp.ge.f32.partialorder %v6059_v36, %v751_v29 }
  0x50   : > { %v753_v34 = vmul.f32 1e-08, %v721_v14  ;;  %v728_v24 = vadd.f32 %v727_v32, %v726_v22  ;;  %v782_v25 = vsel %vm613_vm1, %v6089_v19, 0.0  ;;  %v6095_v30 = vsel %vm759_vm3, 1.0, %v5845_v2 }
  0x51   : > { %vm760_vm4 = vcmp.ge.f32.partialorder %v6062_v37, %v752_v17  ;;  %v755_v38 = vmul.f32 1e-08, %v735_v18  ;;  %838 = vadd.xlane.f32.xlu0 %v782_v25  ;;  %v748_v31 = vrot.slane %v747_v33, 1  ;;  %v789_v36 = vsel %vm613_vm1, %v6095_v30, 0.0 }
  0x52   : > { %v6099_v35 = vsel %vm760_vm4, 1.0, %v5845_v2  ;;  %vm761_vm5 = vcmp.ge.f32.partialorder %v6066_v39, %v753_v34  ;;  %v754_v44 = vmul.f32 1e-08, %v728_v24  ;;  %v740_v47 = vadd.f32 %v739_v40, %v738_v28 }
  0x53   : > { %v796_v42 = vsel %vm613_vm1, %v6099_v35, 0.0  ;;  %v6107_v43 = vsel %vm761_vm5, 1.0, %v5845_v2  ;;  %vm763_vm6 = vcmp.ge.f32.partialorder %v6070_v41, %v755_v38  ;;  %v749_v46 = vadd.f32 %v748_v31, %v747_v33 }
  0x54   : > { %842 = vadd.xlane.f32.xlu1 %v796_v42  ;;  %v803_v37 = vsel %vm613_vm1, %v6107_v43, 0.0  ;;  %v6113_v39 = vsel %vm763_vm6, 1.0, %v5845_v2  ;;  %vm762_vm7 = vcmp.ge.f32.partialorder %v6074_v45, %v754_v44  ;;  %v741_v52 = vrot.slane %v740_v47, 1 }
  0x55   : > { %840 = vadd.xlane.f32.xlu0 %v789_v36  ;;  %v6117_v48 = vsel %vm762_vm7, 1.0, %v5845_v2  ;;  %v817_v41 = vsel %vm613_vm1, %v6113_v39, 0.0  ;;  %v757_v51 = vmul.f32 1e-08, %v749_v46  ;;  %v797_v58 = vrot.slane %v796_v42, 4 }
  0x56   : > { %v810_v50 = vsel %vm613_vm1, %v6117_v48, 0.0  ;;  %v742_v45 = vadd.f32 %v741_v52, %v740_v47  ;;  %v783_v59 = vrot.slane %v782_v25, 4  ;;  %v790_v0 = vrot.slane %v789_v36, 4 }
  0x57   : > { %vm765_vm8 = vcmp.ge.f32.partialorder %v6078_v49, %v757_v51  ;;  %v798_v60 = vadd.f32 %v797_v58, %v796_v42  ;;  %v804_v13 = vrot.slane %v803_v37, 4  ;;  %v818_v29 = vrot.slane %v817_v41, 4 }
  0x58   : > { %844 = vadd.xlane.f32.xlu1 %v803_v37  ;;  %v6125_v53 = vsel %vm765_vm8, 1.0, %v5845_v2  ;;  %v756_v56 = vmul.f32 1e-08, %v742_v45  ;;  %v784_v61 = vadd.f32 %v783_v59, %v782_v25  ;;  %v791_v5 = vadd.f32 %v790_v0, %v789_v36 }
  0x59   : > { %846 = vadd.xlane.f32.xlu0 %v810_v50  ;;  %v6129_v55 = vsel %vm613_vm1, %v6125_v53, 0.0  ;;  %v799_v62 = vrot.slane %v798_v60, 2  ;;  %v805_v26 = vadd.f32 %v804_v13, %v803_v37  ;;  %v819_v24 = vadd.f32 %v818_v29, %v817_v41 }
  0x5a   : > { %vm764_vm9 = vcmp.ge.f32.partialorder %v6082_v54, %v756_v56  ;;  %v811_v54 = vrot.slane %v810_v50, 4  ;;  %v785_v63 = vrot.slane %v784_v61, 2  ;;  %v792_v12 = vrot.slane %v791_v5, 2 }
  0x5b   : > { %v6134_v57 = vsel %vm764_vm9, 1.0, %v5845_v2  ;;  %v800_v1 = vadd.f32 %v799_v62, %v798_v60  ;;  %v806_v33 = vrot.slane %v805_v26, 2  ;;  %v820_v37 = vrot.slane %v819_v24, 2 }
  0x5c   : > { %848 = vadd.xlane.f32.xlu1 %v817_v41  ;;  %v824_v49 = vsel %vm613_vm1, %v6134_v57, 0.0  ;;  %v812_v3 = vadd.f32 %v811_v54, %v810_v50  ;;  %v786_v4 = vadd.f32 %v785_v63, %v784_v61  ;;  %v793_v23 = vadd.f32 %v792_v12, %v791_v5 }
  0x5d   : > { %850 = vadd.xlane.f32.xlu0 %v824_v49  ;;  %v801_v6 = vrot.slane %v800_v1, 1  ;;  %v825_v8 = vrot.slane %v824_v49, 4  ;;  %v807_v38 = vadd.f32 %v806_v33, %v805_v26  ;;  %v832_v44 = vrot.slane %v6129_v55, 4 }
  0x5e   : > { %v813_v7 = vrot.slane %v812_v3, 2  ;;  %v787_v11 = vrot.slane %v786_v4, 1  ;;  %v794_v32 = vrot.slane %v793_v23, 1  ;;  %vm1042_vm3 = vcmask 1043456  }
  0x5f   : > { %v802_v15 = vadd.f32 %v801_v6, %v800_v1  ;;  %v826_v20 = vadd.f32 %v825_v8, %v824_v49  ;;  %v808_v47 = vrot.slane %v807_v38, 1  ;;  %v821_v49 = vadd.f32 %v820_v37, %v819_v24 }
  0x60   : > { %852 = vadd.xlane.f32.xlu1 %v6129_v55  ;;  %v814_v16 = vadd.f32 %v813_v7, %v812_v3  ;;  %v788_v22 = vadd.f32 %v787_v11, %v786_v4  ;;  %v6146_v25 = vadd.f32 %v794_v32, %v793_v23  ;;  %v833_v58 = vadd.f32 %v832_v44, %v6129_v55 }
  0x61   : > { %v827_v28 = vrot.slane %v826_v20, 2  ;;  %vm856_vm13 = vcmp.gt.f32.partialorder %v802_v15, 0.0  ;;  %v6161_v60 = vadd.f32 %v808_v47, %v807_v38  ;;  %v822_v0 = vrot.slane %v821_v49, 1 }
  0x62   : > { %v815_v27 = vrot.slane %v814_v16, 1  ;;  %vm854_vm14 = vcmp.gt.f32.partialorder %v788_v22, 0.0  ;;  %v834_v1 = vrot.slane %v833_v58, 2  ;;  %vm855_vm5 = vcmp.gt.f32.partialorder %v6146_v25, 0.0 }
  0x63   : > { %v828_v18 = vadd.f32 %v827_v28, %v826_v20  ;;  %vm857_vm9 = vcmp.gt.f32.partialorder %v6161_v60, 0.0 }
  0x64   : > { %v6144_v17 = vadd.f32 %v815_v27, %v814_v16 }
  0x65   : > { %v829_v40 = vrot.slane %v828_v18, 1 }
  0x66   : > { %vm858_vm4 = vcmp.gt.f32.partialorder %v6144_v17, 0.0 }
  0x67   : > { %v6157_v45 = vadd.f32 %v829_v40, %v828_v18 }
  0x69   : > { %vm860_vm8 = vcmp.gt.f32.partialorder %v6157_v45, 0.0 }
  0xde   : > { %v839_v9 = vpop.xlane.xlu0 %838 }
  0xdf   : > { %vm878_vm12 = vcmp.gt.f32.partialorder %v839_v9, 0.0 }
  0xe1   : > { %v843_v10 = vpop.xlane.xlu1 %842 }
  0xe2   : > { %5637 = vrsqrt.f32 %v843_v10  ;;  %v6142_v21 = vpop.xlane.xlu0 %840  ;;  %vm880_vm11 = vcmp.gt.f32.partialorder %v843_v10, 0.0 }
  0xe3   : > { %5639 = vrsqrt.f32 %v839_v9  ;;  %vm879_vm2 = vcmp.gt.f32.partialorder %v6142_v21, 0.0 }
  0xe4   : > { %5641 = vrsqrt.f32 %v802_v15 }
  0xe5   : > { %5643 = vrsqrt.f32 %v788_v22  ;;  %v6155_v51 = vpop.xlane.xlu1 %844  ;;  %v835_v22 = vadd.f32 %v834_v1, %v833_v58 }
  0xe6   : > { %v847_v14 = vpop.xlane.xlu0 %846  ;;  %vm881_vm7 = vcmp.gt.f32.partialorder %v6155_v51, 0.0 }
  0xe7   : > { %5645 = vrsqrt.f32 %v847_v14  ;;  %vm882_vm15 = vcmp.gt.f32.partialorder %v847_v14, 0.0 }
  0xe8   : > { %5647 = vrsqrt.f32 %v6142_v21  ;;  %v6179_v21 = vadd.f32 %v822_v0, %v821_v49 }
  0xe9   : > { %5649 = vrsqrt.f32 %v6144_v17  ;;  %v6174_v12 = vpop.xlane.xlu1 %848 }
  0xea   : > { %v6151_v46 = vpop.xlane.xlu0 %850  ;;  %5651 = vrsqrt.f32 %v6146_v25 }
  0xeb   : > { %5653 = vrsqrt.f32 %v6151_v46  ;;  %vm884_vm6 = vcmp.gt.f32.partialorder %v6151_v46, 0.0 }
  0xec   : > { %v5638_v34 = vpop.eup %5637  ;;  %5655 = vrsqrt.f32 %v6155_v51 }
  0xed   : > { %v5640_v31 = vpop.eup %5639  ;;  %v896_v36 = vsel %vm880_vm11, %v5638_v34, 0.0  ;;  %5657 = vrsqrt.f32 %v6157_v45  ;;  %v836_v34 = vrot.slane %v835_v22, 1  ;;  %v853_v40 = vpop.xlane.xlu1 %852  ;;  %vm883_vm11 = vcmp.gt.f32.partialorder %v6174_v12, 0.0 }
  0xee   : > { %v5642_v42 = vpop.eup %5641  ;;  %v894_v41 = vsel %vm878_vm12, %v5640_v31, 0.0  ;;  %v904_v50 = vmul.f32 %v6099_v35, %v896_v36  ;;  %5659 = vrsqrt.f32 %v6161_v60  ;;  %vm859_vm12 = vcmp.gt.f32.partialorder %v6179_v21, 0.0 }
  0xef   : > { %v5644_v52 = vpop.eup %5643  ;;  %v872_v56 = vsel %vm856_vm13, %v5642_v42, 0.0  ;;  %v902_v61 = vmul.f32 %v6089_v19, %v894_v41  ;;  %5661 = vrsqrt.f32 %v6174_v12  ;;  %vm885_vm13 = vcmp.gt.f32.partialorder %v853_v40, 0.0  ;;  %v5615_v12 = vld [vmem:[%s7185_s7 + $0x8] sm:$0xff]  }
  0xf0   : > { %v870_v35 = vsel %vm854_vm14, %v5644_v52, 0.0  ;;  %v912_v62 = vmul.f32 %v904_v50, %v872_v56  ;;  %5663 = vrsqrt.f32 %v6179_v21  ;;  %v837_v52 = vadd.f32 %v836_v34, %v835_v22 }
  0xf1   : > { %v5646_v59 = vpop.eup %5645  ;;  %v910_v19 = vmul.f32 %v902_v61, %v870_v35  ;;  %5665 = vrsqrt.f32 %v853_v40 }
  0xf2   : > { %v5648_v54 = vpop.eup %5647  ;;  %v898_v4 = vsel %vm882_vm15, %v5646_v59, 0.0  ;;  %v6171_v9 = vpack.c.bf16 %v912_v62, %v912_v62  ;;  %5667 = vrsqrt.f32 %v837_v52  ;;  %vm861_vm14 = vcmp.gt.f32.partialorder %v837_v52, 0.0 }
  0xf3   : > { %v5650_v5 = vpop.eup %5649  ;;  %v895_v8 = vsel %vm879_vm2, %v5648_v54, 0.0  ;;  %v906_v20 = vmul.f32 %v6117_v48, %v898_v4  ;;  %v6182_v27 = vpack.c.bf16 %v910_v19, %v910_v19  ;;  %vm1436_vm15 = vcmask 261120  }
  0xf4   : > { %v5652_v13 = vpop.eup %5651  ;;  %v874_v23 = vsel %vm858_vm4, %v5650_v5, 0.0  ;;  %v903_v28 = vmul.f32 %v6095_v30, %v895_v8  ;;  %vm4560_vm2 = vcmask 1042434   ;;  %vm4564_vm4 = vcmask 1044484  }
  0xf5   : > { %v5654_v26 = vpop.eup %5653  ;;  %v871_v48 = vsel %vm855_vm5, %v5652_v13, 0.0  ;;  %v914_v30 = vmul.f32 %v906_v20, %v874_v23  ;;  %vm4566_vm5 = vcmask 1045509  }
  0xf6   : > { %v5656_v29 = vpop.eup %5655  ;;  %v900_v33 = vsel %vm884_vm6, %v5654_v26, 0.0  ;;  %v911_v24 = vmul.f32 %v903_v28, %v871_v48  ;;  %v4897_v28 = vld [vmem:[%s7184_s6] ss:$0 sm:$0xff]  ;;  %vm4568_vm6 = vcmask 1046534  }
  0xf7   : > { %v5658_v18 = vpop.eup %5657  ;;  %v897_v31 = vsel %vm881_vm7, %v5656_v29, 0.0  ;;  %v6208_v46 = vpack.c.bf16 %v914_v30, %v914_v30  ;;  %v908_v47 = vmul.f32 %v6134_v57, %v900_v33  ;;  %vm4570_vm7 = vcmask 1047559  }
  0xf8   : > { %v5660_v37 = vpop.eup %5659  ;;  %v876_v50 = vsel %vm860_vm8, %v5658_v18, 0.0  ;;  %v6212_v45 = vpack.c.bf16 %v911_v24, %v911_v24  ;;  %v905_v51 = vmul.f32 %v6107_v43, %v897_v31  ;;  %vm4724_vm8 = vcmask 195584  }
  0xf9   : > { %v873_v56 = vsel %vm857_vm9, %v5660_v37, 0.0  ;;  %v5662_v58 = vpop.eup %5661  ;;  %v916_v59 = vmul.f32 %v908_v47, %v876_v50 }
  0xfa   : > { %v5176_v63 = vpop.f32.mrb[0].mxu0  ;;  %v913_v43 = vmul.f32 %v905_v51, %v873_v56  ;;  %v5664_v61 = vpop.eup %5663  ;;  %v899_v35 = vsel %vm883_vm11, %v5662_v58, 0.0 }
  0xfb   : > { %v1026_v55 = vpack.c.bf16 %v5176_v63, %v5176_v63  ;;  %v993_v3 = vpop.f32.mrb[1].mxu0  ;;  %v6231_v62 = vpack.c.bf16 %v916_v59, %v916_v59  ;;  %v907_v63 = vmul.f32 %v6113_v39, %v899_v35  ;;  %v875_v1 = vsel %vm859_vm12, %v5664_v61, 0.0 }
  0xfc   : > { %v1024_v6 = vpack.c.bf16 %v993_v3, %v993_v3  ;;  %v6168_v7 = vpop.f32.mrb[2].mxu0  ;;  %v6233_v54 = vpack.c.bf16 %v913_v43, %v913_v43 }
  0xfd   : > { %v1136_v10 = vsel %vm1042_vm3, %v1026_v55, 0  ;;  %v996_v11 = vpop.f32.mrb[3].mxu0  ;;  %v1027_v44 = vpack.c.bf16 %v6168_v7, %v6168_v7  ;;  %v5666_v55 = vpop.eup %5665  ;;  %v915_v3 = vmul.f32 %v907_v63, %v875_v1 }
  0xfe   : > { %v1025_v15 = vpack.c.bf16 %v996_v11, %v996_v11  ;;  %5195 = vmatpush3.bf16.msra.mxu0 %v1136_v10  ;;  %v1044_v16 = vsel %vm1042_vm3, %v1024_v6, 0  ;;  %v901_v39 = vsel %vm885_vm13, %v5666_v55, 0.0  ;;  %v5668_v5 = vpop.eup %5667 }
  0xff   : > { %5183 = vmatpush3.bf16.msra.mxu1 %v1044_v16  ;;  %5206 = vmatprep.subr.bf16.mxu0 %v5845_v2  ;;  %v1182_v57 = vsel %vm1042_vm3, %v1027_v44, 0  ;;  %v6244_v19 = vpack.c.bf16 %v915_v3, %v915_v3  ;;  %v909_v6 = vmul.f32 %v6125_v53, %v901_v39  ;;  %v877_v8 = vsel %vm861_vm14, %v5668_v5, 0.0  ;;  %v5614_v53 = vld [vmem:[%s7185_s7] sm:$0xff]  }
 0x100   : > { %5188 = vmatprep.subr.bf16.mxu1 %v5845_v2  ;;  %v1090_v14 = vsel %vm1042_vm3, %v1025_v15, 0 }
 0x101   : > { %5197 = vmatmul.mubr.msk.bf16.vlgmr.msra.gmra.mrb[8].mxu0 %vm613_vm1, %v6171_v9  ;;  %v917_v10 = vmul.f32 %v909_v6, %v877_v8 }
 0x102   : > { %5185 = vmatmul.mubr.msk.bf16.vlgmr.msra.gmra.mrb[0].mxu1 %vm613_vm1, %v6182_v27  ;;  %v5180_v32 = vpop.f32.mrb[4].mxu0  ;;  %5208 = vmatprep.mubr.msk.bf16.mxu0 %vm5846_vm10, %v5845_v2 }
 0x103   : > { %5189 = vmatpush3.bf16.msra.mxu1 %v1090_v14  ;;  %5190 = vmatprep.mubr.msk.bf16.mxu1 %vm5846_vm10, %v5845_v2  ;;  %v1009_v17 = vpop.f32.mrb[5].mxu0  ;;  %v1030_v36 = vpack.c.bf16 %v5180_v32, %v5180_v32  ;;  %v6253_v11 = vpack.c.bf16 %v917_v10, %v917_v10 }
 0x104   : > { %5200 = vmatprep.subr.bf16.mxu1 %v5845_v2  ;;  %v1028_v25 = vpack.c.bf16 %v1009_v17, %v1009_v17  ;;  %v5181_v38 = vpop.f32.mrb[6].mxu0 }
 0x105   : > { %v1012_v42 = vpop.f32.mrb[7].mxu0  ;;  %v1320_v49 = vsel %vm1042_vm3, %v1030_v36, 0  ;;  %v1031_v4 = vpack.c.bf16 %v5181_v38, %v5181_v38 }
 0x106   : > { %v1228_v41 = vsel %vm1042_vm3, %v1028_v25, 0  ;;  %v1029_v60 = vpack.c.bf16 %v1012_v42, %v1012_v42 }
 0x107   : > { %5207 = vmatpush3.bf16.msra.mxu0 %v1228_v41  ;;  %v1366_v7 = vsel %vm1042_vm3, %v1031_v4, 0 }
 0x108   : > { %5218 = vmatprep.subr.bf16.mxu0 %v5845_v2  ;;  %v1274_v0 = vsel %vm1042_vm3, %v1029_v60, 0 }
 0x10a   : > { %5191 = vmatmul.mubr.msk.bf16.vlgmr.msra.gmra.mrb[4].mxu1 %vm613_vm1, %v6212_v45  ;;  %5209 = vmatmul.mubr.msk.bf16.vlgmr.msra.gmra.mrb[12].mxu0 %vm613_vm1, %v6208_v46 }
 0x10b   : > { %5201 = vmatpush3.bf16.msra.mxu1 %v1182_v57  ;;  %5202 = vmatprep.mubr.msk.bf16.mxu1 %vm5846_vm10, %v5845_v2 }
 0x10c   : > { %5212 = vmatprep.subr.bf16.mxu1 %v5845_v2  ;;  %5219 = vmatpush3.bf16.msra.mxu0 %v1320_v49 }
 0x10d   : > { %5220 = vmatprep.mubr.msk.bf16.mxu0 %vm5846_vm10, %v5845_v2  ;;  %5230 = vmatprep.subr.bf16.mxu0 %v5614_v53 }
 0x112   : > { %5203 = vmatmul.mubr.msk.bf16.vlgmr.msra.gmra.mrb[8].mxu1 %vm613_vm1, %v6233_v54  ;;  %5221 = vmatmul.mubr.msk.bf16.vlgmr.msra.gmra.mrb[16].mxu0 %vm613_vm1, %v6231_v62 }
 0x113   : > { %5213 = vmatpush3.bf16.msra.mxu1 %v1274_v0  ;;  %5214 = vmatprep.mubr.msk.bf16.mxu1 %vm5846_vm10, %v5845_v2 }
 0x114   : > { %5224 = vmatprep.subr.bf16.mxu1 %v5845_v2  ;;  %5231 = vmatpush3.bf16.msra.mxu0 %v5614_v53  ;;  %v1875_v53 = vld [vmem:[%s590_s0 + $0x10] sm:$0xff] }
 0x115   : > { %5232 = vmatprep.subr.bf16.mxu0 %v5615_v12 }
 0x118   : > { %5233 = vmatpush3.bf16.msra.mxu0 %v5615_v12  ;;  %v1876_v12 = vld [vmem:[%s590_s0 + $0x18] sm:$0xff] }
 0x119   : > { %5254 = vmatprep.subr.bf16.mxu0 %v5845_v2 }
 0x11a   : > { %5215 = vmatmul.mubr.msk.bf16.vlgmr.msra.gmra.mrb[12].mxu1 %vm613_vm1, %v6244_v19 }
 0x11b   : > { %5225 = vmatpush3.bf16.msra.mxu1 %v1366_v7  ;;  %5226 = vmatprep.mubr.msk.bf16.mxu1 %vm5846_vm10, %v5845_v2 }
 0x11c   : > { %5242 = vmatprep.subr.bf16.mxu1 %v5845_v2 }
 0x122   : > { %5227 = vmatmul.mubr.msk.bf16.vlgmr.msra.gmra.mrb[16].mxu1 %vm613_vm1, %v6253_v11 }
 0x123   : > { %5244 = vmatprep.mubr.msk.bf16.mxu1 %vm5846_vm10, %v5845_v2 }
 0x1d4   : > { %v1172_v13 = vpop.f32.mrb[8].mxu0 }
 0x1d5   : > { %v1080_v15 = vpop.f32.mrb[0].mxu1  ;;  %v5198_v16 = vpop.f32.mrb[9].mxu0  ;;  %v1173_v40 = vadd.f32 %v4897_v28, %v1172_v13  ;;  %v1873_v13 = vld [vmem:[%s590_s0] sm:$0xff] }
 0x1d6   : > { %v5186_v20 = vpop.f32.mrb[1].mxu1  ;;  %v1175_v21 = vpop.f32.mrb[10].mxu0  ;;  %v1081_v48 = vadd.f32 %v4897_v28, %v1080_v15  ;;  %v5597_v15 = vpack.i.bf16 %v1876_v12, %v1875_v53  ;;  %v1874_v16 = vld [vmem:[%s590_s0 + $0x8] sm:$0xff] }
 0x1d7   : > { %v1083_v22 = vpop.f32.mrb[2].mxu1  ;;  %v5199_v23 = vpop.f32.mrb[11].mxu0  ;;  %v1410_v52 = vmax.f32 %v1173_v40, 0.0  ;;  %v1877_v20 = vld [vmem:[%s590_s0 + $0x20] sm:$0xff]  ;;  %v1878_v21 = vld [vmem:[%s590_s0 + $0x28] sm:$0xff] }
 0x1d8   : > { %v5187_v26 = vpop.f32.mrb[3].mxu1  ;;  %v1408_v34 = vmax.f32 %v1081_v48, 0.0  ;;  %v5592_v22 = vpack.i.bf16 %v1874_v16, %v1873_v13  ;;  %5598 = vrot.lane.b32.xlu1 %v5597_v15, %s5847_s27  ;;  %v5602_v23 = vpack.i.bf16 %v1878_v21, %v1877_v20 }
 0x1d9   : > { %v1879_v26 = vld [vmem:[%s590_s0 + $0x30] sm:$0xff] }
 0x1da   : > { %5593 = vrot.lane.b32.xlu0 %v5592_v22, %s5847_s27 }
 0x1dc   : > { %5603 = vrot.lane.b32.xlu1 %v5602_v23, %s5847_s27 }
 0x1dd   : > { %v1126_v29 = vpop.f32.mrb[4].mxu1  ;;  %v1264_v14 = vpop.f32.mrb[12].mxu0 }
 0x1de   : > { %v1127_v30 = vadd.f32 %v4897_v28, %v1126_v29  ;;  %v5192_v32 = vpop.f32.mrb[5].mxu1  ;;  %v5210_v33 = vpop.f32.mrb[13].mxu0  ;;  %v1265_v57 = vadd.f32 %v4897_v28, %v1264_v14 }
 0x1df   : > { %v1129_v17 = vpop.f32.mrb[6].mxu1  ;;  %v1267_v18 = vpop.f32.mrb[14].mxu0 }
 0x1e0   : > { %v1409_v24 = vmax.f32 %v1127_v30, 0.0  ;;  %v5193_v25 = vpop.f32.mrb[7].mxu1  ;;  %v5211_v38 = vpop.f32.mrb[15].mxu0  ;;  %v1412_v35 = vmax.f32 %v1265_v57, 0.0 }
 0x1e2   : > { %v1416_v31 = vpack.c.bf16 %v1409_v24, %v1408_v34 }
 0x1e4   : > { %5234 = vmatprep.mubr.msk.bf16.mxu0 %vm1436_vm15, %v1416_v31 }
 0x1e5   : > { %v1218_v36 = vpop.f32.mrb[8].mxu1  ;;  %v1356_v42 = vpop.f32.mrb[16].mxu0 }
 0x1e6   : > { %v1219_v37 = vadd.f32 %v4897_v28, %v1218_v36  ;;  %v5204_v44 = vpop.f32.mrb[9].mxu1  ;;  %v5222_v47 = vpop.f32.mrb[17].mxu0  ;;  %v1357_v55 = vadd.f32 %v4897_v28, %v1356_v42 }
 0x1e7   : > { %v1221_v41 = vpop.f32.mrb[10].mxu1  ;;  %v1359_v50 = vpop.f32.mrb[18].mxu0 }
 0x1e8   : > { %v1411_v51 = vmax.f32 %v1219_v37, 0.0  ;;  %v5205_v56 = vpop.f32.mrb[11].mxu1  ;;  %v5223_v49 = vpop.f32.mrb[19].mxu0  ;;  %v1414_v6 = vmax.f32 %v1357_v55, 0.0 }
 0x1ea   : > { %v1417_v58 = vpack.c.bf16 %v1411_v51, %v1410_v52 }
 0x1ec   : > { %5235 = vmatmul.mubr.msk.bf16.vlgmr.msra.gmra.mrb[20].mxu0 %vm1436_vm15, %v1417_v58 }
 0x1ed   : > { %v1310_v59 = vpop.f32.mrb[12].mxu1 }
 0x1ee   : > { %v1311_v43 = vadd.f32 %v4897_v28, %v1310_v59  ;;  %v5216_v60 = vpop.f32.mrb[13].mxu1 }
 0x1ef   : > { %v1313_v61 = vpop.f32.mrb[14].mxu1 }
 0x1f0   : > { %v1413_v63 = vmax.f32 %v1311_v43, 0.0  ;;  %v5217_v0 = vpop.f32.mrb[15].mxu1  ;;  %v4912_v43 = vld [vmem:[%s7186_s8] ss:$0 sm:$0xff] }
 0x1f2   : > { %v1418_v1 = vpack.c.bf16 %v1413_v63, %v1412_v35 }
 0x1f4   : > { %5238 = vmatprep.mubr.msk.bf16.mxu0 %vm1436_vm15, %v1418_v1 }
 0x1f5   : > { %v1402_v3 = vpop.f32.mrb[16].mxu1 }
 0x1f6   : > { %v1403_v4 = vadd.f32 %v4897_v28, %v1402_v3  ;;  %v5228_v39 = vpop.f32.mrb[17].mxu1  ;;  %v1880_v28 = vld [vmem:[%s590_s0 + $0x38] sm:$0xff]  ;;  %s602_s0 = scalar_lea.vmem %s7193_s15, %s5995_s22  ;;  %s571_s22 = sand.u32 1, %s5835_s24  }
 0x1f7   : > { %v1405_v5 = vpop.f32.mrb[18].mxu1  ;;  %v5607_v48 = vpack.i.bf16 %v1880_v28, %v1879_v26  ;;  %s4873_s29 = sshll.u32 %s571_s22, 3 }
 0x1f8   : > { %v1415_v7 = vmax.f32 %v1403_v4, 0.0  ;;  %v5229_v8 = vpop.f32.mrb[19].mxu1  ;;  %s573_s21 = scalar_lea.vmem [#allocation3], %s4873_s29 }
 0x1f9   : > { %5608 = vrot.lane.b32.xlu1 %v5607_v48, %s5847_s27  ;;  %s4749_s19 = sshll.u32 %s573_s21, 4  ;;  %s7136_s19 = int_to_ptr.vmem [resolvable:$true] %s4749_s19 }
 0x1fa   : > { %v1419_v10 = vpack.c.bf16 %v1415_v7, %v1414_v6 }
 0x1fc   : > { %5239 = vmatmul.mubr.msk.bf16.gmra.mrb[24].mxu0 %vm1436_vm15, %v1419_v10 }
 0x1fd   : > { %5256 = vmatprep.mubr.msk.bf16.mxu0 %vm5846_vm10, %v5845_v2 }
 0x24a   : > { %v5599_v6 = vpop.permute.xlu1 %5598 }
 0x24b   : > { %v5601_v8 = vunpack.i.h.bf16 %v5599_v6  ;;  %v5600_v10 = vunpack.i.l.bf16 %v5599_v6 }
 0x24c   : > { %v5594_v60 = vpop.permute.xlu0 %5593 }
 0x24d   : > { %v5596_v61 = vunpack.i.h.bf16 %v5594_v60  ;;  %v5595_v35 = vunpack.i.l.bf16 %v5594_v60 }
 0x2bf   : > { %v5236_v29 = vpop.f32.mrb[20].mxu0 }
 0x2c0   : > { %v1516_v14 = vpack.c.bf16 %v5236_v29, %v5236_v29  ;;  %v1483_v30 = vpop.f32.mrb[21].mxu0  ;;  %v5604_v29 = vpop.permute.xlu1 %5603 }
 0x2c1   : > { %v1514_v32 = vpack.c.bf16 %v1483_v30, %v1483_v30  ;;  %v5237_v33 = vpop.f32.mrb[22].mxu0  ;;  %v5606_v30 = vunpack.i.h.bf16 %v5604_v29 }
 0x2c2   : > { %v1616_v17 = vsel %vm1042_vm3, %v1516_v14, 0  ;;  %v1486_v18 = vpop.f32.mrb[23].mxu0  ;;  %v1517_v38 = vpack.c.bf16 %v5237_v33, %v5237_v33 }
 0x2c3   : > { %v1530_v34 = vsel %vm1042_vm3, %v1514_v32, 0  ;;  %v1515_v24 = vpack.c.bf16 %v1486_v18, %v1486_v18  ;;  %5255 = vmatpush3.bf16.msra.mxu0 %v1616_v17  ;;  %v5605_v32 = vunpack.i.l.bf16 %v5604_v29 }
 0x2c4   : > { %5243 = vmatpush3.bf16.msra.mxu1 %v1530_v34  ;;  %5266 = vmatprep.subr.bf16.mxu0 %v5845_v2  ;;  %v1659_v31 = vsel %vm1042_vm3, %v1517_v38, 0 }
 0x2c5   : > { %5248 = vmatprep.subr.bf16.mxu1 %v5845_v2  ;;  %v1573_v25 = vsel %vm1042_vm3, %v1515_v24, 0 }
 0x2c6   : > { %5257 = vmatmul.mubr.msk.bf16.vlgmr.msra.gmra.mrb[28].mxu0 %vm613_vm1, %v6171_v9 }
 0x2c7   : > { %5245 = vmatmul.mubr.msk.bf16.vlgmr.msra.gmra.mrb[20].mxu1 %vm613_vm1, %v6182_v27  ;;  %5268 = vmatprep.mubr.msk.bf16.mxu0 %vm5846_vm10, %v5845_v2 }
 0x2c8   : > { %5249 = vmatpush3.bf16.msra.mxu1 %v1573_v25  ;;  %5250 = vmatprep.mubr.msk.bf16.mxu1 %vm5846_vm10, %v5845_v2 }
 0x2c9   : > { %5260 = vmatprep.subr.bf16.mxu1 %v5845_v2 }
 0x2cf   : > { %v5240_v40 = vpop.f32.mrb[24].mxu0  ;;  %5251 = vmatmul.mubr.msk.bf16.vlgmr.msra.gmra.mrb[24].mxu1 %vm613_vm1, %v6212_v45 }
 0x2d0   : > { %5261 = vmatpush3.bf16.msra.mxu1 %v1659_v31  ;;  %v1499_v9 = vpop.f32.mrb[25].mxu0  ;;  %5262 = vmatprep.mubr.msk.bf16.mxu1 %vm5846_vm10, %v5845_v2  ;;  %v1520_v37 = vpack.c.bf16 %v5240_v40, %v5240_v40 }
 0x2d1   : > { %v1518_v27 = vpack.c.bf16 %v1499_v9, %v1499_v9  ;;  %v5241_v36 = vpop.f32.mrb[26].mxu0  ;;  %5272 = vmatprep.subr.bf16.mxu1 %v5845_v2 }
 0x2d2   : > { %v1502_v42 = vpop.f32.mrb[27].mxu0  ;;  %v1788_v45 = vsel %vm1042_vm3, %v1520_v37, 0  ;;  %v1521_v50 = vpack.c.bf16 %v5241_v36, %v5241_v36 }
 0x2d3   : > { %v1702_v44 = vsel %vm1042_vm3, %v1518_v27, 0  ;;  %v1519_v47 = vpack.c.bf16 %v1502_v42, %v1502_v42  ;;  %v5609_v42 = vpop.permute.xlu1 %5608 }
 0x2d4   : > { %5267 = vmatpush3.bf16.msra.mxu0 %v1702_v44  ;;  %v1831_v52 = vsel %vm1042_vm3, %v1521_v50, 0  ;;  %v5611_v44 = vunpack.i.h.bf16 %v5609_v42 }
 0x2d5   : > { %v1745_v41 = vsel %vm1042_vm3, %v1519_v47, 0  ;;  %5278 = vmatprep.subr.bf16.mxu0 %v5845_v2  ;;  %v5610_v47 = vunpack.i.l.bf16 %v5609_v42 }
 0x2d7   : > { %5263 = vmatmul.mubr.msk.bf16.vlgmr.msra.gmra.mrb[28].mxu1 %vm613_vm1, %v6233_v54  ;;  %5269 = vmatmul.mubr.msk.bf16.vlgmr.msra.gmra.mrb[32].mxu0 %vm613_vm1, %v6208_v46  ;;  %v5616_v46 = vld [vmem:[%s7187_s9] sm:$0xff]  }
 0x2d8   : > { %5273 = vmatpush3.bf16.msra.mxu1 %v1745_v41  ;;  %5279 = vmatpush3.bf16.msra.mxu0 %v1788_v45  ;;  %v5617_v54 = vld [vmem:[%s7188_s10] sm:$0xff]  }
 0x2d9   : > { %5274 = vmatprep.mubr.msk.bf16.mxu1 %vm5846_vm10, %v5845_v2  ;;  %5280 = vmatprep.mubr.msk.bf16.mxu0 %vm5846_vm10, %v5845_v2 }
 0x2da   : > { %5284 = vmatprep.subr.bf16.mxu1 %v5845_v2  ;;  %5290 = vmatprep.subr.bf16.mxu0 %v5616_v46 }
 0x2df   : > { %5275 = vmatmul.mubr.msk.bf16.vlgmr.msra.gmra.mrb[32].mxu1 %vm613_vm1, %v6244_v19  ;;  %5281 = vmatmul.mubr.msk.bf16.vlgmr.msra.gmra.mrb[36].mxu0 %vm613_vm1, %v6231_v62  ;;  %v5618_v62 = vld [vmem:[%s7189_s11] sm:$0xff]  }
 0x2e0   : > { %5285 = vmatpush3.bf16.msra.mxu1 %v1831_v52  ;;  %5286 = vmatprep.mubr.msk.bf16.mxu1 %vm5846_vm10, %v5845_v2 }
 0x2e1   : > { %5300 = vmatprep.subr.bf16.mxu1 %v5617_v54  ;;  %5291 = vmatpush3.bf16.msra.mxu0 %v5616_v46 }
 0x2e2   : > { %5310 = vmatprep.subr.bf16.mxu0 %v5618_v62 }
 0x2e7   : > { %5287 = vmatmul.mubr.msk.bf16.vlgmr.msra.gmra.mrb[36].mxu1 %vm613_vm1, %v6253_v11 }
 0x2e8   : > { %5301 = vmatpush3.bf16.msra.mxu1 %v5617_v54 }
 0x399   : > { %v1652_v19 = vpop.f32.mrb[28].mxu0 }
 0x39a   : > { %v1566_v51 = vpop.f32.mrb[20].mxu1  ;;  %v5258_v11 = vpop.f32.mrb[29].mxu0  ;;  %v1653_v53 = vadd.f32 %v4912_v43, %v1652_v19 }
 0x39b   : > { %v5246_v56 = vpop.f32.mrb[21].mxu1  ;;  %v1655_v49 = vpop.f32.mrb[30].mxu0  ;;  %v1567_v63 = vadd.f32 %v4912_v43, %v1566_v51  ;;  %v6360_v11 = vld [vmem:[%s7182_s4] sm:$0xff]  }
 0x39c   : > { %v1569_v58 = vpop.f32.mrb[22].mxu1  ;;  %v5259_v57 = vpop.f32.mrb[31].mxu0  ;;  %v1915_v23 = vsel %vm613_vm1, %v1653_v53, %v5600_v10 }
 0x39d   : > { %v5247_v59 = vpop.f32.mrb[23].mxu1  ;;  %v1913_v4 = vsel %vm613_vm1, %v1567_v63, %v5595_v35 }
 0x3a2   : > { %v1609_v0 = vpop.f32.mrb[24].mxu1 }
 0x3a3   : > { %v1610_v1 = vadd.f32 %v4912_v43, %v1609_v0  ;;  %v5252_v55 = vpop.f32.mrb[25].mxu1 }
 0x3a4   : > { %v1612_v3 = vpop.f32.mrb[26].mxu1 }
 0x3a5   : > { %v1914_v39 = vsel %vm613_vm1, %v1610_v1, %v5596_v61  ;;  %v5253_v5 = vpop.f32.mrb[27].mxu1  ;;  %v6379_v1 = vld [vmem:[%s7182_s4 + $0x8] sm:$0xff]  }
 0x3a6   : > { %v1921_v7 = vpack.c.bf16 %v1914_v39, %v1913_v4 }
 0x3a8   : > { %5292 = vmatprep.mubr.msk.bf16.mxu0 %vm946_vm0, %v1921_v7  ;;  %5302 = vmatprep.mubr.msk.bf16.mxu1 %vm946_vm0, %v1921_v7 }
 0x3aa   : > { %v1695_v12 = vpop.f32.mrb[28].mxu1  ;;  %v1738_v13 = vpop.f32.mrb[32].mxu0 }
 0x3ab   : > { %v1696_v15 = vadd.f32 %v4912_v43, %v1695_v12  ;;  %v5264_v16 = vpop.f32.mrb[29].mxu1  ;;  %v5270_v20 = vpop.f32.mrb[33].mxu0  ;;  %v1739_v33 = vadd.f32 %v4912_v43, %v1738_v13 }
 0x3ac   : > { %v1698_v21 = vpop.f32.mrb[30].mxu1  ;;  %v1741_v22 = vpop.f32.mrb[34].mxu0 }
 0x3ad   : > { %v1916_v26 = vsel %vm613_vm1, %v1696_v15, %v5601_v8  ;;  %v5265_v28 = vpop.f32.mrb[31].mxu1  ;;  %v5271_v48 = vpop.f32.mrb[35].mxu0  ;;  %v1917_v40 = vsel %vm613_vm1, %v1739_v33, %v5605_v32 }
 0x3ae   : > { %v1922_v14 = vpack.c.bf16 %v1916_v26, %v1915_v23 }
 0x3b0   : > { %5293 = vmatmul.mubr.msk.bf16.vlgmr.msra.gmra.mrb[40].mxu0 %vm946_vm0, %v1922_v14  ;;  %5303 = vmatmul.mubr.msk.bf16.vlgmr.msra.gmra.mrb[40].mxu1 %vm946_vm0, %v1922_v14 }
 0x3b1   : > { %5311 = vmatpush3.bf16.msra.mxu0 %v5618_v62 }
 0x3b2   : > { %v1781_v17 = vpop.f32.mrb[32].mxu1  ;;  %v1824_v18 = vpop.f32.mrb[36].mxu0 }
 0x3b3   : > { %v1782_v34 = vadd.f32 %v4912_v43, %v1781_v17  ;;  %v5276_v24 = vpop.f32.mrb[33].mxu1  ;;  %v5282_v25 = vpop.f32.mrb[37].mxu0  ;;  %v1825_v41 = vadd.f32 %v4912_v43, %v1824_v18 }
 0x3b4   : > { %v1784_v38 = vpop.f32.mrb[34].mxu1  ;;  %v1827_v31 = vpop.f32.mrb[38].mxu0 }
 0x3b5   : > { %v1918_v9 = vsel %vm613_vm1, %v1782_v34, %v5606_v30  ;;  %v5277_v27 = vpop.f32.mrb[35].mxu1  ;;  %v5283_v36 = vpop.f32.mrb[39].mxu0  ;;  %v1919_v54 = vsel %vm613_vm1, %v1825_v41, %v5610_v47 }
 0x3b6   : > { %v1923_v37 = vpack.c.bf16 %v1918_v9, %v1917_v40 }
 0x3b8   : > { %5296 = vmatprep.mubr.msk.bf16.mxu0 %vm946_vm0, %v1923_v37  ;;  %5306 = vmatprep.mubr.msk.bf16.mxu1 %vm946_vm0, %v1923_v37 }
 0x3ba   : > { %v1867_v45 = vpop.f32.mrb[36].mxu1 }
 0x3bb   : > { %v1868_v50 = vadd.f32 %v4912_v43, %v1867_v45  ;;  %v5288_v52 = vpop.f32.mrb[37].mxu1 }
 0x3bc   : > { %v1870_v46 = vpop.f32.mrb[38].mxu1 }
 0x3bd   : > { %v1920_v62 = vsel %vm613_vm1, %v1868_v50, %v5611_v44  ;;  %v5289_v19 = vpop.f32.mrb[39].mxu1  ;;  %v3024_v46 = vld [vmem:[%s7190_s12] sm:$0xff] }
 0x3be   : > { %v1924_v51 = vpack.c.bf16 %v1920_v62, %v1919_v54  ;;  %v3025_v54 = vld [vmem:[%s7190_s12 + $0x8] sm:$0xff]  ;;  %v7195_v19 = vlaneseq }
 0x3bf   : > { %v6485_v62 = vpack.c.bf16 %v3025_v54, %v3024_v46 }
 0x3c0   : > { %5297 = vmatmul.mubr.msk.bf16.gmra.mrb[44].mxu0 %vm946_vm0, %v1924_v51  ;;  %5307 = vmatmul.mubr.msk.bf16.gmra.mrb[44].mxu1 %vm946_vm0, %v1924_v51 }
 0x3c1   : > { %5312 = vmatprep.mubr.msk.bf16.mxu0 %vm946_vm0, %v1921_v7  ;;  %5322 = vmatprep.mubr.msk.bf16.mxu1 %vm613_vm1, %v6360_v11 }
 0x3c8   : > { %5313 = vmatmul.mubr.msk.bf16.vlgmr.msra.gmra.mrb[48].mxu0 %vm946_vm0, %v1922_v14 }
 0x3c9   : > { %5316 = vmatprep.mubr.msk.bf16.mxu0 %vm946_vm0, %v1923_v37 }
 0x3d0   : > { %5317 = vmatmul.mubr.msk.bf16.gmra.mrb[52].mxu0 %vm946_vm0, %v1924_v51  ;;  %v6500_v51 = vshrl.u32 %v7195_v19, 7 }
 0x3d1   : > { %5334 = vmatprep.mubr.msk.bf16.mxu0 %vm613_vm1, %v6360_v11 }
 0x3d2   : > { %7210 = vst [vmem:[#allocation7_spill] sm:$0xff] %v6500_v51 }
 0x483   : > { %v6366_v56 = vpop.f32.mrb[40].mxu0  ;;  %v5304_v49 = vpop.f32.mrb[40].mxu1 }
 0x484   : > { %v2162_v58 = vpack.c.bf16 %v5304_v49, %v5304_v49  ;;  %v6368_v57 = vpop.f32.mrb[41].mxu0  ;;  %v2052_v59 = vpop.f32.mrb[41].mxu1  ;;  %v3844_v49 = vsub.s32 0, %v6500_v51 }
 0x485   : > { %v2160_v43 = vpack.c.bf16 %v2052_v59, %v2052_v59  ;;  %v6370_v60 = vpop.f32.mrb[42].mxu0  ;;  %v5305_v61 = vpop.f32.mrb[42].mxu1  ;;  %v3835_v59 = vld [vmem:[%s6497_s30 + $0x4] sm:$0xf] }
 0x486   : > { %v2289_v35 = vsel %vm1042_vm3, %v2162_v58, 0  ;;  %v6373_v63 = vpop.f32.mrb[43].mxu0  ;;  %v2055_v0 = vpop.f32.mrb[43].mxu1  ;;  %5535 = vmatprep.subr.msk.bf16.mxu0 %vm1042_vm3, %v2162_v58  ;;  %v2163_v4 = vpack.c.bf16 %v5305_v61, %v5305_v61  ;;  %v3851_v58 = vsub.s32 1, %v6500_v51 }
 0x487   : > { %v2185_v55 = vsel %vm1042_vm3, %v2160_v43, 0  ;;  %v2161_v3 = vpack.c.bf16 %v2055_v0, %v2055_v0  ;;  %5533 = vmatprep.subr.msk.bf16.mxu1 %vm1042_vm3, %v2160_v43  ;;  %5333 = vmatpush3.bf16.msra.mxu0 %v2289_v35  ;;  %v3873_v35 = vrot.slane %v3835_v59, %v3844_v49 }
 0x488   : > { %5321 = vmatpush3.bf16.msra.mxu1 %v2185_v55  ;;  %v2341_v5 = vsel %vm1042_vm3, %v2163_v4, 0  ;;  %v3880_v0 = vrot.slane %v3835_v59, %v3851_v58 }
 0x489   : > { %5534 = vmatprep.subr.msk.bf16.mxu1 %vm1042_vm3, %v2161_v3  ;;  %v2237_v39 = vsel %vm1042_vm3, %v2161_v3, 0  ;;  %v3858_v3 = vsub.s32 2, %v6500_v51 }
 0x48a   : > { %5335 = vmatmul.mubr.msk.bf16.vlgmr.msra.gmra.mrb[56].mxu0 %vm613_vm1, %v6379_v1 }
 0x48b   : > { %5323 = vmatmul.mubr.msk.bf16.vlgmr.msra.gmra.mrb[48].mxu1 %vm613_vm1, %v6379_v1  ;;  %5346 = vmatprep.mubr.msk.bf16.mxu0 %vm613_vm1, %v6360_v11 }
 0x48c   : > { %5327 = vmatpush3.bf16.msra.mxu1 %v2237_v39  ;;  %5328 = vmatprep.mubr.msk.bf16.mxu1 %vm613_vm1, %v6360_v11 }
 0x48d   : > { %5536 = vmatprep.subr.msk.bf16.mxu1 %vm1042_vm3, %v2163_v4 }
 0x493   : > { %v6395_v6 = vpop.f32.mrb[44].mxu0  ;;  %v5308_v7 = vpop.f32.mrb[44].mxu1  ;;  %5329 = vmatmul.mubr.msk.bf16.vlgmr.msra.gmra.mrb[52].mxu1 %vm613_vm1, %v6379_v1 }
 0x494   : > { %5339 = vmatpush3.bf16.msra.mxu1 %v2341_v5  ;;  %v6399_v8 = vpop.f32.mrb[45].mxu0  ;;  %v2068_v10 = vpop.f32.mrb[45].mxu1  ;;  %5340 = vmatprep.mubr.msk.bf16.mxu1 %vm613_vm1, %v6360_v11  ;;  %v2166_v20 = vpack.c.bf16 %v5308_v7, %v5308_v7  ;;  %v3887_v5 = vrot.slane %v3835_v59, %v3858_v3  ;;  %v3837_v7 = vld [vmem:[%s6497_s30 + $0xc] sm:$0xf] }
 0x495   : > { %v2164_v53 = vpack.c.bf16 %v2068_v10, %v2068_v10  ;;  %v6403_v12 = vpop.f32.mrb[46].mxu0  ;;  %v5309_v13 = vpop.f32.mrb[46].mxu1  ;;  %v3929_v10 = vrot.slane %v3837_v7, %v3844_v49 }
 0x496   : > { %v6405_v15 = vpop.f32.mrb[47].mxu0  ;;  %v2071_v16 = vpop.f32.mrb[47].mxu1  ;;  %v2497_v26 = vsel %vm1042_vm3, %v2166_v20, 0  ;;  %v2167_v28 = vpack.c.bf16 %v5309_v13, %v5309_v13  ;;  %v3838_v13 = vld [vmem:[%s6497_s30 + $0x10] sm:$0xf] }
 0x497   : > { %v2393_v21 = vsel %vm1042_vm3, %v2164_v53, 0  ;;  %v2165_v22 = vpack.c.bf16 %v2071_v16, %v2071_v16  ;;  %5537 = vmatprep.subr.msk.bf16.mxu0 %vm1042_vm3, %v2164_v53  ;;  %v3936_v53 = vrot.slane %v3837_v7, %v3851_v58 }
 0x498   : > { %5345 = vmatpush3.bf16.msra.mxu0 %v2393_v21  ;;  %v2549_v33 = vsel %vm1042_vm3, %v2167_v28, 0  ;;  %v3865_v21 = vsub.s32 3, %v6500_v51 }
 0x499   : > { %v2445_v23 = vsel %vm1042_vm3, %v2165_v22, 0  ;;  %5538 = vmatprep.subr.msk.bf16.mxu1 %vm1042_vm3, %v2165_v22  ;;  %5539 = vmatprep.subr.msk.bf16.mxu0 %vm1042_vm3, %v2166_v20  ;;  %v3957_v20 = vrot.slane %v3838_v13, %v3844_v49  ;;  %v3964_v22 = vrot.slane %v3838_v13, %v3851_v58 }
 0x49b   : > { %v5314_v48 = vpop.f32.mrb[48].mxu0  ;;  %5341 = vmatmul.mubr.msk.bf16.vlgmr.msra.gmra.mrb[56].mxu1 %vm613_vm1, %v6379_v1  ;;  %5347 = vmatmul.mubr.msk.bf16.vlgmr.msra.gmra.mrb[60].mxu0 %vm613_vm1, %v6379_v1 }
 0x49c   : > { %5351 = vmatpush3.bf16.msra.mxu1 %v2445_v23  ;;  %v2125_v29 = vpop.f32.mrb[49].mxu0  ;;  %5357 = vmatpush3.bf16.msra.mxu0 %v2497_v26  ;;  %v2602_v17 = vpack.c.bf16 %v5314_v48, %v5314_v48  ;;  %v3894_v26 = vrot.slane %v3835_v59, %v3865_v21  ;;  %v3839_v48 = vld [vmem:[%s6497_s30 + $0x14] sm:$0xf] }
 0x49d   : > { %v2600_v14 = vpack.c.bf16 %v2125_v29, %v2125_v29  ;;  %5540 = vmatprep.subr.msk.bf16.mxu1 %vm1042_vm3, %v2167_v28  ;;  %v5315_v30 = vpop.f32.mrb[50].mxu0  ;;  %5352 = vmatprep.mubr.msk.bf16.mxu1 %vm613_vm1, %v6360_v11  ;;  %v3943_v28 = vrot.slane %v3837_v7, %v3858_v3  ;;  %v3985_v29 = vrot.slane %v3839_v48, %v3844_v49 }
 0x49e   : > { %v2128_v32 = vpop.f32.mrb[51].mxu0  ;;  %5358 = vmatprep.mubr.msk.bf16.mxu0 %vm613_vm1, %v6360_v11  ;;  %v2713_v40 = vsel %vm1042_vm3, %v2602_v17, 0  ;;  %v2603_v9 = vpack.c.bf16 %v5315_v30, %v5315_v30 }
 0x49f   : > { %5541 = vmatprep.subr.msk.bf16.mxu0 %vm1042_vm3, %v2600_v14  ;;  %v2609_v18 = vsel %vm1042_vm3, %v2600_v14, 0  ;;  %v2601_v34 = vpack.c.bf16 %v2128_v32, %v2128_v32  ;;  %v3992_v14 = vrot.slane %v3839_v48, %v3851_v58  ;;  %v3971_v32 = vrot.slane %v3838_v13, %v3858_v3 }
 0x4a0   : > { %v2765_v42 = vsel %vm1042_vm3, %v2603_v9, 0 }
 0x4a1   : > { %v2661_v27 = vsel %vm1042_vm3, %v2601_v34, 0 }
 0x4a3   : > { %v5318_v24 = vpop.f32.mrb[52].mxu0  ;;  %5353 = vmatmul.mubr.msk.bf16.vlgmr.msra.gmra.mrb[60].mxu1 %vm613_vm1, %v6379_v1  ;;  %5359 = vmatmul.mubr.msk.bf16.vlgmr.msra.gmra.mrb[64].mxu0 %vm613_vm1, %v6379_v1 }
 0x4a4   : > { %5363 = vmatpush3.bf16.msra.mxu1 %v2549_v33  ;;  %5369 = vmatpush3.bf16.msra.mxu0 %v2609_v18  ;;  %v2141_v25 = vpop.f32.mrb[53].mxu0  ;;  %v2606_v37 = vpack.c.bf16 %v5318_v24, %v5318_v24  ;;  %v3840_v33 = vld [vmem:[%s6497_s30 + $0x18] sm:$0xf]  ;;  %v3999_v24 = vrot.slane %v3839_v48, %v3858_v3 }
 0x4a5   : > { %5542 = vmatprep.subr.msk.bf16.mxu1 %vm1042_vm3, %v2601_v34  ;;  %5543 = vmatprep.subr.msk.bf16.mxu0 %vm1042_vm3, %v2602_v17  ;;  %v5319_v38 = vpop.f32.mrb[54].mxu0  ;;  %v2604_v36 = vpack.c.bf16 %v2141_v25, %v2141_v25  ;;  %v4013_v17 = vrot.slane %v3840_v33, %v3844_v49  ;;  %v4020_v18 = vrot.slane %v3840_v33, %v3851_v58  ;;  %v3841_v25 = vld [vmem:[%s6497_s30 + $0x1c] sm:$0xf] }
 0x4a6   : > { %v2144_v31 = vpop.f32.mrb[55].mxu0  ;;  %5364 = vmatprep.mubr.msk.bf16.mxu1 %vm613_vm1, %v6360_v11  ;;  %5370 = vmatprep.mubr.msk.bf16.mxu0 %vm613_vm1, %v6360_v11  ;;  %v2921_v41 = vsel %vm1042_vm3, %v2606_v37, 0  ;;  %v2607_v45 = vpack.c.bf16 %v5319_v38, %v5319_v38  ;;  %v3950_v34 = vrot.slane %v3837_v7, %v3865_v21  ;;  %v4041_v38 = vrot.slane %v3841_v25, %v3844_v49 }
 0x4a7   : > { %v2817_v44 = vsel %vm1042_vm3, %v2604_v36, 0  ;;  %v2605_v47 = vpack.c.bf16 %v2144_v31, %v2144_v31  ;;  %v4048_v31 = vrot.slane %v3841_v25, %v3851_v58 }
 0x4a8   : > { %v2973_v52 = vsel %vm1042_vm3, %v2607_v45, 0 }
 0x4a9   : > { %v2869_v50 = vsel %vm1042_vm3, %v2605_v47, 0 }
 0x4ab   : > { %5365 = vmatmul.mubr.msk.bf16.vlgmr.msra.gmra.mrb[64].mxu1 %vm613_vm1, %v6379_v1  ;;  %5371 = vmatmul.mubr.msk.bf16.vlgmr.msra.gmra.mrb[68].mxu0 %vm613_vm1, %v6379_v1 }
 0x4ac   : > { %5375 = vmatpush3.bf16.msra.mxu1 %v2661_v27  ;;  %5381 = vmatpush3.bf16.msra.mxu0 %v2713_v40  ;;  %v3978_v40 = vrot.slane %v3838_v13, %v3865_v21  ;;  %v4006_v27 = vrot.slane %v3839_v48, %v3865_v21 }
 0x4ad   : > { %5544 = vmatprep.subr.msk.bf16.mxu1 %vm1042_vm3, %v2603_v9  ;;  %5545 = vmatprep.subr.msk.bf16.mxu0 %vm1042_vm3, %v2604_v36  ;;  %v4027_v9 = vrot.slane %v3840_v33, %v3858_v3  ;;  %v4055_v36 = vrot.slane %v3841_v25, %v3858_v3 }
 0x4ae   : > { %5376 = vmatprep.mubr.msk.bf16.mxu1 %vm613_vm1, %v6360_v11  ;;  %5382 = vmatprep.mubr.msk.bf16.mxu0 %vm613_vm1, %v6360_v11 }
 0x4b3   : > { %5377 = vmatmul.mubr.msk.bf16.vlgmr.msra.gmra.mrb[68].mxu1 %vm613_vm1, %v6379_v1  ;;  %5383 = vmatmul.mubr.msk.bf16.vlgmr.msra.gmra.mrb[72].mxu0 %vm613_vm1, %v6379_v1 }
 0x4b4   : > { %5387 = vmatpush3.bf16.msra.mxu1 %v2765_v42  ;;  %5393 = vmatpush3.bf16.msra.mxu0 %v2817_v44  ;;  %v4034_v42 = vrot.slane %v3840_v33, %v3865_v21 }
 0x4b5   : > { %5546 = vmatprep.subr.msk.bf16.mxu1 %vm1042_vm3, %v2605_v47  ;;  %5547 = vmatprep.subr.msk.bf16.mxu0 %vm1042_vm3, %v2606_v37  ;;  %v4062_v37 = vrot.slane %v3841_v25, %v3865_v21 }
 0x4b6   : > { %5388 = vmatprep.mubr.msk.bf16.mxu1 %vm613_vm1, %v6360_v11  ;;  %5394 = vmatprep.mubr.msk.bf16.mxu0 %vm613_vm1, %v6360_v11 }
 0x4bb   : > { %5389 = vmatmul.mubr.msk.bf16.vlgmr.msra.gmra.mrb[72].mxu1 %vm613_vm1, %v6379_v1  ;;  %5395 = vmatmul.mubr.msk.bf16.vlgmr.msra.gmra.mrb[76].mxu0 %vm613_vm1, %v6379_v1 }
 0x4bc   : > { %5399 = vmatpush3.bf16.msra.mxu1 %v2869_v50  ;;  %5405 = vmatpush3.bf16.msra.mxu0 %v2921_v41 }
 0x4bd   : > { %5548 = vmatprep.subr.msk.bf16.mxu1 %vm1042_vm3, %v2607_v45  ;;  %5400 = vmatprep.mubr.msk.bf16.mxu1 %vm613_vm1, %v6360_v11  ;;  %vm4562_vm3 = vcmask 1043459  }
 0x4be   : > { %5406 = vmatprep.mubr.msk.bf16.mxu0 %vm613_vm1, %v6360_v11  ;;  %5502 = vmatprep.subr.bf16.mxu0 %v6485_v62 }
 0x4c3   : > { %5401 = vmatmul.mubr.msk.bf16.vlgmr.msra.gmra.mrb[76].mxu1 %vm613_vm1, %v6379_v1  ;;  %5407 = vmatmul.mubr.msk.bf16.vlgmr.msra.gmra.mrb[80].mxu0 %vm613_vm1, %v6379_v1 }
 0x4c4   : > { %5411 = vmatpush3.bf16.msra.mxu1 %v2973_v52  ;;  %5412 = vmatprep.mubr.msk.bf16.mxu1 %vm613_vm1, %v6360_v11  ;;  %v3834_v11 = vld [vmem:[%s6497_s30] sm:$0xf] }
 0x4c5   : > { %5506 = vmatprep.subr.bf16.mxu1 %v6485_v62  ;;  %5504 = vmatpush3.bf16.msra.mxu0 %v6485_v62  ;;  %v3845_v43 = vrot.slane %v3834_v11, %v3844_v49  ;;  %v3852_v61 = vrot.slane %v3834_v11, %v3851_v58  ;;  %v3859_v39 = vrot.slane %v3834_v11, %v3858_v3 }
 0x4c6   : > { %5510 = vmatprep.subr.bf16.mxu0 %v6485_v62  ;;  %v3866_v23 = vrot.slane %v3834_v11, %v3865_v21 }
 0x4c7   : > { %3847 = vbcast.lane.b32.xlu0 %v3845_v43, 256  ;;  %3854 = vbcast.lane.b32.xlu1 %v3852_v61, 256 }
 0x4cb   : > { %5413 = vmatmul.mubr.msk.bf16.vlgmr.msra.gmra.mrb[80].mxu1 %vm613_vm1, %v6379_v1  ;;  %v3836_v1 = vld [vmem:[%s6497_s30 + $0x8] sm:$0xf]  ;;  %3875 = vbcast.lane.b32.xlu0 %v3873_v35, 256  ;;  %s5013_s30 = sshll.u32 %s5959_s13, 7  ;;  %s5781_s13 = scalar_lea.vmem %s7136_s19, 128 }
 0x4cc   : > { %5508 = vmatpush3.bf16.msra.mxu1 %v6485_v62  ;;  %v3901_v55 = vrot.slane %v3836_v1, %v3844_v49  ;;  %3882 = vbcast.lane.b32.xlu1 %v3880_v0, 256  ;;  %v3908_v4 = vrot.slane %v3836_v1, %v3851_v58  ;;  %v3915_v16 = vrot.slane %v3836_v1, %v3858_v3  ;;  %s7134_s1 = scalar_lea.hbm %s7194_s16, %s5013_s30  ;;  %p5782_p11 = scmp.ne.s32.totalorder %s7136_s19, %s5781_s13 }
 0x4cd   : > { %5514 = vmatprep.subr.bf16.mxu1 %v6485_v62  ;;  %v3922_v30 = vrot.slane %v3836_v1, %v3865_v21 }
 0x4ce   : > { %p5783_p12 = pnand %p5782_p11, %p5976_p5 }
 0x4cf   : > { %3903 = vbcast.lane.b32.xlu0 %v3901_v55, 256 }
 0x4d0   : > { %3910 = vbcast.lane.b32.xlu1 %v3908_v4, 256  ;;  %p5784_p13 = pneg %p5783_p12 }
 0x4d3   : > { %3861 = vbcast.lane.b32.xlu0 %v3859_v39, 256 }
 0x4d4   : > { %3889 = vbcast.lane.b32.xlu1 %v3887_v5, 256 }
 0x4d7   : > { %3931 = vbcast.lane.b32.xlu0 %v3929_v10, 256 }
 0x4d8   : > { %3938 = vbcast.lane.b32.xlu1 %v3936_v53, 256 }
 0x4db   : > { %3917 = vbcast.lane.b32.xlu0 %v3915_v16, 256 }
 0x4dc   : > { %3959 = vbcast.lane.b32.xlu1 %v3957_v20, 256 }
 0x4df   : > { %3966 = vbcast.lane.b32.xlu0 %v3964_v22, 256 }
 0x4e0   : > { %3868 = vbcast.lane.b32.xlu1 %v3866_v23, 256 }
 0x4e3   : > { %3896 = vbcast.lane.b32.xlu0 %v3894_v26, 256 }
 0x4e4   : > { %3945 = vbcast.lane.b32.xlu1 %v3943_v28, 256 }
 0x4e7   : > { %3987 = vbcast.lane.b32.xlu0 %v3985_v29, 256 }
 0x4e8   : > { %3994 = vbcast.lane.b32.xlu1 %v3992_v14, 256 }
 0x4eb   : > { %3924 = vbcast.lane.b32.xlu0 %v3922_v30, 256 }
 0x4ec   : > { %3973 = vbcast.lane.b32.xlu1 %v3971_v32, 256 }
 0x4ef   : > { %4015 = vbcast.lane.b32.xlu0 %v4013_v17, 256 }
 0x4f0   : > { %4022 = vbcast.lane.b32.xlu1 %v4020_v18, 256 }
 0x4f3   : > { %3952 = vbcast.lane.b32.xlu0 %v3950_v34, 256 }
 0x4f4   : > { %4001 = vbcast.lane.b32.xlu1 %v3999_v24, 256 }
 0x4f7   : > { %4043 = vbcast.lane.b32.xlu0 %v4041_v38, 256 }
 0x4f8   : > { %4050 = vbcast.lane.b32.xlu1 %v4048_v31, 256 }
 0x4fb   : > { %3980 = vbcast.lane.b32.xlu0 %v3978_v40, 256 }
 0x4fc   : > { %4029 = vbcast.lane.b32.xlu1 %v4027_v9, 256 }
 0x4ff   : > { %4008 = vbcast.lane.b32.xlu0 %v4006_v27, 256 }
 0x500   : > { %4057 = vbcast.lane.b32.xlu1 %v4055_v36, 256 }
 0x503   : > { %4036 = vbcast.lane.b32.xlu0 %v4034_v42, 256 }
 0x504   : > { %4064 = vbcast.lane.b32.xlu1 %v4062_v37, 256 }
 0x55d   : > { %v5336_v44 = vpop.f32.mrb[56].mxu0 }
 0x55e   : > { %v3036_v47 = vmul.f32 %v5336_v44, %v6366_v56  ;;  %v5324_v41 = vpop.f32.mrb[48].mxu1  ;;  %v2325_v45 = vpop.f32.mrb[57].mxu0 }
 0x55f   : > { %v3028_v50 = vmul.f32 %v5324_v41, %v6368_v57  ;;  %v3034_v52 = vmul.f32 %v6366_v56, %v2325_v45  ;;  %v2221_v46 = vpop.f32.mrb[49].mxu1  ;;  %v5337_v54 = vpop.f32.mrb[58].mxu0 }
 0x560   : > { %v3026_v11 = vmul.f32 %v2221_v46, %v6368_v57  ;;  %v3037_v49 = vmul.f32 %v5337_v54, %v6366_v56  ;;  %v5325_v58 = vpop.f32.mrb[50].mxu1  ;;  %v2328_v59 = vpop.f32.mrb[59].mxu0 }
 0x561   : > { %v3029_v43 = vmul.f32 %v5325_v58, %v6368_v57  ;;  %v3035_v61 = vmul.f32 %v6366_v56, %v2328_v59  ;;  %v2224_v35 = vpop.f32.mrb[51].mxu1 }
 0x562   : > { %v3027_v0 = vmul.f32 %v2224_v35, %v6368_v57  ;;  %5420 = vmatprep.mubr.msk.f32.mxu0 %vm946_vm0, %v3026_v11 }
 0x564   : > { %5421 = vmatmul.mubr.msk.f32.vlgmr.msra.gmra.mrb[84].mxu0 %vm946_vm0, %v3027_v0 }
 0x565   : > { %5423 = vmatprep.mubr.msk.f32.mxu0 %vm946_vm0, %v3028_v50  ;;  %5512 = vmatpush3.bf16.msra.mxu0 %v6485_v62 }
 0x566   : > { %v5330_v1 = vpop.f32.mrb[52].mxu1  ;;  %5518 = vmatprep.subr.bf16.mxu0 %v6485_v62 }
 0x567   : > { %v3032_v55 = vmul.f32 %v5330_v1, %v6373_v63  ;;  %v2273_v3 = vpop.f32.mrb[53].mxu1 }
 0x568   : > { %v3030_v4 = vmul.f32 %v2273_v3, %v6373_v63  ;;  %v5331_v56 = vpop.f32.mrb[54].mxu1  ;;  %5424 = vmatmul.mubr.msk.f32.gmra.mrb[86].mxu0 %vm946_vm0, %v3029_v43 }
 0x569   : > { %v3033_v57 = vmul.f32 %v5331_v56, %v6373_v63  ;;  %v2276_v39 = vpop.f32.mrb[55].mxu1  ;;  %5440 = vmatprep.mubr.msk.f32.mxu0 %vm946_vm0, %v3034_v52 }
 0x56a   : > { %v3031_v5 = vmul.f32 %v2276_v39, %v6373_v63  ;;  %5430 = vmatprep.mubr.msk.f32.mxu1 %vm946_vm0, %v3030_v4 }
 0x56c   : > { %5431 = vmatmul.mubr.msk.f32.vlgmr.msra.gmra.mrb[84].mxu1 %vm946_vm0, %v3031_v5  ;;  %5441 = vmatmul.mubr.msk.f32.vlgmr.msra.gmra.mrb[88].mxu0 %vm946_vm0, %v3035_v61 }
 0x56d   : > { %5433 = vmatprep.mubr.msk.f32.mxu1 %vm946_vm0, %v3032_v55  ;;  %5443 = vmatprep.mubr.msk.f32.mxu0 %vm946_vm0, %v3036_v47 }
 0x56e   : > { %v5342_v7 = vpop.f32.mrb[56].mxu1  ;;  %v5348_v10 = vpop.f32.mrb[60].mxu0  ;;  %5516 = vmatpush3.bf16.msra.mxu1 %v6485_v62  ;;  %5520 = vmatpush3.bf16.msra.mxu0 %v6485_v62 }
 0x56f   : > { %v3040_v53 = vmul.f32 %v5342_v7, %v6370_v60  ;;  %v3044_v63 = vmul.f32 %v5348_v10, %v6399_v8  ;;  %v2377_v13 = vpop.f32.mrb[57].mxu1  ;;  %v2429_v16 = vpop.f32.mrb[61].mxu0  ;;  %5522 = vmatprep.subr.bf16.mxu1 %v6485_v62  ;;  %5526 = vmatprep.subr.bf16.mxu0 %v6485_v62 }
 0x570   : > { %v3038_v20 = vmul.f32 %v6370_v60, %v2377_v13  ;;  %v3042_v21 = vmul.f32 %v2429_v16, %v6399_v8  ;;  %v5343_v22 = vpop.f32.mrb[58].mxu1  ;;  %v5349_v23 = vpop.f32.mrb[62].mxu0  ;;  %5434 = vmatmul.mubr.msk.f32.gmra.mrb[86].mxu1 %vm946_vm0, %v3033_v57  ;;  %5444 = vmatmul.mubr.msk.f32.gmra.mrb[90].mxu0 %vm946_vm0, %v3037_v49 }
 0x571   : > { %v3041_v26 = vmul.f32 %v5343_v22, %v6370_v60  ;;  %v3045_v28 = vmul.f32 %v5349_v23, %v6399_v8  ;;  %v2380_v48 = vpop.f32.mrb[59].mxu1  ;;  %v2432_v29 = vpop.f32.mrb[63].mxu0 }
 0x572   : > { %v3039_v14 = vmul.f32 %v6370_v60, %v2380_v48  ;;  %v3043_v30 = vmul.f32 %v2432_v29, %v6399_v8  ;;  %5450 = vmatprep.mubr.msk.f32.mxu1 %vm946_vm0, %v3038_v20  ;;  %5460 = vmatprep.mubr.msk.f32.mxu0 %vm946_vm0, %v3042_v21  ;;  %v3855_v48 = vpop.permute.xlu1 %3854 }
 0x574   : > { %5451 = vmatmul.mubr.msk.f32.vlgmr.msra.gmra.mrb[88].mxu1 %vm946_vm0, %v3039_v14  ;;  %5461 = vmatmul.mubr.msk.f32.vlgmr.msra.gmra.mrb[92].mxu0 %vm946_vm0, %v3043_v30 }
 0x575   : > { %5453 = vmatprep.mubr.msk.f32.mxu1 %vm946_vm0, %v3040_v53  ;;  %5463 = vmatprep.mubr.msk.f32.mxu0 %vm946_vm0, %v3044_v63 }
 0x576   : > { %v5354_v32 = vpop.f32.mrb[60].mxu1  ;;  %v5360_v33 = vpop.f32.mrb[64].mxu0  ;;  %5524 = vmatpush3.bf16.msra.mxu1 %v6485_v62  ;;  %5528 = vmatpush3.bf16.msra.mxu0 %v6485_v62 }
 0x577   : > { %v3048_v60 = vmul.f32 %v5354_v32, %v6405_v15  ;;  %v3052_v8 = vmul.f32 %v5360_v33, %v6395_v6  ;;  %v2481_v17 = vpop.f32.mrb[61].mxu1  ;;  %v2533_v18 = vpop.f32.mrb[65].mxu0  ;;  %5530 = vmatprep.subr.bf16.mxu1 %v6485_v62  ;;  %5496 = vmatprep.subr.mxu0 %v5845_v2 }
 0x578   : > { %v3046_v34 = vmul.f32 %v2481_v17, %v6405_v15  ;;  %v3050_v24 = vmul.f32 %v6395_v6, %v2533_v18  ;;  %v5355_v25 = vpop.f32.mrb[62].mxu1  ;;  %v5361_v38 = vpop.f32.mrb[66].mxu0  ;;  %5454 = vmatmul.mubr.msk.f32.gmra.mrb[90].mxu1 %vm946_vm0, %v3041_v26  ;;  %5464 = vmatmul.mubr.msk.f32.gmra.mrb[94].mxu0 %vm946_vm0, %v3045_v28 }
 0x579   : > { %v3049_v31 = vmul.f32 %v5355_v25, %v6405_v15  ;;  %v3053_v40 = vmul.f32 %v5361_v38, %v6395_v6  ;;  %v2484_v9 = vpop.f32.mrb[63].mxu1  ;;  %v2536_v27 = vpop.f32.mrb[67].mxu0  ;;  %v5848_v25 = vmov 0  }
 0x57a   : > { %v3047_v36 = vmul.f32 %v2484_v9, %v6405_v15  ;;  %v3051_v42 = vmul.f32 %v6395_v6, %v2536_v27  ;;  %5470 = vmatprep.mubr.msk.f32.mxu1 %vm946_vm0, %v3046_v34  ;;  %5480 = vmatprep.mubr.msk.f32.mxu0 %vm946_vm0, %v3050_v24  ;;  %v3848_v26 = vpop.permute.xlu0 %3847  ;;  %v3883_v14 = vpop.permute.xlu1 %3882 }
 0x57b   : > { %5612 = vset.pattern.permute.xlu0 %v5848_v25 }
 0x57c   : > { %5471 = vmatmul.mubr.msk.f32.vlgmr.msra.gmra.mrb[92].mxu1 %vm946_vm0, %v3047_v36  ;;  %5481 = vmatmul.mubr.msk.f32.vlgmr.msra.gmra.mrb[96].mxu0 %vm946_vm0, %v3051_v42 }
 0x57d   : > { %5473 = vmatprep.mubr.msk.f32.mxu1 %vm946_vm0, %v3048_v60  ;;  %5483 = vmatprep.mubr.msk.f32.mxu0 %vm946_vm0, %v3052_v8 }
 0x57e   : > { %v5366_v37 = vpop.f32.mrb[64].mxu1  ;;  %5532 = vmatpush3.bf16.msra.mxu1 %v6485_v62  ;;  %v6579_v44 = vpop.f32.mrb[68].mxu0 }
 0x57f   : > { %v3056_v15 = vmul.f32 %v5366_v37, %v6403_v12  ;;  %v2585_v6 = vpop.f32.mrb[65].mxu1  ;;  %v6582_v47 = vpop.f32.mrb[69].mxu0 }
 0x580   : > { %v3054_v41 = vmul.f32 %v6403_v12, %v2585_v6  ;;  %v5367_v45 = vpop.f32.mrb[66].mxu1  ;;  %5474 = vmatmul.mubr.msk.f32.gmra.mrb[94].mxu1 %vm946_vm0, %v3049_v31  ;;  %5484 = vmatmul.mubr.msk.f32.gmra.mrb[98].mxu0 %vm946_vm0, %v3053_v40  ;;  %v6587_v50 = vpop.f32.mrb[70].mxu0 }
 0x581   : > { %v3057_v52 = vmul.f32 %v5367_v45, %v6403_v12  ;;  %v2588_v46 = vpop.f32.mrb[67].mxu1  ;;  %v6590_v62 = vpop.f32.mrb[71].mxu0  ;;  %5498 = vmatprep.mubr.msk.f32.mxu0 %vm5846_vm10, %v5845_v2  ;;  %vm4559_vm10 = vcmask 1041409  }
 0x582   : > { %v3055_v54 = vmul.f32 %v6403_v12, %v2588_v46  ;;  %5490 = vmatprep.mubr.msk.f32.mxu1 %vm946_vm0, %v3054_v41  ;;  %v3876_v28 = vpop.permute.xlu0 %3875  ;;  %v3911_v32 = vpop.permute.xlu1 %3910 }
 0x584   : > { %5491 = vmatmul.mubr.msk.f32.vlgmr.msra.gmra.mrb[96].mxu1 %vm946_vm0, %v3055_v54 }
 0x585   : > { %5493 = vmatprep.mubr.msk.f32.mxu1 %vm946_vm0, %v3056_v15 }
 0x586   : > { %v6598_v11 = vpop.f32.mrb[68].mxu1  ;;  %v6600_v49 = vpop.f32.mrb[72].mxu0 }
 0x587   : > { %v6603_v58 = vpop.f32.mrb[69].mxu1  ;;  %v6605_v59 = vpop.f32.mrb[73].mxu0 }
 0x588   : > { %5494 = vmatmul.mubr.msk.f32.gmra.mrb[98].mxu1 %vm946_vm0, %v3057_v52  ;;  %v6607_v43 = vpop.f32.mrb[70].mxu1  ;;  %v6609_v2 = vpop.f32.mrb[74].mxu0  ;;  %vm4098_vm0 = vcmask 15360  }
 0x589   : > { %v6611_v12 = vpop.f32.mrb[71].mxu1  ;;  %v6613_v61 = vpop.f32.mrb[75].mxu0 }
 0x58a   : > { %v3904_v29 = vpop.permute.xlu0 %3903  ;;  %v3890_v60 = vpop.permute.xlu1 %3889 }
 0x58e   : > { %v6615_v35 = vpop.f32.mrb[76].mxu0  ;;  %v6617_v0 = vpop.f32.mrb[72].mxu1 }
 0x58f   : > { %7211 = vst [vmem:[#allocation8_spill] sm:$0xff] %v6615_v35  ;;  %7212 = vst [vmem:[#allocation9_spill] sm:$0xff] %v6617_v0  ;;  %v6619_v1 = vpop.f32.mrb[77].mxu0  ;;  %v6621_v55 = vpop.f32.mrb[73].mxu1 }
 0x590   : > { %7213 = vst [vmem:[#allocation10_spill] sm:$0xff] %v6619_v1  ;;  %7214 = vst [vmem:[#allocation11_spill] sm:$0xff] %v6621_v55  ;;  %v6623_v3 = vpop.f32.mrb[78].mxu0  ;;  %v6625_v4 = vpop.f32.mrb[74].mxu1 }
 0x591   : > { %7215 = vst [vmem:[#allocation12_spill] sm:$0xff] %v6623_v3  ;;  %7216 = vst [vmem:[#allocation13_spill] sm:$0xff] %v6625_v4  ;;  %v6627_v56 = vpop.f32.mrb[79].mxu0  ;;  %v6629_v57 = vpop.f32.mrb[75].mxu1 }
 0x592   : > { %7217 = vst [vmem:[#allocation14_spill] sm:$0xff] %v6627_v56  ;;  %7218 = vst [vmem:[#allocation15_spill] sm:$0xff] %v6629_v57  ;;  %v3862_v30 = vpop.permute.xlu0 %3861  ;;  %v6659_v17 = vpop.permute.xlu1 %3938 }
 0x596   : > { %v6631_v39 = vpop.f32.mrb[80].mxu0  ;;  %v6633_v5 = vpop.f32.mrb[76].mxu1 }
 0x597   : > { %7219 = vst [vmem:[#allocation16_spill] sm:$0xff] %v6631_v39  ;;  %7220 = vst [vmem:[#allocation17_spill] sm:$0xff] %v6633_v5  ;;  %v6635_v7 = vpop.f32.mrb[81].mxu0  ;;  %v6641_v63 = vpop.f32.mrb[77].mxu1 }
 0x598   : > { %7221 = vst [vmem:[#allocation18_spill] sm:$0xff] %v6635_v7  ;;  %v6637_v10 = vpop.f32.mrb[82].mxu0  ;;  %7224 = vst [vmem:[#allocation21_spill] sm:$0xff] %v6641_v63  ;;  %v6643_v13 = vpop.f32.mrb[78].mxu1 }
 0x599   : > { %7222 = vst [vmem:[#allocation19_spill] sm:$0xff] %v6637_v10  ;;  %v6639_v53 = vpop.f32.mrb[83].mxu0  ;;  %7225 = vst [vmem:[#allocation22_spill] sm:$0xff] %v6643_v13  ;;  %v6645_v16 = vpop.f32.mrb[79].mxu1 }
 0x59a   : > { %7223 = vst [vmem:[#allocation20_spill] sm:$0xff] %v6639_v53  ;;  %7226 = vst [vmem:[#allocation23_spill] sm:$0xff] %v6645_v16  ;;  %v6655_v33 = vpop.permute.xlu0 %3931  ;;  %v6663_v34 = vpop.permute.xlu1 %3959 }
 0x59e   : > { %v6647_v20 = vpop.f32.mrb[80].mxu1  ;;  %v6657_v8 = vpop.permute.xlu0 %3917 }
 0x59f   : > { %7227 = vst [vmem:[#allocation24_spill] sm:$0xff] %v6647_v20  ;;  %v6649_v21 = vpop.f32.mrb[81].mxu1  ;;  %v3869_v38 = vpop.permute.xlu1 %3868 }
 0x5a0   : > { %7228 = vst [vmem:[#allocation25_spill] sm:$0xff] %v6649_v21  ;;  %v6651_v22 = vpop.f32.mrb[82].mxu1 }
 0x5a1   : > { %7229 = vst [vmem:[#allocation26_spill] sm:$0xff] %v6651_v22  ;;  %v6653_v23 = vpop.f32.mrb[83].mxu1 }
 0x5a2   : > { %7230 = vst [vmem:[#allocation27_spill] sm:$0xff] %v6653_v23  ;;  %v6661_v18 = vpop.permute.xlu0 %3966 }
 0x5a3   : > { %v6667_v40 = vpop.permute.xlu1 %3945 }
 0x5a6   : > { %v3897_v24 = vpop.permute.xlu0 %3896 }
 0x5a7   : > { %v6669_v27 = vpop.permute.xlu1 %3994 }
 0x5aa   : > { %v6665_v31 = vpop.permute.xlu0 %3987 }
 0x5ab   : > { %v6675_v46 = vpop.permute.xlu1 %3973 }
 0x5ae   : > { %v3925_v9 = vpop.permute.xlu0 %3924 }
 0x5b2   : > { %v6671_v36 = vpop.permute.xlu0 %4015 }
 0x5b6   : > { %v6677_v19 = vpop.permute.xlu0 %3952 }
 0x637   : > { %v5422_v42 = vpop.f32.mrb[84].mxu0 }
 0x638   : > { %v4067_v37 = vmul.f32 %v5422_v42, %v3855_v48  ;;  %v3136_v15 = vpop.f32.mrb[85].mxu0 }
 0x639   : > { %v4066_v6 = vmul.f32 %v3848_v26, %v3136_v15 }
 0x63a   : > { %v4100_v41 = vsel %vm4098_vm0, %v4067_v37, -inf }
 0x63b   : > { %v4099_v45 = vsel %vm4098_vm0, %v4066_v6, -inf  ;;  %v5425_v52 = vpop.f32.mrb[86].mxu0 }
 0x63c   : > { %v4101_v54 = vmax.f32 %v4099_v45, %v4100_v41  ;;  %v3146_v25 = vpop.f32.mrb[87].mxu0  ;;  %v4069_v51 = vmul.f32 %v5425_v52, %v3869_v38 }
 0x63d   : > { %v4068_v22 = vmul.f32 %v3862_v30, %v3146_v25 }
 0x63e   : > { %v4104_v39 = vsel %vm4098_vm0, %v4069_v51, -inf }
 0x63f   : > { %v4102_v20 = vsel %vm4098_vm0, %v4068_v22, -inf  ;;  %v5432_v23 = vpop.f32.mrb[84].mxu1  ;;  %v5442_v21 = vpop.f32.mrb[88].mxu0 }
 0x640   : > { %v4103_v48 = vmax.f32 %v4101_v54, %v4102_v20  ;;  %v6680_v42 = vmul.f32 %v5432_v23, %v3883_v14  ;;  %v6682_v26 = vmul.f32 %v5442_v21, %v3911_v32  ;;  %v3233_v15 = vpop.f32.mrb[85].mxu1  ;;  %v3330_v10 = vpop.f32.mrb[89].mxu0 }
 0x641   : > { %v6685_v53 = vmul.f32 %v3876_v28, %v3233_v15  ;;  %v6687_v41 = vmul.f32 %v3904_v29, %v3330_v10  ;;  %v6693_v20 = vpop.permute.xlu1 %4022  ;;  %v6695_v23 = vpop.permute.xlu0 %4043 }
 0x642   : > { %v4105_v45 = vmax.f32 %v4103_v48, %v4104_v39  ;;  %v4107_v30 = vsel %vm4098_vm0, %v6680_v42, -inf  ;;  %v4114_v38 = vsel %vm4098_vm0, %v6682_v26, -inf }
 0x643   : > { %v4106_v21 = vsel %vm4098_vm0, %v6685_v53, -inf  ;;  %v4113_v28 = vsel %vm4098_vm0, %v6687_v41, -inf  ;;  %v5435_v14 = vpop.f32.mrb[86].mxu1  ;;  %v5445_v10 = vpop.f32.mrb[90].mxu0 }
 0x644   : > { %v4155_v29 = vsub.f32 %v4066_v6, %v4105_v45  ;;  %v4156_v39 = vsub.f32 %v4067_v37, %v4105_v45  ;;  %v4157_v32 = vsub.f32 %v4068_v22, %v4105_v45  ;;  %v4158_v52 = vsub.f32 %v4069_v51, %v4105_v45  ;;  %v3243_v54 = vpop.f32.mrb[87].mxu1  ;;  %v3340_v25 = vpop.f32.mrb[91].mxu0 }
 0x645   : > { %v4108_v48 = vmax.f32 %v4106_v21, %v4107_v30  ;;  %v4115_v15 = vmax.f32 %v4113_v28, %v4114_v38  ;;  %v4073_v7 = vmul.f32 %v5435_v14, %v3897_v24  ;;  %v4077_v13 = vmul.f32 %v5445_v10, %v3925_v9 }
 0x646   : > { %v4187_v5 = vmul.f32 1.442695, %v4155_v29  ;;  %v4189_v16 = vmul.f32 1.442695, %v4156_v39  ;;  %v4191_v63 = vmul.f32 1.442695, %v4157_v32  ;;  %v4072_v3 = vmul.f32 %v3890_v60, %v3243_v54 }
 0x647   : > { %v4193_v35 = vmul.f32 1.442695, %v4158_v52  ;;  %v4111_v56 = vsel %vm4098_vm0, %v4073_v7, -inf  ;;  %v4118_v1 = vsel %vm4098_vm0, %v4077_v13, -inf  ;;  %v4076_v6 = vmul.f32 %v6657_v8, %v3340_v25  ;;  %v5452_v37 = vpop.f32.mrb[88].mxu1  ;;  %v5462_v22 = vpop.f32.mrb[92].mxu0 }
 0x648   : > { %5669 = vpow2.f32 %v4187_v5  ;;  %v4109_v51 = vsel %vm4098_vm0, %v4072_v3, -inf  ;;  %v6706_v45 = vmul.f32 %v5452_v37, %v6659_v17  ;;  %v6709_v24 = vmul.f32 %v5462_v22, %v6661_v18  ;;  %v3427_v9 = vpop.f32.mrb[89].mxu1  ;;  %v3524_v60 = vpop.f32.mrb[93].mxu0 }
 0x649   : > { %5671 = vpow2.f32 %v4189_v16  ;;  %v4110_v30 = vmax.f32 %v4108_v48, %v4109_v51  ;;  %v4116_v38 = vsel %vm4098_vm0, %v4076_v6, -inf  ;;  %v6713_v21 = vmul.f32 %v6655_v33, %v3427_v9  ;;  %v3981_v8 = vpop.permute.xlu0 %3980  ;;  %v6719_v18 = vpop.permute.xlu1 %4001 }
 0x64a   : > { %5673 = vpow2.f32 %v4191_v63  ;;  %v4117_v5 = vmax.f32 %v4115_v15, %v4116_v38  ;;  %v4121_v28 = vsel %vm4098_vm0, %v6706_v45, -inf  ;;  %v4128_v17 = vsel %vm4098_vm0, %v6709_v24, -inf }
 0x64b   : > { %5675 = vpow2.f32 %v4193_v35  ;;  %v4112_v14 = vmax.f32 %v4110_v30, %v4111_v56  ;;  %v4120_v16 = vsel %vm4098_vm0, %v6713_v21, -inf  ;;  %v6724_v10 = vmul.f32 %v6663_v34, %v3524_v60  ;;  %v5455_v33 = vpop.f32.mrb[90].mxu1  ;;  %v5465_v29 = vpop.f32.mrb[94].mxu0 }
 0x64c   : > { %v4119_v63 = vmax.f32 %v4117_v5, %v4118_v1  ;;  %v4122_v39 = vmax.f32 %v4120_v16, %v4121_v28  ;;  %v6727_v32 = vmul.f32 %v5455_v33, %v6677_v19  ;;  %v6729_v52 = vmul.f32 %v5465_v29, %v3981_v8  ;;  %v3437_v54 = vpop.f32.mrb[91].mxu1  ;;  %v3534_v25 = vpop.f32.mrb[95].mxu0 }
 0x64d   : > { %v4159_v35 = vsub.f32 %v6685_v53, %v4112_v14  ;;  %v4160_v56 = vsub.f32 %v6680_v42, %v4112_v14  ;;  %v4161_v48 = vsub.f32 %v4072_v3, %v4112_v14  ;;  %v4162_v15 = vsub.f32 %v4073_v7, %v4112_v14  ;;  %v6739_v42 = vpop.permute.xlu1 %4050 }
 0x64e   : > { %v4163_v34 = vsub.f32 %v6687_v41, %v4119_v63  ;;  %v4164_v37 = vsub.f32 %v6682_v26, %v4119_v63  ;;  %v4165_v22 = vsub.f32 %v4076_v6, %v4119_v63  ;;  %v4166_v1 = vsub.f32 %v4077_v13, %v4119_v63 }
 0x64f   : > { %v4195_v51 = vmul.f32 1.442695, %v4159_v35  ;;  %v4197_v9 = vmul.f32 1.442695, %v4160_v56  ;;  %v4199_v19 = vmul.f32 1.442695, %v4161_v48  ;;  %v4080_v60 = vmul.f32 %v6667_v40, %v3437_v54 }
 0x650   : > { %v4201_v30 = vmul.f32 1.442695, %v4162_v15  ;;  %v4203_v38 = vmul.f32 1.442695, %v4163_v34  ;;  %v4205_v8 = vmul.f32 1.442695, %v4164_v37  ;;  %v6737_v53 = vmul.f32 %v6675_v46, %v3534_v25 }
 0x651   : > { %5677 = vpow2.f32 %v4195_v51  ;;  %v4207_v3 = vmul.f32 1.442695, %v4165_v22  ;;  %v4209_v7 = vmul.f32 1.442695, %v4166_v1  ;;  %v4127_v26 = vsel %vm4098_vm0, %v6724_v10, -inf  ;;  %v5472_v13 = vpop.f32.mrb[92].mxu1 }
 0x652   : > { %v6743_v41 = vpop.eup %5669  ;;  %5679 = vpow2.f32 %v4197_v9  ;;  %v4129_v6 = vmax.f32 %v4127_v26, %v4128_v17  ;;  %v4125_v40 = vsel %vm4098_vm0, %v6727_v32, -inf  ;;  %v4132_v46 = vsel %vm4098_vm0, %v6729_v52, -inf  ;;  %v5482_v5 = vpop.f32.mrb[96].mxu0 }
 0x653   : > { %v6749_v28 = vpop.f32.mrb[93].mxu1  ;;  %v6751_v14 = vpop.eup %5671  ;;  %v4251_v16 = vsel %vm4098_vm0, %v6743_v41, 0.0  ;;  %5681 = vpow2.f32 %v4199_v19  ;;  %v4123_v33 = vsel %vm4098_vm0, %v4080_v60, -inf  ;;  %v4130_v17 = vsel %vm4098_vm0, %v6737_v53, -inf }
 0x654   : > { %v6758_v29 = vpop.f32.mrb[97].mxu0  ;;  %v6760_v63 = vpop.f32.mrb[94].mxu1  ;;  %v4252_v25 = vsel %vm4098_vm0, %v6751_v14, 0.0  ;;  %5683 = vpow2.f32 %v4201_v30  ;;  %v4124_v35 = vmax.f32 %v4122_v39, %v4123_v33  ;;  %v4131_v56 = vmax.f32 %v4129_v6, %v4130_v17 }
 0x655   : > { %v6762_v54 = vpop.eup %5673  ;;  %v6766_v48 = vpop.f32.mrb[98].mxu0  ;;  %v4253_v37 = vadd.f32 %v4252_v25, %v4251_v16  ;;  %5685 = vpow2.f32 %v4203_v38  ;;  %v6775_v1 = vmul.f32 %v5472_v13, %v6669_v27  ;;  %v6788_v38 = vmul.f32 %v5482_v5, %v6693_v20 }
 0x656   : > { %v6768_v15 = vpop.f32.mrb[95].mxu1  ;;  %v6770_v34 = vpop.eup %5675  ;;  %v4254_v22 = vsel %vm4098_vm0, %v6762_v54, 0.0  ;;  %5687 = vpow2.f32 %v4205_v8  ;;  %v4126_v9 = vmax.f32 %v4124_v35, %v4125_v40  ;;  %v4133_v19 = vmax.f32 %v4131_v56, %v4132_v46 }
 0x657   : > { %v6777_v51 = vpop.f32.mrb[99].mxu0  ;;  %v4256_v39 = vsel %vm4098_vm0, %v6770_v34, 0.0  ;;  %v6781_v30 = vpop.permute.xlu1 %4029  ;;  %v4255_v26 = vadd.f32 %v4254_v22, %v4253_v37  ;;  %5689 = vpow2.f32 %v4207_v3  ;;  %v6785_v6 = vsel %vm4098_vm0, %v6775_v1, -inf }
 0x658   : > { %v6790_v27 = vpop.f32.mrb[96].mxu1  ;;  %5691 = vpow2.f32 %v4209_v7  ;;  %v4167_v13 = vsub.f32 %v6713_v21, %v4126_v9  ;;  %v4168_v8 = vsub.f32 %v6706_v45, %v4126_v9  ;;  %v4169_v40 = vsub.f32 %v4080_v60, %v4126_v9  ;;  %v4009_v56 = vpop.permute.xlu0 %4008 }
 0x659   : > { %v6794_v46 = vpop.f32.mrb[97].mxu1  ;;  %v4257_v16 = vadd.f32 %v4256_v39, %v4255_v26  ;;  %v4170_v3 = vsub.f32 %v6727_v32, %v4126_v9  ;;  %v4171_v33 = vsub.f32 %v6724_v10, %v4133_v19  ;;  %v4172_v17 = vsub.f32 %v6709_v24, %v4133_v19 }
 0x65a   : > { %v4211_v25 = vmul.f32 1.442695, %v4167_v13  ;;  %v4213_v20 = vmul.f32 1.442695, %v4168_v8  ;;  %v4215_v5 = vmul.f32 1.442695, %v4169_v40  ;;  %v4173_v35 = vsub.f32 %v6737_v53, %v4133_v19 }
 0x65b   : > { %v6800_v7 = vpop.eup %5677  ;;  %5693 = vrcp.f32 %v4257_v16  ;;  %v4217_v21 = vmul.f32 1.442695, %v4170_v3  ;;  %v4174_v45 = vsub.f32 %v6729_v52, %v4133_v19  ;;  %v4219_v60 = vmul.f32 1.442695, %v4171_v33  ;;  %v5495_v37 = vpop.f32.mrb[98].mxu1 }
 0x65c   : > { %v6803_v22 = vpop.eup %5679  ;;  %v4258_v10 = vsel %vm4098_vm0, %v6800_v7, 0.0  ;;  %5695 = vpow2.f32 %v4211_v25  ;;  %v4221_v24 = vmul.f32 1.442695, %v4172_v17  ;;  %v4223_v32 = vmul.f32 1.442695, %v4173_v35  ;;  %v4058_v39 = vpop.permute.xlu1 %4057 }
 0x65d   : > { %v3825_v9 = vpop.f32.mrb[99].mxu1  ;;  %v6807_v53 = vpop.eup %5681  ;;  %v4259_v26 = vsel %vm4098_vm0, %v6803_v22, 0.0  ;;  %5697 = vpow2.f32 %v4213_v20  ;;  %v4225_v52 = vmul.f32 1.442695, %v4174_v45  ;;  %v4142_v19 = vsel %vm4098_vm0, %v6788_v38, -inf }
 0x65e   : > { %v6813_v13 = vpop.eup %5683  ;;  %v4260_v8 = vadd.f32 %v4259_v26, %v4258_v10  ;;  %v4261_v40 = vsel %vm4098_vm0, %v6807_v53, 0.0  ;;  %5699 = vpow2.f32 %v4215_v5  ;;  %v6819_v16 = vmul.f32 %v6665_v31, %v6749_v28 }
 0x65f   : > { %v6821_v3 = vpop.eup %5685  ;;  %v4263_v33 = vsel %vm4098_vm0, %v6813_v13, 0.0  ;;  %5701 = vpow2.f32 %v4217_v21  ;;  %v6827_v17 = vmul.f32 %v6671_v36, %v6758_v29  ;;  %v6830_v25 = vmul.f32 %v6760_v63, %v4009_v56  ;;  %v4037_v63 = vpop.permute.xlu0 %4036 }
 0x660   : > { %v6832_v20 = vpop.eup %5687  ;;  %v4262_v5 = vadd.f32 %v4261_v40, %v4260_v8  ;;  %v4265_v31 = vsel %vm4098_vm0, %v6821_v3, 0.0  ;;  %5703 = vpow2.f32 %v4219_v60  ;;  %v4134_v28 = vsel %vm4098_vm0, %v6819_v16, -inf  ;;  %v4065_v26 = vpop.permute.xlu1 %4064 }
 0x661   : > { %v6838_v35 = vpop.eup %5689  ;;  %v4266_v21 = vsel %vm4098_vm0, %v6832_v20, 0.0  ;;  %5705 = vpow2.f32 %v4221_v24  ;;  %v4136_v36 = vmax.f32 %v4134_v28, %v6785_v6  ;;  %v4141_v29 = vsel %vm4098_vm0, %v6827_v17, -inf }
 0x662   : > { %v6845_v45 = vpop.eup %5691  ;;  %v4264_v56 = vadd.f32 %v4263_v33, %v4262_v5  ;;  %v4267_v10 = vadd.f32 %v4266_v21, %v4265_v31  ;;  %v4268_v60 = vsel %vm4098_vm0, %v6838_v35, 0.0  ;;  %5707 = vpow2.f32 %v4223_v32 }
 0x663   : > { %v4270_v8 = vsel %vm4098_vm0, %v6845_v45, 0.0  ;;  %5709 = vpow2.f32 %v4225_v52  ;;  %v4143_v24 = vmax.f32 %v4141_v29, %v4142_v19  ;;  %v4139_v6 = vsel %vm4098_vm0, %v6830_v25, -inf }
 0x664   : > { %5711 = vrcp.f32 %v4264_v56  ;;  %v4269_v40 = vadd.f32 %v4268_v60, %v4267_v10  ;;  %v6854_v28 = vmul.f32 %v6766_v48, %v4037_v63  ;;  %v4088_v33 = vmul.f32 %v6719_v18, %v6768_v15 }
 0x665   : > { %v6858_v5 = vpop.eup %5693  ;;  %v4092_v32 = vmul.f32 %v6781_v30, %v6777_v51  ;;  %v6864_v52 = vmul.f32 %v6790_v27, %v6739_v42  ;;  %v6868_v19 = vmul.f32 %v6695_v23, %v6794_v46  ;;  %v6870_v31 = vmul.f32 %v5495_v37, %v4065_v26 }
 0x666   : > { %v6872_v48 = vpop.eup %5695  ;;  %v4271_v21 = vadd.f32 %v4270_v8, %v4269_v40  ;;  %v4146_v18 = vsel %vm4098_vm0, %v6854_v28, -inf  ;;  %v4137_v15 = vsel %vm4098_vm0, %v4088_v33, -inf  ;;  %v6877_v29 = vmul.f32 %v4058_v39, %v3825_v9 }
 0x667   : > { %v6879_v51 = vpop.eup %5697  ;;  %v4272_v42 = vsel %vm4098_vm0, %v6872_v48, 0.0  ;;  %v4138_v30 = vmax.f32 %v4136_v36, %v4137_v15  ;;  %v4144_v23 = vsel %vm4098_vm0, %v4092_v32, -inf  ;;  %v4149_v27 = vsel %vm4098_vm0, %v6864_v52, -inf }
 0x668   : > { %v6886_v46 = vpop.eup %5699  ;;  %5713 = vrcp.f32 %v4271_v21  ;;  %v4273_v37 = vsel %vm4098_vm0, %v6879_v51, 0.0  ;;  %v4145_v63 = vmax.f32 %v4143_v24, %v4144_v23  ;;  %v4148_v39 = vsel %vm4098_vm0, %v6868_v19, -inf }
 0x669   : > { %v6892_v9 = vpop.eup %5701  ;;  %v4274_v56 = vadd.f32 %v4273_v37, %v4272_v42  ;;  %v4275_v36 = vsel %vm4098_vm0, %v6886_v46, 0.0  ;;  %v4140_v10 = vmax.f32 %v4138_v30, %v4139_v6  ;;  %v4150_v60 = vmax.f32 %v4148_v39, %v4149_v27 }
 0x66a   : > { %v6896_v26 = vpop.eup %5703  ;;  %v4277_v8 = vsel %vm4098_vm0, %v6892_v9, 0.0  ;;  %v4147_v40 = vmax.f32 %v4145_v63, %v4146_v18  ;;  %v4153_v24 = vsel %vm4098_vm0, %v6870_v31, -inf  ;;  %v4151_v21 = vsel %vm4098_vm0, %v6877_v29, -inf }
 0x66b   : > { %7231 = vst [vmem:[#allocation28_spill] sm:$0xff] %v6896_v26  ;;  %v6904_v15 = vpop.eup %5705  ;;  %v4276_v42 = vadd.f32 %v4275_v36, %v4274_v56  ;;  %v4279_v23 = vsel %vm4098_vm0, %v6896_v26, 0.0  ;;  %v4175_v6 = vsub.f32 %v6819_v16, %v4140_v10  ;;  %v4176_v30 = vsub.f32 %v6775_v1, %v4140_v10 }
 0x66c   : > { %7232 = vst [vmem:[#allocation29_spill] sm:$0xff] %v6904_v15  ;;  %v6910_v27 = vpop.eup %5707  ;;  %v4280_v18 = vsel %vm4098_vm0, %v6904_v15, 0.0  ;;  %v4177_v37 = vsub.f32 %v4088_v33, %v4140_v10  ;;  %v4178_v63 = vsub.f32 %v6830_v25, %v4140_v10  ;;  %v4179_v39 = vsub.f32 %v6827_v17, %v4147_v40 }
 0x66d   : > { %7233 = vst [vmem:[#allocation30_spill] sm:$0xff] %v6910_v27  ;;  %v6916_v4 = vpop.eup %5709  ;;  %v4278_v56 = vadd.f32 %v4277_v8, %v4276_v42  ;;  %v4281_v36 = vadd.f32 %v4280_v18, %v4279_v23  ;;  %v4282_v26 = vsel %vm4098_vm0, %v6910_v27, 0.0  ;;  %v4227_v16 = vmul.f32 1.442695, %v4175_v6 }
 0x66e   : > { %7234 = vst [vmem:[#allocation31_spill] sm:$0xff] %v6916_v4  ;;  %v6920_v0 = vpop.eup %5711  ;;  %v4284_v1 = vsel %vm4098_vm0, %v6916_v4, 0.0  ;;  %v4229_v57 = vmul.f32 1.442695, %v4176_v30  ;;  %v4231_v15 = vmul.f32 1.442695, %v4177_v37  ;;  %v4180_v33 = vsub.f32 %v6788_v38, %v4147_v40 }
 0x66f   : > { %5715 = vrcp.f32 %v4278_v56  ;;  %v4283_v25 = vadd.f32 %v4282_v26, %v4281_v36  ;;  %v4233_v17 = vmul.f32 1.442695, %v4178_v63  ;;  %v4181_v10 = vsub.f32 %v4092_v32, %v4147_v40 }
 0x670   : > { %5717 = vpow2.f32 %v4227_v16  ;;  %v4182_v8 = vsub.f32 %v6854_v28, %v4147_v40  ;;  %v4235_v42 = vmul.f32 1.442695, %v4179_v39  ;;  %v4237_v23 = vmul.f32 1.442695, %v4180_v33 }
 0x671   : > { %v4285_v18 = vadd.f32 %v4284_v1, %v4283_v25  ;;  %5719 = vpow2.f32 %v4229_v57  ;;  %v4239_v6 = vmul.f32 1.442695, %v4181_v10  ;;  %v4152_v27 = vmax.f32 %v4150_v60, %v4151_v21 }
 0x672   : > { %v5714_v55 = vpop.eup %5713  ;;  %5721 = vpow2.f32 %v4231_v15  ;;  %v4241_v4 = vmul.f32 1.442695, %v4182_v8  ;;  %v4315_v30 = vmul.f32 %v6858_v5, %v6743_v41  ;;  %v4316_v38 = vmul.f32 %v6858_v5, %v6751_v14 }
 0x673   : > { %5723 = vrcp.f32 %v4285_v18  ;;  %v4154_v32 = vmax.f32 %v4152_v27, %v4153_v24  ;;  %v4317_v28 = vmul.f32 %v6858_v5, %v6762_v54  ;;  %v4318_v26 = vmul.f32 %v6858_v5, %v6770_v34 }
 0x674   : > { %5725 = vpow2.f32 %v4233_v17  ;;  %v4347_v57 = vmul.f32 %v4315_v30, %v6582_v47  ;;  %v4348_v60 = vmul.f32 %v4316_v38, %v6590_v62  ;;  %v4323_v40 = vmul.f32 %v5714_v55, %v6821_v3 }
 0x675   : > { %5727 = vpow2.f32 %v4235_v42  ;;  %v4183_v41 = vsub.f32 %v6868_v19, %v4154_v32  ;;  %v4184_v14 = vsub.f32 %v6864_v52, %v4154_v32  ;;  %v4185_v24 = vsub.f32 %v6877_v29, %v4154_v32 }
 0x676   : > { %5729 = vpow2.f32 %v4237_v23  ;;  %v4186_v54 = vsub.f32 %v6870_v31, %v4154_v32  ;;  %v4349_v21 = vmul.f32 %v6579_v44, %v4317_v28  ;;  %v4350_v34 = vmul.f32 %v6587_v50, %v4318_v26 }
 0x677   : > { %5731 = vpow2.f32 %v4239_v6  ;;  %v4243_v47 = vmul.f32 1.442695, %v4183_v41  ;;  %v4245_v5 = vmul.f32 1.442695, %v4184_v14  ;;  %v4247_v62 = vmul.f32 1.442695, %v4185_v24 }
 0x678   : > { %5733 = vpow2.f32 %v4241_v4  ;;  %v4249_v3 = vmul.f32 1.442695, %v4186_v54  ;;  %v4379_v15 = vsel %vm4098_vm0, %v4347_v57, 0.0  ;;  %v4380_v19 = vsel %vm4098_vm0, %v4348_v60, 0.0 }
 0x679   : > { %v6945_v52 = vpop.eup %5715  ;;  %5735 = vpow2.f32 %v4243_v47  ;;  %v4381_v29 = vadd.f32 %v4380_v19, %v4379_v15  ;;  %v4382_v31 = vsel %vm4098_vm0, %v4349_v21, 0.0  ;;  %v4384_v44 = vsel %vm4098_vm0, %v4350_v34, 0.0 }
 0x67a   : > { %v6949_v27 = vpop.eup %5717  ;;  %5737 = vpow2.f32 %v4245_v5  ;;  %v4324_v50 = vmul.f32 %v5714_v55, %v6832_v20  ;;  %v4325_v4 = vmul.f32 %v5714_v55, %v6838_v35  ;;  %v4326_v37 = vmul.f32 %v5714_v55, %v6845_v45 }
 0x67b   : > { %v6954_v63 = vpop.eup %5719  ;;  %v4286_v39 = vsel %vm4098_vm0, %v6949_v27, 0.0  ;;  %5739 = vpow2.f32 %v4247_v62  ;;  %v4383_v56 = vadd.f32 %v4382_v31, %v4381_v29  ;;  %v4355_v36 = vmul.f32 %v4323_v40, %v6605_v59 }
 0x67c   : > { %v6959_v16 = vpop.eup %5721  ;;  %v4287_v1 = vsel %vm4098_vm0, %v6954_v63, 0.0  ;;  %5741 = vpow2.f32 %v4249_v3  ;;  %v4356_v20 = vmul.f32 %v4324_v50, %v6613_v61  ;;  %v4357_v35 = vmul.f32 %v6600_v49, %v4325_v4 }
 0x67d   : > { %v6965_v55 = vpop.eup %5723  ;;  %v4288_v45 = vadd.f32 %v4287_v1, %v4286_v39  ;;  %v4289_v33 = vsel %vm4098_vm0, %v6959_v16, 0.0  ;;  %v4385_v25 = vadd.f32 %v4384_v44, %v4383_v56  ;;  %v4358_v17 = vmul.f32 %v6609_v2, %v4326_v37 }
 0x67e   : > { %v6970_v59 = vpop.eup %5725  ;;  %v4397_v10 = vsel %vm4098_vm0, %v4355_v36, 0.0  ;;  %v4398_v8 = vsel %vm4098_vm0, %v4356_v20, 0.0  ;;  %v4400_v42 = vsel %vm4098_vm0, %v4357_v35, 0.0  ;;  %v4319_v49 = vmul.f32 %v6920_v0, %v6800_v7  ;;  %v7235_v35 = vld [vmem:[#allocation11_spill] sm:$0xff] }
 0x67f   : > { %v6977_v61 = vpop.eup %5727  ;;  %v4290_v23 = vadd.f32 %v4289_v33, %v4288_v45  ;;  %v4291_v18 = vsel %vm4098_vm0, %v6970_v59, 0.0  ;;  %4386 = vadd.xlane.f32.xlu0 %v4385_v25  ;;  %v4399_v6 = vadd.f32 %v4398_v8, %v4397_v10  ;;  %v4402_v2 = vsel %vm4098_vm0, %v4358_v17, 0.0  ;;  %v7236_v25 = vld [vmem:[#allocation15_spill] sm:$0xff]  ;;  %v7237_v17 = vld [vmem:[#allocation9_spill] sm:$0xff]  ;;  %v7238_v8 = vld [vmem:[#allocation28_spill] sm:$0xff] }
 0x680   : > { %v6982_v30 = vpop.eup %5729  ;;  %v4293_v38 = vsel %vm4098_vm0, %v6977_v61, 0.0  ;;  %v4320_v32 = vmul.f32 %v6920_v0, %v6803_v22  ;;  %v4321_v7 = vmul.f32 %v6920_v0, %v6807_v53  ;;  %v4322_v28 = vmul.f32 %v6920_v0, %v6813_v13 }
 0x681   : > { %v6992_v26 = vpop.eup %5731  ;;  %v4292_v57 = vadd.f32 %v4291_v18, %v4290_v23  ;;  %v4294_v60 = vsel %vm4098_vm0, %v6982_v30, 0.0  ;;  %v4401_v40 = vadd.f32 %v4400_v42, %v4399_v6  ;;  %v4351_v41 = vmul.f32 %v4319_v49, %v6603_v58  ;;  %v7240_v18 = vld [vmem:[#allocation29_spill] sm:$0xff] }
 0x682   : > { %v6997_v14 = vpop.eup %5733  ;;  %v4295_v24 = vadd.f32 %v4294_v60, %v4293_v38  ;;  %v4296_v22 = vsel %vm4098_vm0, %v6992_v26, 0.0  ;;  %v4352_v53 = vmul.f32 %v4320_v32, %v6611_v12  ;;  %v4353_v54 = vmul.f32 %v6598_v11, %v4321_v7  ;;  %v7242_v38 = vld [vmem:[#allocation31_spill] sm:$0xff] }
 0x683   : > { %v7003_v0 = vpop.eup %5735  ;;  %5743 = vrcp.f32 %v4292_v57  ;;  %v4298_v13 = vsel %vm4098_vm0, %v6997_v14, 0.0  ;;  %v4403_v21 = vadd.f32 %v4402_v2, %v4401_v40  ;;  %v4354_v34 = vmul.f32 %v6607_v43, %v4322_v28  ;;  %v7243_v28 = vld [vmem:[#allocation10_spill] sm:$0xff] }
 0x684   : > { %v7008_v58 = vpop.eup %5737  ;;  %v4297_v47 = vadd.f32 %v4296_v22, %v4295_v24  ;;  %v4300_v5 = vsel %vm4098_vm0, %v7003_v0, 0.0  ;;  %v4388_v62 = vsel %vm4098_vm0, %v4351_v41, 0.0  ;;  %v4389_v12 = vsel %vm4098_vm0, %v4352_v53, 0.0  ;;  %v7244_v41 = vld [vmem:[#allocation14_spill] sm:$0xff]  ;;  %v7245_v22 = vld [vmem:[#allocation8_spill] sm:$0xff] }
 0x685   : > { %v7014_v11 = vpop.eup %5739  ;;  %v4301_v3 = vsel %vm4098_vm0, %v7008_v58, 0.0  ;;  %4404 = vadd.xlane.f32.xlu0 %v4403_v21  ;;  %v4390_v15 = vadd.f32 %v4389_v12, %v4388_v62  ;;  %v4391_v19 = vsel %vm4098_vm0, %v4353_v54, 0.0  ;;  %v4393_v43 = vsel %vm4098_vm0, %v4354_v34, 0.0  ;;  %v7246_v54 = vld [vmem:[#allocation12_spill] sm:$0xff] }
 0x686   : > { %v7020_v29 = vpop.eup %5741  ;;  %v4299_v31 = vadd.f32 %v4298_v13, %v4297_v47  ;;  %v4302_v44 = vadd.f32 %v4301_v3, %v4300_v5  ;;  %v4303_v50 = vsel %vm4098_vm0, %v7014_v11, 0.0  ;;  %v4327_v4 = vmul.f32 %v6945_v52, %v6872_v48 }
 0x687   : > { %v4305_v37 = vsel %vm4098_vm0, %v7020_v29, 0.0  ;;  %v4392_v39 = vadd.f32 %v4391_v19, %v4390_v15  ;;  %v4328_v56 = vmul.f32 %v6945_v52, %v6879_v51  ;;  %v4329_v36 = vmul.f32 %v6945_v52, %v6886_v46  ;;  %v7239_v51 = vld [vmem:[#allocation13_spill] sm:$0xff] }
 0x688   : > { %5745 = vrcp.f32 %v4299_v31  ;;  %v4304_v1 = vadd.f32 %v4303_v50, %v4302_v44  ;;  %v4330_v20 = vmul.f32 %v6945_v52, %v6892_v9  ;;  %v4359_v45 = vmul.f32 %v4327_v4, %v7235_v35  ;;  %v7241_v52 = vld [vmem:[#allocation30_spill] sm:$0xff]  ;;  %v7248_v50 = vld [vmem:[#allocation23_spill] sm:$0xff] }
 0x689   : > { %v4394_v33 = vadd.f32 %v4393_v43, %v4392_v39  ;;  %v4360_v48 = vmul.f32 %v4328_v56, %v7236_v25  ;;  %v4361_v10 = vmul.f32 %v7237_v17, %v4329_v36  ;;  %v4331_v42 = vmul.f32 %v6965_v55, %v7238_v8  ;;  %v7247_v43 = vld [vmem:[#allocation21_spill] sm:$0xff]  ;;  %v7250_v36 = vld [vmem:[#allocation22_spill] sm:$0xff] }
 0x68a   : > { %v4306_v49 = vadd.f32 %v4305_v37, %v4304_v1  ;;  %v4362_v23 = vmul.f32 %v7239_v51, %v4330_v20  ;;  %v4406_v46 = vsel %vm4098_vm0, %v4359_v45, 0.0  ;;  %v4332_v6 = vmul.f32 %v6965_v55, %v7240_v18  ;;  %v7249_v37 = vld [vmem:[#allocation17_spill] sm:$0xff]  ;;  %v7254_v51 = vld [vmem:[#allocation19_spill] sm:$0xff] }
 0x68b   : > { %4395 = vadd.xlane.f32.xlu1 %v4394_v33  ;;  %v4407_v9 = vsel %vm4098_vm0, %v4360_v48, 0.0  ;;  %v4333_v2 = vmul.f32 %v6965_v55, %v7241_v52  ;;  %v4334_v32 = vmul.f32 %v6965_v55, %v7242_v38  ;;  %v4363_v57 = vmul.f32 %v4331_v42, %v7243_v28  ;;  %v7251_v48 = vld [vmem:[#allocation18_spill] sm:$0xff]  ;;  %v7253_v42 = vld [vmem:[#allocation16_spill] sm:$0xff] }
 0x68c   : > { %5747 = vrcp.f32 %v4306_v49  ;;  %v4408_v7 = vadd.f32 %v4407_v9, %v4406_v46  ;;  %v4409_v40 = vsel %vm4098_vm0, %v4361_v10, 0.0  ;;  %v4364_v24 = vmul.f32 %v4332_v6, %v7244_v41  ;;  %v7252_v10 = vld [vmem:[#allocation20_spill] sm:$0xff]  ;;  %v7256_v41 = vld [vmem:[#allocation27_spill] sm:$0xff] }
 0x68d   : > { %v5744_v60 = vpop.eup %5743  ;;  %v4365_v53 = vmul.f32 %v7245_v22, %v4333_v2  ;;  %v4366_v13 = vmul.f32 %v7246_v54, %v4334_v32  ;;  %v4415_v34 = vsel %vm4098_vm0, %v4363_v57, 0.0  ;;  %v4411_v5 = vsel %vm4098_vm0, %v4362_v23, 0.0  ;;  %v7258_v54 = vld [vmem:[#allocation26_spill] sm:$0xff] }
 0x68e   : > { %v4410_v21 = vadd.f32 %v4409_v40, %v4408_v7  ;;  %v4335_v47 = vmul.f32 %v5744_v60, %v6949_v27  ;;  %v4336_v55 = vmul.f32 %v5744_v60, %v6954_v63  ;;  %v4416_v62 = vsel %vm4098_vm0, %v4364_v24, 0.0 }
 0x68f   : > { %v4337_v12 = vmul.f32 %v5744_v60, %v6959_v16  ;;  %v4417_v15 = vadd.f32 %v4416_v62, %v4415_v34  ;;  %v4338_v19 = vmul.f32 %v5744_v60, %v6970_v59  ;;  %v4418_v44 = vsel %vm4098_vm0, %v4365_v53, 0.0  ;;  %v7255_v60 = vld [vmem:[#allocation25_spill] sm:$0xff]  ;;  %v7257_v53 = vld [vmem:[#allocation24_spill] sm:$0xff] }
 0x690   : > { %v4412_v3 = vadd.f32 %v4411_v5, %v4410_v21  ;;  %v4367_v31 = vmul.f32 %v4335_v47, %v7247_v43  ;;  %v4368_v4 = vmul.f32 %v4336_v55, %v7248_v50  ;;  %v4420_v56 = vsel %vm4098_vm0, %v4366_v13, 0.0  ;;  %v5002_v62 = vld [vmem:[#allocation2] ss:$0 sm:$0xff] }
 0x691   : > { %v4369_v27 = vmul.f32 %v7249_v37, %v4337_v12  ;;  %v4419_v63 = vadd.f32 %v4418_v44, %v4417_v15  ;;  %v4370_v1 = vmul.f32 %v7250_v36, %v4338_v19  ;;  %v4638_v12 = vld [vmem:[%s7192_s14] sm:$0xff]  ;;  %v7259_v44 = vlaneseq }
 0x692   : > { %v5746_v39 = vpop.eup %5745  ;;  %4413 = vadd.xlane.f32.xlu0 %v4412_v3  ;;  %v4424_v16 = vsel %vm4098_vm0, %v4367_v31, 0.0  ;;  %v4425_v25 = vsel %vm4098_vm0, %v4368_v4, 0.0  ;;  %5497 = vmatpush3.msra.mxu0 %v4638_v12 }
 0x693   : > { %v4339_v20 = vmul.f32 %v5746_v39, %v6977_v61  ;;  %v4340_v59 = vmul.f32 %v5746_v39, %v6982_v30  ;;  %v4341_v35 = vmul.f32 %v5746_v39, %v6992_v26  ;;  %v4342_v45 = vmul.f32 %v5746_v39, %v6997_v14 }
 0x694   : > { %v4421_v33 = vadd.f32 %v4420_v56, %v4419_v63  ;;  %v4426_v61 = vadd.f32 %v4425_v25, %v4424_v16  ;;  %v4427_v14 = vsel %vm4098_vm0, %v4369_v27, 0.0  ;;  %v4429_v38 = vsel %vm4098_vm0, %v4370_v1, 0.0  ;;  %v7260_v27 = vld [vmem:[#allocation7_spill] sm:$0xff] }
 0x695   : > { %v4371_v17 = vmul.f32 %v4339_v20, %v7251_v48  ;;  %v4372_v8 = vmul.f32 %v4340_v59, %v7252_v10  ;;  %v4373_v49 = vmul.f32 %v7253_v42, %v4341_v35  ;;  %v4374_v23 = vmul.f32 %v7254_v51, %v4342_v45 }
 0x696   : > { %v5748_v46 = vpop.eup %5747  ;;  %4422 = vadd.xlane.f32.xlu0 %v4421_v33  ;;  %v4428_v6 = vadd.f32 %v4427_v14, %v4426_v61  ;;  %v4526_v50 = vand.u32 127, %v7259_v44 }
 0x697   : > { %v4433_v30 = vsel %vm4098_vm0, %v4371_v17, 0.0  ;;  %v4434_v26 = vsel %vm4098_vm0, %v4372_v8, 0.0  ;;  %v4343_v9 = vmul.f32 %v5748_v46, %v7003_v0  ;;  %v4344_v52 = vmul.f32 %v5748_v46, %v7008_v58 }
 0x698   : > { %v4435_v18 = vadd.f32 %v4434_v26, %v4433_v30  ;;  %v4436_v2 = vsel %vm4098_vm0, %v4373_v49, 0.0  ;;  %v4345_v32 = vmul.f32 %v5748_v46, %v7014_v11  ;;  %v4346_v7 = vmul.f32 %v5748_v46, %v7020_v29 }
 0x699   : > { %v4430_v57 = vadd.f32 %v4429_v38, %v4428_v6  ;;  %v4375_v40 = vmul.f32 %v4343_v9, %v7255_v60  ;;  %v4376_v24 = vmul.f32 %v4344_v52, %v7256_v41  ;;  %v4438_v22 = vsel %vm4098_vm0, %v4374_v23, 0.0 }
 0x69a   : > { %v4437_v28 = vadd.f32 %v4436_v2, %v4435_v18  ;;  %v4377_v0 = vmul.f32 %v7257_v53, %v4345_v32  ;;  %v4378_v58 = vmul.f32 %v7258_v54, %v4346_v7  ;;  %v4529_v39 = vsub.s32 %v4526_v50, %v7260_v27 }
 0x69b   : > { %4431 = vadd.xlane.f32.xlu1 %v4430_v57  ;;  %v4442_v21 = vsel %vm4098_vm0, %v4375_v40, 0.0  ;;  %v4443_v11 = vsel %vm4098_vm0, %v4376_v24, 0.0 }
 0x69c   : > { %v4439_v13 = vadd.f32 %v4438_v22, %v4437_v28  ;;  %v4444_v34 = vadd.f32 %v4443_v11, %v4442_v21  ;;  %v4445_v29 = vsel %vm4098_vm0, %v4377_v0, 0.0  ;;  %v4447_v55 = vsel %vm4098_vm0, %v4378_v58, 0.0 }
 0x69e   : > { %4440 = vadd.xlane.f32.xlu0 %v4439_v13  ;;  %v4446_v47 = vadd.f32 %v4445_v29, %v4444_v34 }
 0x6a0   : > { %v4448_v5 = vadd.f32 %v4447_v55, %v4446_v47 }
 0x6a2   : > { %4449 = vadd.xlane.f32.xlu1 %v4448_v5 }
 0x6b4   : > { %4458 = vperm.xlu0 %5612, %v5002_v62  }
 0x70c   : > { %v4387_v3 = vpop.xlane.xlu0 %4386 }
 0x712   : > { %v4405_v15 = vpop.xlane.xlu0 %4404 }
 0x718   : > { %v4396_v31 = vpop.xlane.xlu1 %4395 }
 0x71f   : > { %v4414_v19 = vpop.xlane.xlu0 %4413 }
 0x723   : > { %v4423_v43 = vpop.xlane.xlu0 %4422 }
 0x728   : > { %v4432_v37 = vpop.xlane.xlu1 %4431 }
 0x72b   : > { %v4441_v4 = vpop.xlane.xlu0 %4440 }
 0x72f   : > { %v4450_v20 = vpop.xlane.xlu1 %4449 }
 0x733   : > { %v4459_v63 = vpop.permute.xlu0 %4458 }
 0x734   : > { %v4461_v56 = vadd.f32 %v4459_v63, %v4387_v3  ;;  %v4462_v36 = vadd.f32 %v4459_v63, %v4396_v31  ;;  %v4463_v1 = vadd.f32 %v4459_v63, %v4405_v15  ;;  %v4464_v16 = vadd.f32 %v4459_v63, %v4414_v19 }
 0x735   : > { %v4465_v59 = vadd.f32 %v4459_v63, %v4423_v43  ;;  %v4466_v35 = vadd.f32 %v4459_v63, %v4432_v37  ;;  %v4467_v45 = vadd.f32 %v4459_v63, %v4441_v4  ;;  %v4468_v42 = vadd.f32 %v4459_v63, %v4450_v20 }
 0x736   : > { %v5003_v33 = vmul.f32 -1.442695, %v4461_v56  ;;  %v5004_v25 = vmul.f32 -1.442695, %v4462_v36  ;;  %v5005_v48 = vmul.f32 -1.442695, %v4463_v1  ;;  %v7099_v17 = vrot.slane %v4461_v56, %v4529_v39 }
 0x737   : > { %v5006_v10 = vmul.f32 -1.442695, %v4464_v16  ;;  %v7101_v8 = vrot.slane %v4462_v36, %v4529_v39  ;;  %v5007_v49 = vmul.f32 -1.442695, %v4465_v59  ;;  %v4538_v51 = vrot.slane %v4463_v1, %v4529_v39 }
 0x738   : > { %5749 = vpow2.f32 %v5003_v33  ;;  %v5008_v23 = vmul.f32 -1.442695, %v4466_v35  ;;  %v5009_v46 = vmul.f32 -1.442695, %v4467_v45  ;;  %v4542_v61 = vrot.slane %v4464_v16, %v4529_v39 }
 0x739   : > { %5751 = vpow2.f32 %v5004_v25  ;;  %v4639_v30 = vsel %vm4559_vm10, %v7101_v8, %v7099_v17  ;;  %v4546_v26 = vrot.slane %v4465_v59, %v4529_v39  ;;  %v5010_v18 = vmul.f32 -1.442695, %v4468_v42 }
 0x73a   : > { %5753 = vpow2.f32 %v5005_v48  ;;  %v4640_v14 = vsel %vm4560_vm2, %v4538_v51, %v4639_v30  ;;  %v4550_v6 = vrot.slane %v4466_v35, %v4529_v39  ;;  %v4554_v52 = vrot.slane %v4467_v45, %v4529_v39 }
 0x73b   : > { %5755 = vpow2.f32 %v5006_v10  ;;  %v4641_v9 = vsel %vm4562_vm3, %v4542_v61, %v4640_v14  ;;  %v4558_v32 = vrot.slane %v4468_v42, %v4529_v39 }
 0x73c   : > { %5757 = vpow2.f32 %v5007_v49  ;;  %v4642_v2 = vsel %vm4564_vm4, %v4546_v26, %v4641_v9 }
 0x73d   : > { %5759 = vpow2.f32 %v5008_v23  ;;  %v4643_v38 = vsel %vm4566_vm5, %v4550_v6, %v4642_v2 }
 0x73e   : > { %5761 = vpow2.f32 %v5009_v46  ;;  %v4644_v7 = vsel %vm4568_vm6, %v4554_v52, %v4643_v38 }
 0x73f   : > { %5763 = vpow2.f32 %v5010_v18  ;;  %v7110_v28 = vsel %vm4570_vm7, %v4558_v32, %v4644_v7 }
 0x740   : > { %5499 = vmatmul.mubr.msk.f32.vlgmr.msra.gmra.mrb[100].mxu0 %vm613_vm1, %v7110_v28 }
 0x742   : > { %v5750_v57 = vpop.eup %5749 }
 0x743   : > { %v5752_v60 = vpop.eup %5751  ;;  %v4493_v40 = vadd.f32 1.0, %v5750_v57 }
 0x744   : > { %v5754_v41 = vpop.eup %5753  ;;  %v4494_v24 = vadd.f32 1.0, %v5752_v60 }
 0x745   : > { %v5756_v22 = vpop.eup %5755  ;;  %v4495_v53 = vadd.f32 1.0, %v5754_v41  ;;  %5765 = vrcp.f32 %v4493_v40 }
 0x746   : > { %v5758_v0 = vpop.eup %5757  ;;  %v4496_v54 = vadd.f32 1.0, %v5756_v22  ;;  %5767 = vrcp.f32 %v4494_v24 }
 0x747   : > { %v5760_v58 = vpop.eup %5759  ;;  %v4497_v13 = vadd.f32 1.0, %v5758_v0  ;;  %5769 = vrcp.f32 %v4495_v53 }
 0x748   : > { %v5762_v21 = vpop.eup %5761  ;;  %v4498_v11 = vadd.f32 1.0, %v5760_v58  ;;  %5771 = vrcp.f32 %v4496_v54 }
 0x749   : > { %v5764_v34 = vpop.eup %5763  ;;  %v4499_v29 = vadd.f32 1.0, %v5762_v21  ;;  %5773 = vrcp.f32 %v4497_v13 }
 0x74a   : > { %5775 = vrcp.f32 %v4498_v11  ;;  %v4500_v47 = vadd.f32 1.0, %v5764_v34 }
 0x74b   : > { %5777 = vrcp.f32 %v4499_v29 }
 0x74c   : > { %5779 = vrcp.f32 %v4500_v47 }
 0x74f   : > { %v5766_v55 = vpop.eup %5765 }
 0x750   : > { %v5768_v5 = vpop.eup %5767  ;;  %v4622_v62 = vmul.f32 %v5766_v55, %v7099_v17 }
 0x751   : > { %v5770_v12 = vpop.eup %5769  ;;  %v4623_v3 = vmul.f32 %v5768_v5, %v7101_v8 }
 0x752   : > { %v5772_v15 = vpop.eup %5771  ;;  %v4624_v19 = vmul.f32 %v5770_v12, %v4538_v51  ;;  %4630 = vst.msk [vmem:[%s602_s0] sm:$0xff] %vm613_vm1, %v4622_v62 }
 0x753   : > { %v5774_v43 = vpop.eup %5773  ;;  %v4625_v31 = vmul.f32 %v5772_v15, %v4542_v61  ;;  %4631 = vst.msk [vmem:[%s602_s0 + $0x8] sm:$0xff] %vm613_vm1, %v4623_v3 }
 0x754   : > { %v5776_v44 = vpop.eup %5775  ;;  %v4626_v50 = vmul.f32 %v5774_v43, %v4546_v26  ;;  %4632 = vst.msk [vmem:[%s602_s0 + $0x10] sm:$0xff] %vm613_vm1, %v4624_v19 }
 0x755   : > { %v5778_v4 = vpop.eup %5777  ;;  %4633 = vst.msk [vmem:[%s602_s0 + $0x18] sm:$0xff] %vm613_vm1, %v4625_v31  ;;  %v4627_v37 = vmul.f32 %v5776_v44, %v4550_v6 }
 0x756   : > { %v5780_v27 = vpop.eup %5779  ;;  %4634 = vst.msk [vmem:[%s602_s0 + $0x20] sm:$0xff] %vm613_vm1, %v4626_v50  ;;  %v4628_v39 = vmul.f32 %v5778_v4, %v4554_v52 }
 0x757   : > { %4635 = vst.msk [vmem:[%s602_s0 + $0x28] sm:$0xff] %vm613_vm1, %v4627_v37  ;;  %v4629_v63 = vmul.f32 %v5780_v27, %v4558_v32 }
 0x758   : > { %4636 = vst.msk [vmem:[%s602_s0 + $0x30] sm:$0xff] %vm613_vm1, %v4628_v39 }
 0x759   : > { %4637 = vst.msk [vmem:[%s602_s0 + $0x38] sm:$0xff] %vm613_vm1, %v4629_v63  ;;  %s5849_s0 = smov [#allocation3]  }
 0x75a   : > { %s5785_s29 = sshll.u32 %s5849_s0, 4  ;;  %s5786_s29 = int_to_ptr.vmem [resolvable:$false] %s5785_s29 }
 0x75b   : > { %s5787_s30 = scalar_lea.vmem %s5786_s29, 256  ;;  %p5788_p0 = scmp.lt.s32.totalorder %s7136_s19, %s5786_s29 }
 0x75c   : > { %p5789_p1 = scmp.lt.s32.totalorder %s5787_s30, %s5781_s13 }
 0x75e   : > { %p5790_p2 = por %p5789_p1, %p5788_p0 }
 0x760   : > { %p5791_p3 = pnand %p5790_p2, %p5784_p13 }
 0x813   : > { %v4714_v56 = vpop.f32.mrb[100].mxu0 }
 0x814   : > { %4720 = vrot.lane.b32.xlu1 %v4714_v56, %s5847_s27  ;;  %v5500_v36 = vpop.f32.mrb[101].mxu0  ;;  %s4732_s27 = scalar_lea.sflag [#allocation4], %s571_s22 }
 0x886   : > { %v4721_v1 = vpop.permute.xlu1 %4720 }
 0x887   : > { %v4723_v16 = vsel %vm613_vm1, %v7110_v28, %v4721_v1 }
 0x888   : > { %4725 = vst.msk [vmem:[%s573_s21] sm:$0xff] %vm4724_vm8, %v4723_v16 }
 0x889   : > { %5794 = shalt.err (!%p5791_p3)
}
 0x88a   : > { %s5795_s22 = scalar_lea.hbm %s7134_s1, 128  ;;  %s5799_s5 = scalar_lea.hbm %s7194_s16, 256 }
 0x88b   : > { %p5796_p4 = scmp.ne.s32.totalorder %s7134_s1, %s5795_s22  ;;  %p5800_p9 = scmp.lt.u32.totalorder %s7134_s1, %s7194_s16 }
 0x88c   : > { %p5801_p10 = scmp.lt.u32.totalorder %s5799_s5, %s5795_s22  ;;  %p5803_p12 = scmp.lt.u32.totalorder %s5795_s22, %s7134_s1 }
 0x88d   : > { %p5797_p7 = pnand %p5796_p4, %p5976_p5 }
 0x88e   : > { %p5802_p11 = por %p5801_p10, %p5800_p9 }
 0x88f   : > { %p5798_p8 = pneg %p5797_p7 }
 0x890   : > { %p5804_p13 = por %p5803_p12, %p5802_p11 }
 0x892   : > { %p5805_p0 = pnand %p5804_p13, %p5798_p8 }
 0x894   : > { %5808 = shalt.err (!%p5805_p0)
}
 0x895   : > { %5549 = dma.vmem_to_hbm [thread:$0]  (%p5976_p5), %s7136_s19, 128, %s7134_s1, %s4732_s27  }
 0x896 PF: > { %p5555_p1 = scmp.ge.s32.totalorder %s5843_s26, 2  ;;  %s4769_s13 = sand.u32 1, %s5831_s23  }
 0x897   : > { %s4770_s30 = scalar_lea.sflag [#allocation4], %s4769_s13 }
 0x898   : > { %p5552_p2 = pnand %p5555_p1, %p5980_p6 }
 0x89a   : > { %5826 = dma.done.wait (!%p5552_p2), %s4770_s30, 128  }
 0x89b   : > { %5828 = vsyncadd (!%p5552_p2), %s4770_s30, 4294967168  ;;  %s7261_s22 = sld [smem:[#allocation6_spill]]  ;;  %p29_p3 = scmp.ge.s32.totalorder %s5963_s28, 4  }
 0x89c   : > { %s7262_s23 = smov %s5835_s24  ;;  %s7263_s24 = smov %s5839_s25 }
 0x89d   : > { %s7265_s26 = smov %s5963_s28  ;;  %31 = sbr.rel (!%p29_p3) target bundleno = 7 (0x7), region = 136 }
 0x8a1   : > { %s7264_s25 = smov %s7261_s22 }
 0x8a4   :  { %4775 = vsyncpa [#allocation4], 1 }
 0x8a5   :  { %4777 = vsyncpa [#allocation4 + $0x1], 1 }

</bundles_post_ra>
